<compile_context>
chip_gen: v7x
topology: tpu7x:2x2x1
jax: 0.10.0
libtpu: 0.0.40
codegen_flags: <defaults>
</compile_context>

<pallas_src>
import math

import jax
import jax.numpy as jnp
from jax.experimental import pallas as pl
from jax.experimental.pallas import tpu as pltpu  # noqa: F401  (no TPU-specific params needed at this size)

EPS = 1e-5

N_BRANCH_W = 18   # folded weights per PointNetfeat branch
N_CLS_W = 7       # folded classifier-head weights


# ---------------------------------------------------------------------------
# Parameter construction (deterministic, synthetic) + BN folding
# ---------------------------------------------------------------------------
def _fold_bn(w, b, gamma, beta, mean, var):
    """Fold eval-mode BatchNorm into a (Cin, Cout) weight / (1, Cout) bias."""
    scale = gamma / jnp.sqrt(var + EPS)
    w_f = w * scale[None, :]
    b_f = (b - mean) * scale + beta
    return w_f, b_f.reshape(1, -1)


def _init_linear(key, cin, cout, scale=0.1):
    kw, kb = jax.random.split(key)
    w = jax.random.normal(kw, (cin, cout), jnp.float32) * scale
    b = jax.random.normal(kb, (cout,), jnp.float32) * scale
    return w, b


def _init_bn(key, c):
    k1, k2, k3, k4 = jax.random.split(key, 4)
    gamma = 1.0 + 0.1 * jax.random.normal(k1, (c,), jnp.float32)
    beta = 0.1 * jax.random.normal(k2, (c,), jnp.float32)
    mean = 0.1 * jax.random.normal(k3, (c,), jnp.float32)
    var = 0.5 + jax.random.uniform(k4, (c,), jnp.float32)
    return gamma, beta, mean, var


def _init_conv_bn_stack(key, dims):
    """Conv1d(kernel=1)+BN stack, BN after every layer (folded)."""
    params = []
    keys = jax.random.split(key, len(dims) - 1)
    for k, cin, cout in zip(keys, dims[:-1], dims[1:]):
        k1, k2 = jax.random.split(k)
        w, b = _init_linear(k1, cin, cout)
        g, be, m, v = _init_bn(k2, cout)
        wf, bf = _fold_bn(w, b, g, be, m, v)
        params += [wf, bf]
    return tuple(params)


def _init_fc_stack(key, dims):
    """Linear stack with BN after every layer except the last (folded)."""
    params = []
    keys = jax.random.split(key, len(dims) - 1)
    n = len(dims) - 1
    for i, (k, cin, cout) in enumerate(zip(keys, dims[:-1], dims[1:])):
        k1, k2 = jax.random.split(k)
        w, b = _init_linear(k1, cin, cout)
        if i < n - 1:
            g, be, m, v = _init_bn(k2, cout)
            w, bf = _fold_bn(w, b, g, be, m, v)
        else:
            bf = b.reshape(1, -1)
        params += [w, bf]
    return tuple(params)


def init_pointnetfeat(key):
    k1, k2, k3 = jax.random.split(key, 3)
    stn_conv = _init_conv_bn_stack(k1, (3, 64, 128, 256))      # STN3d conv1..3 + bn1..3
    stn_fc = _init_fc_stack(k2, (256, 128, 64, 9))             # STN3d fc1..3 + bn4..5
    feat_conv = _init_conv_bn_stack(k3, (3, 64, 128, 256))     # PointNetfeat conv1..3
    return (stn_conv, stn_fc, feat_conv)


def init_dualnet(key, k=2):
    kl, kr, kc = jax.random.split(key, 3)
    left = init_pointnetfeat(kl)
    right = init_pointnetfeat(kr)
    cls = _init_fc_stack(kc, (512, 256, 64, k))                # DualNetCls fc1..3 + bn1..2
    return (left, right, cls)


# ---------------------------------------------------------------------------
# Kernel-ready parameter preparation (one-time, outside the forward)
# ---------------------------------------------------------------------------
def prepare_branch(branch_params):
    """Pad / fold / cast one PointNetfeat branch's folded params for the kernel."""
    stn_conv, stn_fc, feat_conv = branch_params
    w1s, b1s, w2s, b2s, w3s, b3s = stn_conv
    w4, b4, w5, b5, w6, b6 = stn_fc
    w1f, b1f, w2f, b2f, w3f, b3f = feat_conv
    bf16 = jnp.bfloat16
    # K-pad the first STN conv weight 3->8 (input channels are zero-filled to 8
    # inside the kernel) so layer 1 is a single MXU dot.
    w1s_pad = jnp.zeros((8, w1s.shape[1]), jnp.float32).at[:3].set(w1s)
    # Fold the 3x3 identity offset into the last STN-FC bias and lane-pad that
    # layer 9 -> 128 so t9 (and the trans output) is lane-dense.
    b6_fold = b6 + jnp.eye(3, dtype=jnp.float32).reshape(1, 9)
    w6_pad = jnp.zeros((w6.shape[0], 128), jnp.float32).at[:, :9].set(w6)
    b6_pad = jnp.zeros((1, 128), jnp.float32).at[:, :9].set(b6_fold)
    return (w1s_pad, b1s, w2s.astype(bf16), b2s, w3s.astype(bf16), b3s,
            w4, b4, w5, b5, w6_pad, b6_pad,
            w1f, b1f, w2f.astype(bf16), b2f, w3f.astype(bf16), b3f)


def prepare_cls(cls_params):
    """Split fc1 (concat removal) and lane-pad fc3 k -> 128 (dense stores)."""
    w1, b1, w2, b2, w3, b3 = cls_params
    k = w3.shape[1]
    w3_pad = jnp.zeros((w3.shape[0], 128), jnp.float32).at[:, :k].set(w3)
    b3_pad = jnp.zeros((1, 128), jnp.float32).at[:, :k].set(b3)
    return (w1[:256], w1[256:], b1, w2, b2, w3_pad, b3_pad)


def prepare_dualnet(params):
    lp, rp, cp = params
    return (prepare_branch(lp), prepare_branch(rp), prepare_cls(cp))


# ---------------------------------------------------------------------------
# The single fused kernel: left branch + right branch + classifier + log_softmax
# ---------------------------------------------------------------------------
def _make_dualnet_kernel(B, N):
    def kernel(*refs):
        xl_ref, xr_ref = refs[0], refs[1]
        lw = refs[2:2 + N_BRANCH_W]
        rw = refs[2 + N_BRANCH_W:2 + 2 * N_BRANCH_W]
        cw = refs[2 + 2 * N_BRANCH_W:2 + 2 * N_BRANCH_W + N_CLS_W]
        out_ref, t9_ref = refs[-2], refs[-1]

        f32, bf16 = jnp.float32, jnp.bfloat16
        one, zero = jnp.float32(1.0), jnp.float32(0.0)
        lane8 = jax.lax.broadcasted_iota(jnp.int32, (1, 8), 1)
        row8 = jax.lax.broadcasted_iota(jnp.int32, (8, 1), 0)
        rowB = jax.lax.broadcasted_iota(jnp.int32, (B, 1), 0)
        rowBN = jax.lax.broadcasted_iota(jnp.int32, (B * N, 1), 0)

        def pad3to8(x):
            # Zero-fill channels 3..7 in VMEM (no extra HBM pad pass).
            return (jnp.where(lane8 == 0, one, zero) * x[:, 0:1]
                    + jnp.where(lane8 == 1, one, zero) * x[:, 1:2]
                    + jnp.where(lane8 == 2, one, zero) * x[:, 2:3])

        def seg_max(h):
            # Per-batch max over the stacked point axis: (B*N, C) -> (B, C).
            out = jnp.zeros((B, h.shape[1]), f32)
            for b in range(B):  # B is tiny & static -> unrolled
                gb = jnp.max(h[b * N:(b + 1) * N, :], axis=0, keepdims=True)
                out = out + jnp.where(rowB == b, one, zero) * gb
            return out

        def branch(x_ref, w):
            (w1s, b1s, w2s, b2s, w3s, b3s,
             w4, b4, w5, b5, w6, b6,
             w1f, b1f, w2f, b2f, w3f, b3f) = w
            x8 = pad3to8(x_ref[...])                                   # (B*N, 8)

            # --- STN3d conv stack (3->64->128->256), batch-stacked (M = B*N)
            h = jnp.maximum(jnp.dot(x8, w1s[...],
                                    preferred_element_type=f32) + b1s[...], 0.0)
            h = jnp.maximum(jnp.dot(h.astype(bf16), w2s[...],
                                    preferred_element_type=f32) + b2s[...], 0.0)
            h = jnp.maximum(jnp.dot(h.astype(bf16), w3s[...],
                                    preferred_element_type=f32) + b3s[...], 0.0)
            g = seg_max(h)                                             # (B, 256)

            # --- STN3d FC head (256->128->64->9); identity folded into b6,
            #     lane-padded to 128 (lanes 0..8 hold the row-major 3x3).
            t = jnp.maximum(jnp.dot(g, w4[...],
                                    preferred_element_type=f32) + b4[...], 0.0)
            t = jnp.maximum(jnp.dot(t, w5[...],
                                    preferred_element_type=f32) + b5[...], 0.0)
            t9 = jnp.dot(t, w6[...], preferred_element_type=f32) + b6[...]  # (B,128)

            # --- torch.bmm(x, trans) folded into feat conv1:
            #     (x @ T_b) @ W1f == x @ (T_b @ W1f).  Build the (8,64) folded
            #     weight per batch element (tiny, weight-sized broadcasts) and
            #     run the per-point work as an MXU dot; rows are combined with
            #     per-batch row masks (B is tiny, so the extra masked dot rows
            #     are free; for large B use a batch grid instead).
            w1 = w1f[...]                                              # (3, 64)
            h1 = jnp.zeros((B * N, w1.shape[1]), f32)
            for b in range(B):
                tb = t9[b:b + 1, :]
                r0 = (tb[:, 0:1] * w1[0:1, :] + tb[:, 1:2] * w1[1:2, :]
                      + tb[:, 2:3] * w1[2:3, :])
                r1 = (tb[:, 3:4] * w1[0:1, :] + tb[:, 4:5] * w1[1:2, :]
                      + tb[:, 5:6] * w1[2:3, :])
                r2 = (tb[:, 6:7] * w1[0:1, :] + tb[:, 7:8] * w1[1:2, :]
                      + tb[:, 8:9] * w1[2:3, :])
                twp = (jnp.where(row8 == 0, one, zero) * r0
                       + jnp.where(row8 == 1, one, zero) * r1
                       + jnp.where(row8 == 2, one, zero) * r2)         # (8,64)
                hb = jnp.dot(x8, twp, preferred_element_type=f32)      # (B*N,64)
                in_b = (rowBN >= b * N) & (rowBN < (b + 1) * N)
                h1 = h1 + jnp.where(in_b, one, zero) * hb
            h = jnp.maximum(h1 + b1f[...], 0.0)                        # (B*N, 64)

            # --- PointNetfeat conv2/conv3 (NO ReLU after conv3, matches torch)
            h = jnp.maximum(jnp.dot(h.astype(bf16), w2f[...],
                                    preferred_element_type=f32) + b2f[...], 0.0)
            h = jnp.dot(h.astype(bf16), w3f[...],
                        preferred_element_type=f32) + b3f[...]
            return seg_max(h), t9                                      # (B,256),(B,128)

        feat_l, _ = branch(xl_ref, lw)          # left trans is never consumed
        feat_r, t9_r = branch(xr_ref, rw)       # torch keeps the RIGHT trans

        # --- Classifier head 512->256->64->k (concat removed via fc1 split),
        #     then log_softmax over dim 0 (the batch axis, as in the torch code).
        w1a, w1b, b1, w2, b2, w3, b3 = cw
        h = (jnp.dot(feat_l, w1a[...], preferred_element_type=f32)
             + jnp.dot(feat_r, w1b[...], preferred_element_type=f32) + b1[...])
        h = jnp.maximum(h, 0.0)
        h = jnp.maximum(jnp.dot(h, w2[...],
                                preferred_element_type=f32) + b2[...], 0.0)
        logits = jnp.dot(h, w3[...], preferred_element_type=f32) + b3[...]  # (B,128)
        m = jnp.max(logits, axis=0, keepdims=True)
        z = logits - m
        lse = jnp.log(jnp.sum(jnp.exp(z), axis=0, keepdims=True))
        out_ref[...] = z - lse
        t9_ref[...] = t9_r

    return kernel


def _flops_estimate(B, N):
    def mm(m, kk, n):
        return 2 * m * kk * n
    branch = (mm(B * N, 8, 64) + mm(B * N, 64, 128) + mm(B * N, 128, 256)   # STN convs
              + mm(B, 256, 128) + mm(B, 128, 64) + mm(B, 64, 128)           # STN fc
              + B * mm(B * N, 8, 64)                                        # folded transform
              + mm(B * N, 64, 128) + mm(B * N, 128, 256))                   # feat conv2/3
    head = 2 * mm(B, 256, 256) + mm(B, 256, 64) + mm(B, 64, 128)
    return 2 * branch + head


# ---------------------------------------------------------------------------
# Forward pass — ONE pallas_call total
# ---------------------------------------------------------------------------
def dualnet_forward(x_left, x_right, prepared, *, k=2):
    """x_left, x_right: (B, N, 3).  Returns (log_softmax(out, dim=0), trans)."""
    left_p, right_p, cls_p = prepared
    B, N, _ = x_left.shape
    xl = x_left.reshape(B * N, 3)
    xr = x_right.reshape(B * N, 3)
    args = (xl, xr, *left_p, *right_p, *cls_p)
    bytes_accessed = (sum(math.prod(a.shape) * a.dtype.itemsize for a in args)
                      + 2 * B * 128 * 4)
    out_pad, t9 = pl.pallas_call(
        _make_dualnet_kernel(B, N),
        out_shape=(jax.ShapeDtypeStruct((B, 128), jnp.float32),   # log_softmax (lanes 0..k-1)
                   jax.ShapeDtypeStruct((B, 128), jnp.float32)),  # right t9 (lanes 0..8)
        cost_estimate=pl.CostEstimate(flops=int(_flops_estimate(B, N)),
                                      transcendentals=int(2 * B * 128),
                                      bytes_accessed=int(bytes_accessed)),
    )(*args)
    out = out_pad[:, :k]
    trans = t9[:, :9].reshape(B, 3, 3)
    return out, trans


# ---------------------------------------------------------------------------
# Pure-JAX reference (golden f32 path on the original folded params)
# ---------------------------------------------------------------------------
_P = jax.lax.Precision.HIGHEST


def _ref_mlp_max(x, p, final_relu):
    w1, b1, w2, b2, w3, b3 = p
    h = jnp.maximum(jnp.einsum("bnc,cd->bnd", x, w1, precision=_P) + b1, 0.0)
    h = jnp.maximum(jnp.einsum("bnc,cd->bnd", h, w2, precision=_P) + b2, 0.0)
    h = jnp.einsum("bnc,cd->bnd", h, w3, precision=_P) + b3
    if final_relu:
        h = jnp.maximum(h, 0.0)
    return jnp.max(h, axis=1)


def _ref_pointnetfeat(x, p):
    stn_conv, stn_fc, feat_conv = p
    g = _ref_mlp_max(x, stn_conv, True)
    w1, b1, w2, b2, w3, b3 = stn_fc
    h = jnp.maximum(jnp.dot(g, w1, precision=_P) + b1, 0.0)
    h = jnp.maximum(jnp.dot(h, w2, precision=_P) + b2, 0.0)
    t9 = jnp.dot(h, w3, precision=_P) + b3 + jnp.eye(3, dtype=jnp.float32).reshape(1, 9)
    trans = t9.reshape(-1, 3, 3)
    xt = jnp.einsum("bni,bij->bnj", x, trans, precision=_P)
    feat = _ref_mlp_max(xt, feat_conv, False)
    return feat, trans


def ref_dualnet(xl, xr, params):
    lp, rp, cp = params
    fl, trans = _ref_pointnetfeat(xl, lp)
    fr, trans = _ref_pointnetfeat(xr, rp)
    x = jnp.concatenate([fl, fr], axis=1)
    w1, b1, w2, b2, w3, b3 = cp
    h = jnp.maximum(jnp.dot(x, w1, precision=_P) + b1, 0.0)
    h = jnp.maximum(jnp.dot(h, w2, precision=_P) + b2, 0.0)
    logits = jnp.dot(h, w3, precision=_P) + b3
    return jax.nn.log_softmax(logits, axis=0), trans


# ---------------------------------------------------------------------------
if __name__ == "__main__":
    key = jax.random.PRNGKey(0)
    k_params, k_left, k_right = jax.random.split(key, 3)

    B, N, K = 2, 32, 2                                          # batch, n points, classes
    params = init_dualnet(k_params, k=K)
    prepared = prepare_dualnet(params)                          # one-time weight prep

    # PyTorch takes (B, 3, N); kernel layout is (B, N, 3).
    x_left_ncw = jax.random.normal(k_left, (B, 3, N), jnp.float32)
    x_right_ncw = jax.random.normal(k_right, (B, 3, N), jnp.float32)
    x_left = jnp.transpose(x_left_ncw, (0, 2, 1))
    x_right = jnp.transpose(x_right_ncw, (0, 2, 1))

    fwd = jax.jit(dualnet_forward, static_argnames=("k",))
    out, trans = fwd(x_left, x_right, prepared, k=K)
    out = jax.block_until_ready(out)
    trans = jax.block_until_ready(trans)

    assert out.shape == (B, K) and trans.shape == (B, 3, 3)
    assert bool(jnp.all(jnp.isfinite(out))) and bool(jnp.all(jnp.isfinite(trans)))

    ref_out, ref_trans = ref_dualnet(x_left, x_right, params)
    # Tolerance accounts for bf16 MXU inputs (w2/w3 of both conv stacks) vs the
    # HIGHEST-precision f32 XLA reference.
    if not (jnp.allclose(out, ref_out, atol=5e-2, rtol=5e-2)
            and jnp.allclose(trans, ref_trans, atol=5e-2, rtol=5e-2)):
        raise AssertionError("Pallas result does not match JAX reference")

    print("KERNEL_OK")
</pallas_src>

<mosaic_0001>
module attributes {stable_mosaic.version = 11 : i64} {
  func.func @kernel(%arg0: memref<64x3xf32, #tpu.memory_space<vmem>>, %arg1: memref<64x3xf32, #tpu.memory_space<vmem>>, %arg2: memref<8x64xf32, #tpu.memory_space<vmem>>, %arg3: memref<1x64xf32, #tpu.memory_space<vmem>>, %arg4: memref<64x128xbf16, #tpu.memory_space<vmem>>, %arg5: memref<1x128xf32, #tpu.memory_space<vmem>>, %arg6: memref<128x256xbf16, #tpu.memory_space<vmem>>, %arg7: memref<1x256xf32, #tpu.memory_space<vmem>>, %arg8: memref<256x128xf32, #tpu.memory_space<vmem>>, %arg9: memref<1x128xf32, #tpu.memory_space<vmem>>, %arg10: memref<128x64xf32, #tpu.memory_space<vmem>>, %arg11: memref<1x64xf32, #tpu.memory_space<vmem>>, %arg12: memref<64x128xf32, #tpu.memory_space<vmem>>, %arg13: memref<1x128xf32, #tpu.memory_space<vmem>>, %arg14: memref<3x64xf32, #tpu.memory_space<vmem>>, %arg15: memref<1x64xf32, #tpu.memory_space<vmem>>, %arg16: memref<64x128xbf16, #tpu.memory_space<vmem>>, %arg17: memref<1x128xf32, #tpu.memory_space<vmem>>, %arg18: memref<128x256xbf16, #tpu.memory_space<vmem>>, %arg19: memref<1x256xf32, #tpu.memory_space<vmem>>, %arg20: memref<8x64xf32, #tpu.memory_space<vmem>>, %arg21: memref<1x64xf32, #tpu.memory_space<vmem>>, %arg22: memref<64x128xbf16, #tpu.memory_space<vmem>>, %arg23: memref<1x128xf32, #tpu.memory_space<vmem>>, %arg24: memref<128x256xbf16, #tpu.memory_space<vmem>>, %arg25: memref<1x256xf32, #tpu.memory_space<vmem>>, %arg26: memref<256x128xf32, #tpu.memory_space<vmem>>, %arg27: memref<1x128xf32, #tpu.memory_space<vmem>>, %arg28: memref<128x64xf32, #tpu.memory_space<vmem>>, %arg29: memref<1x64xf32, #tpu.memory_space<vmem>>, %arg30: memref<64x128xf32, #tpu.memory_space<vmem>>, %arg31: memref<1x128xf32, #tpu.memory_space<vmem>>, %arg32: memref<3x64xf32, #tpu.memory_space<vmem>>, %arg33: memref<1x64xf32, #tpu.memory_space<vmem>>, %arg34: memref<64x128xbf16, #tpu.memory_space<vmem>>, %arg35: memref<1x128xf32, #tpu.memory_space<vmem>>, %arg36: memref<128x256xbf16, #tpu.memory_space<vmem>>, %arg37: memref<1x256xf32, #tpu.memory_space<vmem>>, %arg38: memref<256x256xf32, #tpu.memory_space<vmem>>, %arg39: memref<256x256xf32, #tpu.memory_space<vmem>>, %arg40: memref<1x256xf32, #tpu.memory_space<vmem>>, %arg41: memref<256x64xf32, #tpu.memory_space<vmem>>, %arg42: memref<1x64xf32, #tpu.memory_space<vmem>>, %arg43: memref<64x128xf32, #tpu.memory_space<vmem>>, %arg44: memref<1x128xf32, #tpu.memory_space<vmem>>, %arg45: memref<2x128xf32, #tpu.memory_space<vmem>>, %arg46: memref<2x128xf32, #tpu.memory_space<vmem>>) attributes {dimension_semantics = [], scalar_prefetch = 0 : i64, scratch_operands = 0 : i64, tpu.core_type = #tpu.core_type<tc>} {
    %0 = tpu.iota {dimensions = array<i32: 1>} : vector<1x8xi32>
    %1 = tpu.iota {dimensions = array<i32: 0>} : vector<8x1xi32>
    %2 = tpu.iota {dimensions = array<i32: 0>} : vector<2x1xi32>
    %3 = tpu.iota {dimensions = array<i32: 0>} : vector<64x1xi32>
    %c0 = arith.constant 0 : index
    %c0_0 = arith.constant 0 : index
    %4 = vector.load %arg0[%c0, %c0_0] : memref<64x3xf32, #tpu.memory_space<vmem>>, vector<64x3xf32>
    %c0_i32 = arith.constant 0 : i32
    %5 = vector.broadcast %c0_i32 : i32 to vector<1x8xi32>
    %6 = arith.cmpi eq, %0, %5 : vector<1x8xi32>
    %cst = arith.constant 1.000000e+00 : f32
    %cst_1 = arith.constant 0.000000e+00 : f32
    %7 = vector.broadcast %cst : f32 to vector<1x8xf32>
    %8 = vector.broadcast %cst_1 : f32 to vector<1x8xf32>
    %9 = arith.select %6, %7, %8 : vector<1x8xi1>, vector<1x8xf32>
    %10 = vector.extract_strided_slice %4 {offsets = [0, 0], sizes = [64, 1], strides = [1, 1]} : vector<64x3xf32> to vector<64x1xf32>
    %11 = vector.broadcast %9 : vector<1x8xf32> to vector<64x8xf32>
    %12 = vector.broadcast %10 : vector<64x1xf32> to vector<64x8xf32>
    %13 = arith.mulf %11, %12 : vector<64x8xf32>
    %c1_i32 = arith.constant 1 : i32
    %14 = vector.broadcast %c1_i32 : i32 to vector<1x8xi32>
    %15 = arith.cmpi eq, %0, %14 : vector<1x8xi32>
    %cst_2 = arith.constant 1.000000e+00 : f32
    %cst_3 = arith.constant 0.000000e+00 : f32
    %16 = vector.broadcast %cst_2 : f32 to vector<1x8xf32>
    %17 = vector.broadcast %cst_3 : f32 to vector<1x8xf32>
    %18 = arith.select %15, %16, %17 : vector<1x8xi1>, vector<1x8xf32>
    %19 = vector.extract_strided_slice %4 {offsets = [0, 1], sizes = [64, 1], strides = [1, 1]} : vector<64x3xf32> to vector<64x1xf32>
    %20 = vector.broadcast %18 : vector<1x8xf32> to vector<64x8xf32>
    %21 = vector.broadcast %19 : vector<64x1xf32> to vector<64x8xf32>
    %22 = arith.mulf %20, %21 : vector<64x8xf32>
    %23 = arith.addf %13, %22 : vector<64x8xf32>
    %c2_i32 = arith.constant 2 : i32
    %24 = vector.broadcast %c2_i32 : i32 to vector<1x8xi32>
    %25 = arith.cmpi eq, %0, %24 : vector<1x8xi32>
    %cst_4 = arith.constant 1.000000e+00 : f32
    %cst_5 = arith.constant 0.000000e+00 : f32
    %26 = vector.broadcast %cst_4 : f32 to vector<1x8xf32>
    %27 = vector.broadcast %cst_5 : f32 to vector<1x8xf32>
    %28 = arith.select %25, %26, %27 : vector<1x8xi1>, vector<1x8xf32>
    %29 = vector.extract_strided_slice %4 {offsets = [0, 2], sizes = [64, 1], strides = [1, 1]} : vector<64x3xf32> to vector<64x1xf32>
    %30 = vector.broadcast %28 : vector<1x8xf32> to vector<64x8xf32>
    %31 = vector.broadcast %29 : vector<64x1xf32> to vector<64x8xf32>
    %32 = arith.mulf %30, %31 : vector<64x8xf32>
    %33 = arith.addf %23, %32 : vector<64x8xf32>
    %c0_6 = arith.constant 0 : index
    %c0_7 = arith.constant 0 : index
    %34 = vector.load %arg2[%c0_6, %c0_7] : memref<8x64xf32, #tpu.memory_space<vmem>>, vector<8x64xf32>
    %cst_8 = arith.constant dense<0.000000e+00> : vector<64x64xf32>
    %35 = tpu.matmul %33, %34, %cst_8 {dimension_numbers = #tpu.dot_dimension_numbers<[1], [0], [0], [1], [0, 0, 1, 1], [], []>} : vector<64x8xf32>, vector<8x64xf32>, vector<64x64xf32> -> vector<64x64xf32>
    %c0_9 = arith.constant 0 : index
    %c0_10 = arith.constant 0 : index
    %36 = vector.load %arg3[%c0_9, %c0_10] : memref<1x64xf32, #tpu.memory_space<vmem>>, vector<1x64xf32>
    %37 = vector.broadcast %36 : vector<1x64xf32> to vector<64x64xf32>
    %38 = arith.addf %35, %37 : vector<64x64xf32>
    %cst_11 = arith.constant 0.000000e+00 : f32
    %39 = vector.broadcast %cst_11 : f32 to vector<64x64xf32>
    %40 = arith.maximumf %38, %39 : vector<64x64xf32>
    %41 = arith.truncf %40 : vector<64x64xf32> to vector<64x64xbf16>
    %c0_12 = arith.constant 0 : index
    %c0_13 = arith.constant 0 : index
    %42 = vector.load %arg4[%c0_12, %c0_13] : memref<64x128xbf16, #tpu.memory_space<vmem>>, vector<64x128xbf16>
    %cst_14 = arith.constant dense<0.000000e+00> : vector<64x128xf32>
    %43 = tpu.matmul %41, %42, %cst_14 {dimension_numbers = #tpu.dot_dimension_numbers<[1], [0], [0], [1], [0, 0, 1, 1], [], []>} : vector<64x64xbf16>, vector<64x128xbf16>, vector<64x128xf32> -> vector<64x128xf32>
    %c0_15 = arith.constant 0 : index
    %c0_16 = arith.constant 0 : index
    %44 = vector.load %arg5[%c0_15, %c0_16] : memref<1x128xf32, #tpu.memory_space<vmem>>, vector<1x128xf32>
    %45 = vector.broadcast %44 : vector<1x128xf32> to vector<64x128xf32>
    %46 = arith.addf %43, %45 : vector<64x128xf32>
    %cst_17 = arith.constant 0.000000e+00 : f32
    %47 = vector.broadcast %cst_17 : f32 to vector<64x128xf32>
    %48 = arith.maximumf %46, %47 : vector<64x128xf32>
    %49 = arith.truncf %48 : vector<64x128xf32> to vector<64x128xbf16>
    %c0_18 = arith.constant 0 : index
    %c0_19 = arith.constant 0 : index
    %50 = vector.load %arg6[%c0_18, %c0_19] : memref<128x256xbf16, #tpu.memory_space<vmem>>, vector<128x256xbf16>
    %cst_20 = arith.constant dense<0.000000e+00> : vector<64x256xf32>
    %51 = tpu.matmul %49, %50, %cst_20 {dimension_numbers = #tpu.dot_dimension_numbers<[1], [0], [0], [1], [0, 0, 1, 1], [], []>} : vector<64x128xbf16>, vector<128x256xbf16>, vector<64x256xf32> -> vector<64x256xf32>
    %c0_21 = arith.constant 0 : index
    %c0_22 = arith.constant 0 : index
    %52 = vector.load %arg7[%c0_21, %c0_22] : memref<1x256xf32, #tpu.memory_space<vmem>>, vector<1x256xf32>
    %53 = vector.broadcast %52 : vector<1x256xf32> to vector<64x256xf32>
    %54 = arith.addf %51, %53 : vector<64x256xf32>
    %cst_23 = arith.constant 0.000000e+00 : f32
    %55 = vector.broadcast %cst_23 : f32 to vector<64x256xf32>
    %56 = arith.maximumf %54, %55 : vector<64x256xf32>
    %cst_24 = arith.constant 0.000000e+00 : f32
    %57 = vector.broadcast %cst_24 : f32 to vector<2x256xf32>
    %58 = vector.extract_strided_slice %56 {offsets = [0, 0], sizes = [32, 256], strides = [1, 1]} : vector<64x256xf32> to vector<32x256xf32>
    %cst_25 = arith.constant dense<0xFF800000> : vector<256xf32>
    %59 = vector.multi_reduction <maximumf>, %58, %cst_25 [0] : vector<32x256xf32> to vector<256xf32>
    %60 = vector.shape_cast %59 : vector<256xf32> to vector<1x256xf32>
    %c0_i32_26 = arith.constant 0 : i32
    %61 = vector.broadcast %c0_i32_26 : i32 to vector<2x1xi32>
    %62 = arith.cmpi eq, %2, %61 : vector<2x1xi32>
    %cst_27 = arith.constant 1.000000e+00 : f32
    %cst_28 = arith.constant 0.000000e+00 : f32
    %63 = vector.broadcast %cst_27 : f32 to vector<2x1xf32>
    %64 = vector.broadcast %cst_28 : f32 to vector<2x1xf32>
    %65 = arith.select %62, %63, %64 : vector<2x1xi1>, vector<2x1xf32>
    %66 = vector.broadcast %65 : vector<2x1xf32> to vector<2x256xf32>
    %67 = vector.broadcast %60 : vector<1x256xf32> to vector<2x256xf32>
    %68 = arith.mulf %66, %67 : vector<2x256xf32>
    %69 = arith.addf %57, %68 : vector<2x256xf32>
    %70 = vector.extract_strided_slice %56 {offsets = [32, 0], sizes = [32, 256], strides = [1, 1]} : vector<64x256xf32> to vector<32x256xf32>
    %cst_29 = arith.constant dense<0xFF800000> : vector<256xf32>
    %71 = vector.multi_reduction <maximumf>, %70, %cst_29 [0] : vector<32x256xf32> to vector<256xf32>
    %72 = vector.shape_cast %71 : vector<256xf32> to vector<1x256xf32>
    %c1_i32_30 = arith.constant 1 : i32
    %73 = vector.broadcast %c1_i32_30 : i32 to vector<2x1xi32>
    %74 = arith.cmpi eq, %2, %73 : vector<2x1xi32>
    %cst_31 = arith.constant 1.000000e+00 : f32
    %cst_32 = arith.constant 0.000000e+00 : f32
    %75 = vector.broadcast %cst_31 : f32 to vector<2x1xf32>
    %76 = vector.broadcast %cst_32 : f32 to vector<2x1xf32>
    %77 = arith.select %74, %75, %76 : vector<2x1xi1>, vector<2x1xf32>
    %78 = vector.broadcast %77 : vector<2x1xf32> to vector<2x256xf32>
    %79 = vector.broadcast %72 : vector<1x256xf32> to vector<2x256xf32>
    %80 = arith.mulf %78, %79 : vector<2x256xf32>
    %81 = arith.addf %69, %80 : vector<2x256xf32>
    %c0_33 = arith.constant 0 : index
    %c0_34 = arith.constant 0 : index
    %82 = vector.load %arg8[%c0_33, %c0_34] : memref<256x128xf32, #tpu.memory_space<vmem>>, vector<256x128xf32>
    %cst_35 = arith.constant dense<0.000000e+00> : vector<2x128xf32>
    %83 = tpu.matmul %81, %82, %cst_35 {dimension_numbers = #tpu.dot_dimension_numbers<[1], [0], [0], [1], [0, 0, 1, 1], [], []>} : vector<2x256xf32>, vector<256x128xf32>, vector<2x128xf32> -> vector<2x128xf32>
    %c0_36 = arith.constant 0 : index
    %c0_37 = arith.constant 0 : index
    %84 = vector.load %arg9[%c0_36, %c0_37] : memref<1x128xf32, #tpu.memory_space<vmem>>, vector<1x128xf32>
    %85 = vector.broadcast %84 : vector<1x128xf32> to vector<2x128xf32>
    %86 = arith.addf %83, %85 : vector<2x128xf32>
    %cst_38 = arith.constant 0.000000e+00 : f32
    %87 = vector.broadcast %cst_38 : f32 to vector<2x128xf32>
    %88 = arith.maximumf %86, %87 : vector<2x128xf32>
    %c0_39 = arith.constant 0 : index
    %c0_40 = arith.constant 0 : index
    %89 = vector.load %arg10[%c0_39, %c0_40] : memref<128x64xf32, #tpu.memory_space<vmem>>, vector<128x64xf32>
    %cst_41 = arith.constant dense<0.000000e+00> : vector<2x64xf32>
    %90 = tpu.matmul %88, %89, %cst_41 {dimension_numbers = #tpu.dot_dimension_numbers<[1], [0], [0], [1], [0, 0, 1, 1], [], []>} : vector<2x128xf32>, vector<128x64xf32>, vector<2x64xf32> -> vector<2x64xf32>
    %c0_42 = arith.constant 0 : index
    %c0_43 = arith.constant 0 : index
    %91 = vector.load %arg11[%c0_42, %c0_43] : memref<1x64xf32, #tpu.memory_space<vmem>>, vector<1x64xf32>
    %92 = vector.broadcast %91 : vector<1x64xf32> to vector<2x64xf32>
    %93 = arith.addf %90, %92 : vector<2x64xf32>
    %cst_44 = arith.constant 0.000000e+00 : f32
    %94 = vector.broadcast %cst_44 : f32 to vector<2x64xf32>
    %95 = arith.maximumf %93, %94 : vector<2x64xf32>
    %c0_45 = arith.constant 0 : index
    %c0_46 = arith.constant 0 : index
    %96 = vector.load %arg12[%c0_45, %c0_46] : memref<64x128xf32, #tpu.memory_space<vmem>>, vector<64x128xf32>
    %cst_47 = arith.constant dense<0.000000e+00> : vector<2x128xf32>
    %97 = tpu.matmul %95, %96, %cst_47 {dimension_numbers = #tpu.dot_dimension_numbers<[1], [0], [0], [1], [0, 0, 1, 1], [], []>} : vector<2x64xf32>, vector<64x128xf32>, vector<2x128xf32> -> vector<2x128xf32>
    %c0_48 = arith.constant 0 : index
    %c0_49 = arith.constant 0 : index
    %98 = vector.load %arg13[%c0_48, %c0_49] : memref<1x128xf32, #tpu.memory_space<vmem>>, vector<1x128xf32>
    %99 = vector.broadcast %98 : vector<1x128xf32> to vector<2x128xf32>
    %100 = arith.addf %97, %99 : vector<2x128xf32>
    %c0_50 = arith.constant 0 : index
    %c0_51 = arith.constant 0 : index
    %101 = vector.load %arg14[%c0_50, %c0_51] : memref<3x64xf32, #tpu.memory_space<vmem>>, vector<3x64xf32>
    %cst_52 = arith.constant 0.000000e+00 : f32
    %102 = vector.broadcast %cst_52 : f32 to vector<64x64xf32>
    %103 = vector.extract_strided_slice %100 {offsets = [0, 0], sizes = [1, 128], strides = [1, 1]} : vector<2x128xf32> to vector<1x128xf32>
    %104 = vector.extract_strided_slice %103 {offsets = [0, 0], sizes = [1, 1], strides = [1, 1]} : vector<1x128xf32> to vector<1x1xf32>
    %105 = vector.extract_strided_slice %101 {offsets = [0, 0], sizes = [1, 64], strides = [1, 1]} : vector<3x64xf32> to vector<1x64xf32>
    %106 = vector.broadcast %104 : vector<1x1xf32> to vector<1x64xf32>
    %107 = arith.mulf %106, %105 : vector<1x64xf32>
    %108 = vector.extract_strided_slice %103 {offsets = [0, 1], sizes = [1, 1], strides = [1, 1]} : vector<1x128xf32> to vector<1x1xf32>
    %109 = vector.extract_strided_slice %101 {offsets = [1, 0], sizes = [1, 64], strides = [1, 1]} : vector<3x64xf32> to vector<1x64xf32>
    %110 = vector.broadcast %108 : vector<1x1xf32> to vector<1x64xf32>
    %111 = arith.mulf %110, %109 : vector<1x64xf32>
    %112 = arith.addf %107, %111 : vector<1x64xf32>
    %113 = vector.extract_strided_slice %103 {offsets = [0, 2], sizes = [1, 1], strides = [1, 1]} : vector<1x128xf32> to vector<1x1xf32>
    %114 = vector.extract_strided_slice %101 {offsets = [2, 0], sizes = [1, 64], strides = [1, 1]} : vector<3x64xf32> to vector<1x64xf32>
    %115 = vector.broadcast %113 : vector<1x1xf32> to vector<1x64xf32>
    %116 = arith.mulf %115, %114 : vector<1x64xf32>
    %117 = arith.addf %112, %116 : vector<1x64xf32>
    %118 = vector.extract_strided_slice %103 {offsets = [0, 3], sizes = [1, 1], strides = [1, 1]} : vector<1x128xf32> to vector<1x1xf32>
    %119 = vector.extract_strided_slice %101 {offsets = [0, 0], sizes = [1, 64], strides = [1, 1]} : vector<3x64xf32> to vector<1x64xf32>
    %120 = vector.broadcast %118 : vector<1x1xf32> to vector<1x64xf32>
    %121 = arith.mulf %120, %119 : vector<1x64xf32>
    %122 = vector.extract_strided_slice %103 {offsets = [0, 4], sizes = [1, 1], strides = [1, 1]} : vector<1x128xf32> to vector<1x1xf32>
    %123 = vector.extract_strided_slice %101 {offsets = [1, 0], sizes = [1, 64], strides = [1, 1]} : vector<3x64xf32> to vector<1x64xf32>
    %124 = vector.broadcast %122 : vector<1x1xf32> to vector<1x64xf32>
    %125 = arith.mulf %124, %123 : vector<1x64xf32>
    %126 = arith.addf %121, %125 : vector<1x64xf32>
    %127 = vector.extract_strided_slice %103 {offsets = [0, 5], sizes = [1, 1], strides = [1, 1]} : vector<1x128xf32> to vector<1x1xf32>
    %128 = vector.extract_strided_slice %101 {offsets = [2, 0], sizes = [1, 64], strides = [1, 1]} : vector<3x64xf32> to vector<1x64xf32>
    %129 = vector.broadcast %127 : vector<1x1xf32> to vector<1x64xf32>
    %130 = arith.mulf %129, %128 : vector<1x64xf32>
    %131 = arith.addf %126, %130 : vector<1x64xf32>
    %132 = vector.extract_strided_slice %103 {offsets = [0, 6], sizes = [1, 1], strides = [1, 1]} : vector<1x128xf32> to vector<1x1xf32>
    %133 = vector.extract_strided_slice %101 {offsets = [0, 0], sizes = [1, 64], strides = [1, 1]} : vector<3x64xf32> to vector<1x64xf32>
    %134 = vector.broadcast %132 : vector<1x1xf32> to vector<1x64xf32>
    %135 = arith.mulf %134, %133 : vector<1x64xf32>
    %136 = vector.extract_strided_slice %103 {offsets = [0, 7], sizes = [1, 1], strides = [1, 1]} : vector<1x128xf32> to vector<1x1xf32>
    %137 = vector.extract_strided_slice %101 {offsets = [1, 0], sizes = [1, 64], strides = [1, 1]} : vector<3x64xf32> to vector<1x64xf32>
    %138 = vector.broadcast %136 : vector<1x1xf32> to vector<1x64xf32>
    %139 = arith.mulf %138, %137 : vector<1x64xf32>
    %140 = arith.addf %135, %139 : vector<1x64xf32>
    %141 = vector.extract_strided_slice %103 {offsets = [0, 8], sizes = [1, 1], strides = [1, 1]} : vector<1x128xf32> to vector<1x1xf32>
    %142 = vector.extract_strided_slice %101 {offsets = [2, 0], sizes = [1, 64], strides = [1, 1]} : vector<3x64xf32> to vector<1x64xf32>
    %143 = vector.broadcast %141 : vector<1x1xf32> to vector<1x64xf32>
    %144 = arith.mulf %143, %142 : vector<1x64xf32>
    %145 = arith.addf %140, %144 : vector<1x64xf32>
    %c0_i32_53 = arith.constant 0 : i32
    %146 = vector.broadcast %c0_i32_53 : i32 to vector<8x1xi32>
    %147 = arith.cmpi eq, %1, %146 : vector<8x1xi32>
    %cst_54 = arith.constant 1.000000e+00 : f32
    %cst_55 = arith.constant 0.000000e+00 : f32
    %148 = vector.broadcast %cst_54 : f32 to vector<8x1xf32>
    %149 = vector.broadcast %cst_55 : f32 to vector<8x1xf32>
    %150 = arith.select %147, %148, %149 : vector<8x1xi1>, vector<8x1xf32>
    %151 = vector.broadcast %150 : vector<8x1xf32> to vector<8x64xf32>
    %152 = vector.broadcast %117 : vector<1x64xf32> to vector<8x64xf32>
    %153 = arith.mulf %151, %152 : vector<8x64xf32>
    %c1_i32_56 = arith.constant 1 : i32
    %154 = vector.broadcast %c1_i32_56 : i32 to vector<8x1xi32>
    %155 = arith.cmpi eq, %1, %154 : vector<8x1xi32>
    %cst_57 = arith.constant 1.000000e+00 : f32
    %cst_58 = arith.constant 0.000000e+00 : f32
    %156 = vector.broadcast %cst_57 : f32 to vector<8x1xf32>
    %157 = vector.broadcast %cst_58 : f32 to vector<8x1xf32>
    %158 = arith.select %155, %156, %157 : vector<8x1xi1>, vector<8x1xf32>
    %159 = vector.broadcast %158 : vector<8x1xf32> to vector<8x64xf32>
    %160 = vector.broadcast %131 : vector<1x64xf32> to vector<8x64xf32>
    %161 = arith.mulf %159, %160 : vector<8x64xf32>
    %162 = arith.addf %153, %161 : vector<8x64xf32>
    %c2_i32_59 = arith.constant 2 : i32
    %163 = vector.broadcast %c2_i32_59 : i32 to vector<8x1xi32>
    %164 = arith.cmpi eq, %1, %163 : vector<8x1xi32>
    %cst_60 = arith.constant 1.000000e+00 : f32
    %cst_61 = arith.constant 0.000000e+00 : f32
    %165 = vector.broadcast %cst_60 : f32 to vector<8x1xf32>
    %166 = vector.broadcast %cst_61 : f32 to vector<8x1xf32>
    %167 = arith.select %164, %165, %166 : vector<8x1xi1>, vector<8x1xf32>
    %168 = vector.broadcast %167 : vector<8x1xf32> to vector<8x64xf32>
    %169 = vector.broadcast %145 : vector<1x64xf32> to vector<8x64xf32>
    %170 = arith.mulf %168, %169 : vector<8x64xf32>
    %171 = arith.addf %162, %170 : vector<8x64xf32>
    %cst_62 = arith.constant dense<0.000000e+00> : vector<64x64xf32>
    %172 = tpu.matmul %33, %171, %cst_62 {dimension_numbers = #tpu.dot_dimension_numbers<[1], [0], [0], [1], [0, 0, 1, 1], [], []>} : vector<64x8xf32>, vector<8x64xf32>, vector<64x64xf32> -> vector<64x64xf32>
    %c0_i32_63 = arith.constant 0 : i32
    %173 = vector.broadcast %c0_i32_63 : i32 to vector<64x1xi32>
    %174 = arith.cmpi sge, %3, %173 : vector<64x1xi32>
    %c32_i32 = arith.constant 32 : i32
    %175 = vector.broadcast %c32_i32 : i32 to vector<64x1xi32>
    %176 = arith.cmpi slt, %3, %175 : vector<64x1xi32>
    %177 = arith.andi %174, %176 : vector<64x1xi1>
    %cst_64 = arith.constant 1.000000e+00 : f32
    %cst_65 = arith.constant 0.000000e+00 : f32
    %178 = vector.broadcast %cst_64 : f32 to vector<64x1xf32>
    %179 = vector.broadcast %cst_65 : f32 to vector<64x1xf32>
    %180 = arith.select %177, %178, %179 : vector<64x1xi1>, vector<64x1xf32>
    %181 = vector.broadcast %180 : vector<64x1xf32> to vector<64x64xf32>
    %182 = arith.mulf %181, %172 : vector<64x64xf32>
    %183 = arith.addf %102, %182 : vector<64x64xf32>
    %184 = vector.extract_strided_slice %100 {offsets = [1, 0], sizes = [1, 128], strides = [1, 1]} : vector<2x128xf32> to vector<1x128xf32>
    %185 = vector.extract_strided_slice %184 {offsets = [0, 0], sizes = [1, 1], strides = [1, 1]} : vector<1x128xf32> to vector<1x1xf32>
    %186 = vector.extract_strided_slice %101 {offsets = [0, 0], sizes = [1, 64], strides = [1, 1]} : vector<3x64xf32> to vector<1x64xf32>
    %187 = vector.broadcast %185 : vector<1x1xf32> to vector<1x64xf32>
    %188 = arith.mulf %187, %186 : vector<1x64xf32>
    %189 = vector.extract_strided_slice %184 {offsets = [0, 1], sizes = [1, 1], strides = [1, 1]} : vector<1x128xf32> to vector<1x1xf32>
    %190 = vector.extract_strided_slice %101 {offsets = [1, 0], sizes = [1, 64], strides = [1, 1]} : vector<3x64xf32> to vector<1x64xf32>
    %191 = vector.broadcast %189 : vector<1x1xf32> to vector<1x64xf32>
    %192 = arith.mulf %191, %190 : vector<1x64xf32>
    %193 = arith.addf %188, %192 : vector<1x64xf32>
    %194 = vector.extract_strided_slice %184 {offsets = [0, 2], sizes = [1, 1], strides = [1, 1]} : vector<1x128xf32> to vector<1x1xf32>
    %195 = vector.extract_strided_slice %101 {offsets = [2, 0], sizes = [1, 64], strides = [1, 1]} : vector<3x64xf32> to vector<1x64xf32>
    %196 = vector.broadcast %194 : vector<1x1xf32> to vector<1x64xf32>
    %197 = arith.mulf %196, %195 : vector<1x64xf32>
    %198 = arith.addf %193, %197 : vector<1x64xf32>
    %199 = vector.extract_strided_slice %184 {offsets = [0, 3], sizes = [1, 1], strides = [1, 1]} : vector<1x128xf32> to vector<1x1xf32>
    %200 = vector.extract_strided_slice %101 {offsets = [0, 0], sizes = [1, 64], strides = [1, 1]} : vector<3x64xf32> to vector<1x64xf32>
    %201 = vector.broadcast %199 : vector<1x1xf32> to vector<1x64xf32>
    %202 = arith.mulf %201, %200 : vector<1x64xf32>
    %203 = vector.extract_strided_slice %184 {offsets = [0, 4], sizes = [1, 1], strides = [1, 1]} : vector<1x128xf32> to vector<1x1xf32>
    %204 = vector.extract_strided_slice %101 {offsets = [1, 0], sizes = [1, 64], strides = [1, 1]} : vector<3x64xf32> to vector<1x64xf32>
    %205 = vector.broadcast %203 : vector<1x1xf32> to vector<1x64xf32>
    %206 = arith.mulf %205, %204 : vector<1x64xf32>
    %207 = arith.addf %202, %206 : vector<1x64xf32>
    %208 = vector.extract_strided_slice %184 {offsets = [0, 5], sizes = [1, 1], strides = [1, 1]} : vector<1x128xf32> to vector<1x1xf32>
    %209 = vector.extract_strided_slice %101 {offsets = [2, 0], sizes = [1, 64], strides = [1, 1]} : vector<3x64xf32> to vector<1x64xf32>
    %210 = vector.broadcast %208 : vector<1x1xf32> to vector<1x64xf32>
    %211 = arith.mulf %210, %209 : vector<1x64xf32>
    %212 = arith.addf %207, %211 : vector<1x64xf32>
    %213 = vector.extract_strided_slice %184 {offsets = [0, 6], sizes = [1, 1], strides = [1, 1]} : vector<1x128xf32> to vector<1x1xf32>
    %214 = vector.extract_strided_slice %101 {offsets = [0, 0], sizes = [1, 64], strides = [1, 1]} : vector<3x64xf32> to vector<1x64xf32>
    %215 = vector.broadcast %213 : vector<1x1xf32> to vector<1x64xf32>
    %216 = arith.mulf %215, %214 : vector<1x64xf32>
    %217 = vector.extract_strided_slice %184 {offsets = [0, 7], sizes = [1, 1], strides = [1, 1]} : vector<1x128xf32> to vector<1x1xf32>
    %218 = vector.extract_strided_slice %101 {offsets = [1, 0], sizes = [1, 64], strides = [1, 1]} : vector<3x64xf32> to vector<1x64xf32>
    %219 = vector.broadcast %217 : vector<1x1xf32> to vector<1x64xf32>
    %220 = arith.mulf %219, %218 : vector<1x64xf32>
    %221 = arith.addf %216, %220 : vector<1x64xf32>
    %222 = vector.extract_strided_slice %184 {offsets = [0, 8], sizes = [1, 1], strides = [1, 1]} : vector<1x128xf32> to vector<1x1xf32>
    %223 = vector.extract_strided_slice %101 {offsets = [2, 0], sizes = [1, 64], strides = [1, 1]} : vector<3x64xf32> to vector<1x64xf32>
    %224 = vector.broadcast %222 : vector<1x1xf32> to vector<1x64xf32>
    %225 = arith.mulf %224, %223 : vector<1x64xf32>
    %226 = arith.addf %221, %225 : vector<1x64xf32>
    %c0_i32_66 = arith.constant 0 : i32
    %227 = vector.broadcast %c0_i32_66 : i32 to vector<8x1xi32>
    %228 = arith.cmpi eq, %1, %227 : vector<8x1xi32>
    %cst_67 = arith.constant 1.000000e+00 : f32
    %cst_68 = arith.constant 0.000000e+00 : f32
    %229 = vector.broadcast %cst_67 : f32 to vector<8x1xf32>
    %230 = vector.broadcast %cst_68 : f32 to vector<8x1xf32>
    %231 = arith.select %228, %229, %230 : vector<8x1xi1>, vector<8x1xf32>
    %232 = vector.broadcast %231 : vector<8x1xf32> to vector<8x64xf32>
    %233 = vector.broadcast %198 : vector<1x64xf32> to vector<8x64xf32>
    %234 = arith.mulf %232, %233 : vector<8x64xf32>
    %c1_i32_69 = arith.constant 1 : i32
    %235 = vector.broadcast %c1_i32_69 : i32 to vector<8x1xi32>
    %236 = arith.cmpi eq, %1, %235 : vector<8x1xi32>
    %cst_70 = arith.constant 1.000000e+00 : f32
    %cst_71 = arith.constant 0.000000e+00 : f32
    %237 = vector.broadcast %cst_70 : f32 to vector<8x1xf32>
    %238 = vector.broadcast %cst_71 : f32 to vector<8x1xf32>
    %239 = arith.select %236, %237, %238 : vector<8x1xi1>, vector<8x1xf32>
    %240 = vector.broadcast %239 : vector<8x1xf32> to vector<8x64xf32>
    %241 = vector.broadcast %212 : vector<1x64xf32> to vector<8x64xf32>
    %242 = arith.mulf %240, %241 : vector<8x64xf32>
    %243 = arith.addf %234, %242 : vector<8x64xf32>
    %c2_i32_72 = arith.constant 2 : i32
    %244 = vector.broadcast %c2_i32_72 : i32 to vector<8x1xi32>
    %245 = arith.cmpi eq, %1, %244 : vector<8x1xi32>
    %cst_73 = arith.constant 1.000000e+00 : f32
    %cst_74 = arith.constant 0.000000e+00 : f32
    %246 = vector.broadcast %cst_73 : f32 to vector<8x1xf32>
    %247 = vector.broadcast %cst_74 : f32 to vector<8x1xf32>
    %248 = arith.select %245, %246, %247 : vector<8x1xi1>, vector<8x1xf32>
    %249 = vector.broadcast %248 : vector<8x1xf32> to vector<8x64xf32>
    %250 = vector.broadcast %226 : vector<1x64xf32> to vector<8x64xf32>
    %251 = arith.mulf %249, %250 : vector<8x64xf32>
    %252 = arith.addf %243, %251 : vector<8x64xf32>
    %cst_75 = arith.constant dense<0.000000e+00> : vector<64x64xf32>
    %253 = tpu.matmul %33, %252, %cst_75 {dimension_numbers = #tpu.dot_dimension_numbers<[1], [0], [0], [1], [0, 0, 1, 1], [], []>} : vector<64x8xf32>, vector<8x64xf32>, vector<64x64xf32> -> vector<64x64xf32>
    %c32_i32_76 = arith.constant 32 : i32
    %254 = vector.broadcast %c32_i32_76 : i32 to vector<64x1xi32>
    %255 = arith.cmpi sge, %3, %254 : vector<64x1xi32>
    %c64_i32 = arith.constant 64 : i32
    %256 = vector.broadcast %c64_i32 : i32 to vector<64x1xi32>
    %257 = arith.cmpi slt, %3, %256 : vector<64x1xi32>
    %258 = arith.andi %255, %257 : vector<64x1xi1>
    %cst_77 = arith.constant 1.000000e+00 : f32
    %cst_78 = arith.constant 0.000000e+00 : f32
    %259 = vector.broadcast %cst_77 : f32 to vector<64x1xf32>
    %260 = vector.broadcast %cst_78 : f32 to vector<64x1xf32>
    %261 = arith.select %258, %259, %260 : vector<64x1xi1>, vector<64x1xf32>
    %262 = vector.broadcast %261 : vector<64x1xf32> to vector<64x64xf32>
    %263 = arith.mulf %262, %253 : vector<64x64xf32>
    %264 = arith.addf %183, %263 : vector<64x64xf32>
    %c0_79 = arith.constant 0 : index
    %c0_80 = arith.constant 0 : index
    %265 = vector.load %arg15[%c0_79, %c0_80] : memref<1x64xf32, #tpu.memory_space<vmem>>, vector<1x64xf32>
    %266 = vector.broadcast %265 : vector<1x64xf32> to vector<64x64xf32>
    %267 = arith.addf %264, %266 : vector<64x64xf32>
    %cst_81 = arith.constant 0.000000e+00 : f32
    %268 = vector.broadcast %cst_81 : f32 to vector<64x64xf32>
    %269 = arith.maximumf %267, %268 : vector<64x64xf32>
    %270 = arith.truncf %269 : vector<64x64xf32> to vector<64x64xbf16>
    %c0_82 = arith.constant 0 : index
    %c0_83 = arith.constant 0 : index
    %271 = vector.load %arg16[%c0_82, %c0_83] : memref<64x128xbf16, #tpu.memory_space<vmem>>, vector<64x128xbf16>
    %cst_84 = arith.constant dense<0.000000e+00> : vector<64x128xf32>
    %272 = tpu.matmul %270, %271, %cst_84 {dimension_numbers = #tpu.dot_dimension_numbers<[1], [0], [0], [1], [0, 0, 1, 1], [], []>} : vector<64x64xbf16>, vector<64x128xbf16>, vector<64x128xf32> -> vector<64x128xf32>
    %c0_85 = arith.constant 0 : index
    %c0_86 = arith.constant 0 : index
    %273 = vector.load %arg17[%c0_85, %c0_86] : memref<1x128xf32, #tpu.memory_space<vmem>>, vector<1x128xf32>
    %274 = vector.broadcast %273 : vector<1x128xf32> to vector<64x128xf32>
    %275 = arith.addf %272, %274 : vector<64x128xf32>
    %cst_87 = arith.constant 0.000000e+00 : f32
    %276 = vector.broadcast %cst_87 : f32 to vector<64x128xf32>
    %277 = arith.maximumf %275, %276 : vector<64x128xf32>
    %278 = arith.truncf %277 : vector<64x128xf32> to vector<64x128xbf16>
    %c0_88 = arith.constant 0 : index
    %c0_89 = arith.constant 0 : index
    %279 = vector.load %arg18[%c0_88, %c0_89] : memref<128x256xbf16, #tpu.memory_space<vmem>>, vector<128x256xbf16>
    %cst_90 = arith.constant dense<0.000000e+00> : vector<64x256xf32>
    %280 = tpu.matmul %278, %279, %cst_90 {dimension_numbers = #tpu.dot_dimension_numbers<[1], [0], [0], [1], [0, 0, 1, 1], [], []>} : vector<64x128xbf16>, vector<128x256xbf16>, vector<64x256xf32> -> vector<64x256xf32>
    %c0_91 = arith.constant 0 : index
    %c0_92 = arith.constant 0 : index
    %281 = vector.load %arg19[%c0_91, %c0_92] : memref<1x256xf32, #tpu.memory_space<vmem>>, vector<1x256xf32>
    %282 = vector.broadcast %281 : vector<1x256xf32> to vector<64x256xf32>
    %283 = arith.addf %280, %282 : vector<64x256xf32>
    %cst_93 = arith.constant 0.000000e+00 : f32
    %284 = vector.broadcast %cst_93 : f32 to vector<2x256xf32>
    %285 = vector.extract_strided_slice %283 {offsets = [0, 0], sizes = [32, 256], strides = [1, 1]} : vector<64x256xf32> to vector<32x256xf32>
    %cst_94 = arith.constant dense<0xFF800000> : vector<256xf32>
    %286 = vector.multi_reduction <maximumf>, %285, %cst_94 [0] : vector<32x256xf32> to vector<256xf32>
    %287 = vector.shape_cast %286 : vector<256xf32> to vector<1x256xf32>
    %c0_i32_95 = arith.constant 0 : i32
    %288 = vector.broadcast %c0_i32_95 : i32 to vector<2x1xi32>
    %289 = arith.cmpi eq, %2, %288 : vector<2x1xi32>
    %cst_96 = arith.constant 1.000000e+00 : f32
    %cst_97 = arith.constant 0.000000e+00 : f32
    %290 = vector.broadcast %cst_96 : f32 to vector<2x1xf32>
    %291 = vector.broadcast %cst_97 : f32 to vector<2x1xf32>
    %292 = arith.select %289, %290, %291 : vector<2x1xi1>, vector<2x1xf32>
    %293 = vector.broadcast %292 : vector<2x1xf32> to vector<2x256xf32>
    %294 = vector.broadcast %287 : vector<1x256xf32> to vector<2x256xf32>
    %295 = arith.mulf %293, %294 : vector<2x256xf32>
    %296 = arith.addf %284, %295 : vector<2x256xf32>
    %297 = vector.extract_strided_slice %283 {offsets = [32, 0], sizes = [32, 256], strides = [1, 1]} : vector<64x256xf32> to vector<32x256xf32>
    %cst_98 = arith.constant dense<0xFF800000> : vector<256xf32>
    %298 = vector.multi_reduction <maximumf>, %297, %cst_98 [0] : vector<32x256xf32> to vector<256xf32>
    %299 = vector.shape_cast %298 : vector<256xf32> to vector<1x256xf32>
    %c1_i32_99 = arith.constant 1 : i32
    %300 = vector.broadcast %c1_i32_99 : i32 to vector<2x1xi32>
    %301 = arith.cmpi eq, %2, %300 : vector<2x1xi32>
    %cst_100 = arith.constant 1.000000e+00 : f32
    %cst_101 = arith.constant 0.000000e+00 : f32
    %302 = vector.broadcast %cst_100 : f32 to vector<2x1xf32>
    %303 = vector.broadcast %cst_101 : f32 to vector<2x1xf32>
    %304 = arith.select %301, %302, %303 : vector<2x1xi1>, vector<2x1xf32>
    %305 = vector.broadcast %304 : vector<2x1xf32> to vector<2x256xf32>
    %306 = vector.broadcast %299 : vector<1x256xf32> to vector<2x256xf32>
    %307 = arith.mulf %305, %306 : vector<2x256xf32>
    %308 = arith.addf %296, %307 : vector<2x256xf32>
    %c0_102 = arith.constant 0 : index
    %c0_103 = arith.constant 0 : index
    %309 = vector.load %arg1[%c0_102, %c0_103] : memref<64x3xf32, #tpu.memory_space<vmem>>, vector<64x3xf32>
    %c0_i32_104 = arith.constant 0 : i32
    %310 = vector.broadcast %c0_i32_104 : i32 to vector<1x8xi32>
    %311 = arith.cmpi eq, %0, %310 : vector<1x8xi32>
    %cst_105 = arith.constant 1.000000e+00 : f32
    %cst_106 = arith.constant 0.000000e+00 : f32
    %312 = vector.broadcast %cst_105 : f32 to vector<1x8xf32>
    %313 = vector.broadcast %cst_106 : f32 to vector<1x8xf32>
    %314 = arith.select %311, %312, %313 : vector<1x8xi1>, vector<1x8xf32>
    %315 = vector.extract_strided_slice %309 {offsets = [0, 0], sizes = [64, 1], strides = [1, 1]} : vector<64x3xf32> to vector<64x1xf32>
    %316 = vector.broadcast %314 : vector<1x8xf32> to vector<64x8xf32>
    %317 = vector.broadcast %315 : vector<64x1xf32> to vector<64x8xf32>
    %318 = arith.mulf %316, %317 : vector<64x8xf32>
    %c1_i32_107 = arith.constant 1 : i32
    %319 = vector.broadcast %c1_i32_107 : i32 to vector<1x8xi32>
    %320 = arith.cmpi eq, %0, %319 : vector<1x8xi32>
    %cst_108 = arith.constant 1.000000e+00 : f32
    %cst_109 = arith.constant 0.000000e+00 : f32
    %321 = vector.broadcast %cst_108 : f32 to vector<1x8xf32>
    %322 = vector.broadcast %cst_109 : f32 to vector<1x8xf32>
    %323 = arith.select %320, %321, %322 : vector<1x8xi1>, vector<1x8xf32>
    %324 = vector.extract_strided_slice %309 {offsets = [0, 1], sizes = [64, 1], strides = [1, 1]} : vector<64x3xf32> to vector<64x1xf32>
    %325 = vector.broadcast %323 : vector<1x8xf32> to vector<64x8xf32>
    %326 = vector.broadcast %324 : vector<64x1xf32> to vector<64x8xf32>
    %327 = arith.mulf %325, %326 : vector<64x8xf32>
    %328 = arith.addf %318, %327 : vector<64x8xf32>
    %c2_i32_110 = arith.constant 2 : i32
    %329 = vector.broadcast %c2_i32_110 : i32 to vector<1x8xi32>
    %330 = arith.cmpi eq, %0, %329 : vector<1x8xi32>
    %cst_111 = arith.constant 1.000000e+00 : f32
    %cst_112 = arith.constant 0.000000e+00 : f32
    %331 = vector.broadcast %cst_111 : f32 to vector<1x8xf32>
    %332 = vector.broadcast %cst_112 : f32 to vector<1x8xf32>
    %333 = arith.select %330, %331, %332 : vector<1x8xi1>, vector<1x8xf32>
    %334 = vector.extract_strided_slice %309 {offsets = [0, 2], sizes = [64, 1], strides = [1, 1]} : vector<64x3xf32> to vector<64x1xf32>
    %335 = vector.broadcast %333 : vector<1x8xf32> to vector<64x8xf32>
    %336 = vector.broadcast %334 : vector<64x1xf32> to vector<64x8xf32>
    %337 = arith.mulf %335, %336 : vector<64x8xf32>
    %338 = arith.addf %328, %337 : vector<64x8xf32>
    %c0_113 = arith.constant 0 : index
    %c0_114 = arith.constant 0 : index
    %339 = vector.load %arg20[%c0_113, %c0_114] : memref<8x64xf32, #tpu.memory_space<vmem>>, vector<8x64xf32>
    %cst_115 = arith.constant dense<0.000000e+00> : vector<64x64xf32>
    %340 = tpu.matmul %338, %339, %cst_115 {dimension_numbers = #tpu.dot_dimension_numbers<[1], [0], [0], [1], [0, 0, 1, 1], [], []>} : vector<64x8xf32>, vector<8x64xf32>, vector<64x64xf32> -> vector<64x64xf32>
    %c0_116 = arith.constant 0 : index
    %c0_117 = arith.constant 0 : index
    %341 = vector.load %arg21[%c0_116, %c0_117] : memref<1x64xf32, #tpu.memory_space<vmem>>, vector<1x64xf32>
    %342 = vector.broadcast %341 : vector<1x64xf32> to vector<64x64xf32>
    %343 = arith.addf %340, %342 : vector<64x64xf32>
    %cst_118 = arith.constant 0.000000e+00 : f32
    %344 = vector.broadcast %cst_118 : f32 to vector<64x64xf32>
    %345 = arith.maximumf %343, %344 : vector<64x64xf32>
    %346 = arith.truncf %345 : vector<64x64xf32> to vector<64x64xbf16>
    %c0_119 = arith.constant 0 : index
    %c0_120 = arith.constant 0 : index
    %347 = vector.load %arg22[%c0_119, %c0_120] : memref<64x128xbf16, #tpu.memory_space<vmem>>, vector<64x128xbf16>
    %cst_121 = arith.constant dense<0.000000e+00> : vector<64x128xf32>
    %348 = tpu.matmul %346, %347, %cst_121 {dimension_numbers = #tpu.dot_dimension_numbers<[1], [0], [0], [1], [0, 0, 1, 1], [], []>} : vector<64x64xbf16>, vector<64x128xbf16>, vector<64x128xf32> -> vector<64x128xf32>
    %c0_122 = arith.constant 0 : index
    %c0_123 = arith.constant 0 : index
    %349 = vector.load %arg23[%c0_122, %c0_123] : memref<1x128xf32, #tpu.memory_space<vmem>>, vector<1x128xf32>
    %350 = vector.broadcast %349 : vector<1x128xf32> to vector<64x128xf32>
    %351 = arith.addf %348, %350 : vector<64x128xf32>
    %cst_124 = arith.constant 0.000000e+00 : f32
    %352 = vector.broadcast %cst_124 : f32 to vector<64x128xf32>
    %353 = arith.maximumf %351, %352 : vector<64x128xf32>
    %354 = arith.truncf %353 : vector<64x128xf32> to vector<64x128xbf16>
    %c0_125 = arith.constant 0 : index
    %c0_126 = arith.constant 0 : index
    %355 = vector.load %arg24[%c0_125, %c0_126] : memref<128x256xbf16, #tpu.memory_space<vmem>>, vector<128x256xbf16>
    %cst_127 = arith.constant dense<0.000000e+00> : vector<64x256xf32>
    %356 = tpu.matmul %354, %355, %cst_127 {dimension_numbers = #tpu.dot_dimension_numbers<[1], [0], [0], [1], [0, 0, 1, 1], [], []>} : vector<64x128xbf16>, vector<128x256xbf16>, vector<64x256xf32> -> vector<64x256xf32>
    %c0_128 = arith.constant 0 : index
    %c0_129 = arith.constant 0 : index
    %357 = vector.load %arg25[%c0_128, %c0_129] : memref<1x256xf32, #tpu.memory_space<vmem>>, vector<1x256xf32>
    %358 = vector.broadcast %357 : vector<1x256xf32> to vector<64x256xf32>
    %359 = arith.addf %356, %358 : vector<64x256xf32>
    %cst_130 = arith.constant 0.000000e+00 : f32
    %360 = vector.broadcast %cst_130 : f32 to vector<64x256xf32>
    %361 = arith.maximumf %359, %360 : vector<64x256xf32>
    %cst_131 = arith.constant 0.000000e+00 : f32
    %362 = vector.broadcast %cst_131 : f32 to vector<2x256xf32>
    %363 = vector.extract_strided_slice %361 {offsets = [0, 0], sizes = [32, 256], strides = [1, 1]} : vector<64x256xf32> to vector<32x256xf32>
    %cst_132 = arith.constant dense<0xFF800000> : vector<256xf32>
    %364 = vector.multi_reduction <maximumf>, %363, %cst_132 [0] : vector<32x256xf32> to vector<256xf32>
    %365 = vector.shape_cast %364 : vector<256xf32> to vector<1x256xf32>
    %c0_i32_133 = arith.constant 0 : i32
    %366 = vector.broadcast %c0_i32_133 : i32 to vector<2x1xi32>
    %367 = arith.cmpi eq, %2, %366 : vector<2x1xi32>
    %cst_134 = arith.constant 1.000000e+00 : f32
    %cst_135 = arith.constant 0.000000e+00 : f32
    %368 = vector.broadcast %cst_134 : f32 to vector<2x1xf32>
    %369 = vector.broadcast %cst_135 : f32 to vector<2x1xf32>
    %370 = arith.select %367, %368, %369 : vector<2x1xi1>, vector<2x1xf32>
    %371 = vector.broadcast %370 : vector<2x1xf32> to vector<2x256xf32>
    %372 = vector.broadcast %365 : vector<1x256xf32> to vector<2x256xf32>
    %373 = arith.mulf %371, %372 : vector<2x256xf32>
    %374 = arith.addf %362, %373 : vector<2x256xf32>
    %375 = vector.extract_strided_slice %361 {offsets = [32, 0], sizes = [32, 256], strides = [1, 1]} : vector<64x256xf32> to vector<32x256xf32>
    %cst_136 = arith.constant dense<0xFF800000> : vector<256xf32>
    %376 = vector.multi_reduction <maximumf>, %375, %cst_136 [0] : vector<32x256xf32> to vector<256xf32>
    %377 = vector.shape_cast %376 : vector<256xf32> to vector<1x256xf32>
    %c1_i32_137 = arith.constant 1 : i32
    %378 = vector.broadcast %c1_i32_137 : i32 to vector<2x1xi32>
    %379 = arith.cmpi eq, %2, %378 : vector<2x1xi32>
    %cst_138 = arith.constant 1.000000e+00 : f32
    %cst_139 = arith.constant 0.000000e+00 : f32
    %380 = vector.broadcast %cst_138 : f32 to vector<2x1xf32>
    %381 = vector.broadcast %cst_139 : f32 to vector<2x1xf32>
    %382 = arith.select %379, %380, %381 : vector<2x1xi1>, vector<2x1xf32>
    %383 = vector.broadcast %382 : vector<2x1xf32> to vector<2x256xf32>
    %384 = vector.broadcast %377 : vector<1x256xf32> to vector<2x256xf32>
    %385 = arith.mulf %383, %384 : vector<2x256xf32>
    %386 = arith.addf %374, %385 : vector<2x256xf32>
    %c0_140 = arith.constant 0 : index
    %c0_141 = arith.constant 0 : index
    %387 = vector.load %arg26[%c0_140, %c0_141] : memref<256x128xf32, #tpu.memory_space<vmem>>, vector<256x128xf32>
    %cst_142 = arith.constant dense<0.000000e+00> : vector<2x128xf32>
    %388 = tpu.matmul %386, %387, %cst_142 {dimension_numbers = #tpu.dot_dimension_numbers<[1], [0], [0], [1], [0, 0, 1, 1], [], []>} : vector<2x256xf32>, vector<256x128xf32>, vector<2x128xf32> -> vector<2x128xf32>
    %c0_143 = arith.constant 0 : index
    %c0_144 = arith.constant 0 : index
    %389 = vector.load %arg27[%c0_143, %c0_144] : memref<1x128xf32, #tpu.memory_space<vmem>>, vector<1x128xf32>
    %390 = vector.broadcast %389 : vector<1x128xf32> to vector<2x128xf32>
    %391 = arith.addf %388, %390 : vector<2x128xf32>
    %cst_145 = arith.constant 0.000000e+00 : f32
    %392 = vector.broadcast %cst_145 : f32 to vector<2x128xf32>
    %393 = arith.maximumf %391, %392 : vector<2x128xf32>
    %c0_146 = arith.constant 0 : index
    %c0_147 = arith.constant 0 : index
    %394 = vector.load %arg28[%c0_146, %c0_147] : memref<128x64xf32, #tpu.memory_space<vmem>>, vector<128x64xf32>
    %cst_148 = arith.constant dense<0.000000e+00> : vector<2x64xf32>
    %395 = tpu.matmul %393, %394, %cst_148 {dimension_numbers = #tpu.dot_dimension_numbers<[1], [0], [0], [1], [0, 0, 1, 1], [], []>} : vector<2x128xf32>, vector<128x64xf32>, vector<2x64xf32> -> vector<2x64xf32>
    %c0_149 = arith.constant 0 : index
    %c0_150 = arith.constant 0 : index
    %396 = vector.load %arg29[%c0_149, %c0_150] : memref<1x64xf32, #tpu.memory_space<vmem>>, vector<1x64xf32>
    %397 = vector.broadcast %396 : vector<1x64xf32> to vector<2x64xf32>
    %398 = arith.addf %395, %397 : vector<2x64xf32>
    %cst_151 = arith.constant 0.000000e+00 : f32
    %399 = vector.broadcast %cst_151 : f32 to vector<2x64xf32>
    %400 = arith.maximumf %398, %399 : vector<2x64xf32>
    %c0_152 = arith.constant 0 : index
    %c0_153 = arith.constant 0 : index
    %401 = vector.load %arg30[%c0_152, %c0_153] : memref<64x128xf32, #tpu.memory_space<vmem>>, vector<64x128xf32>
    %cst_154 = arith.constant dense<0.000000e+00> : vector<2x128xf32>
    %402 = tpu.matmul %400, %401, %cst_154 {dimension_numbers = #tpu.dot_dimension_numbers<[1], [0], [0], [1], [0, 0, 1, 1], [], []>} : vector<2x64xf32>, vector<64x128xf32>, vector<2x128xf32> -> vector<2x128xf32>
    %c0_155 = arith.constant 0 : index
    %c0_156 = arith.constant 0 : index
    %403 = vector.load %arg31[%c0_155, %c0_156] : memref<1x128xf32, #tpu.memory_space<vmem>>, vector<1x128xf32>
    %404 = vector.broadcast %403 : vector<1x128xf32> to vector<2x128xf32>
    %405 = arith.addf %402, %404 : vector<2x128xf32>
    %c0_157 = arith.constant 0 : index
    %c0_158 = arith.constant 0 : index
    %406 = vector.load %arg32[%c0_157, %c0_158] : memref<3x64xf32, #tpu.memory_space<vmem>>, vector<3x64xf32>
    %cst_159 = arith.constant 0.000000e+00 : f32
    %407 = vector.broadcast %cst_159 : f32 to vector<64x64xf32>
    %408 = vector.extract_strided_slice %405 {offsets = [0, 0], sizes = [1, 128], strides = [1, 1]} : vector<2x128xf32> to vector<1x128xf32>
    %409 = vector.extract_strided_slice %408 {offsets = [0, 0], sizes = [1, 1], strides = [1, 1]} : vector<1x128xf32> to vector<1x1xf32>
    %410 = vector.extract_strided_slice %406 {offsets = [0, 0], sizes = [1, 64], strides = [1, 1]} : vector<3x64xf32> to vector<1x64xf32>
    %411 = vector.broadcast %409 : vector<1x1xf32> to vector<1x64xf32>
    %412 = arith.mulf %411, %410 : vector<1x64xf32>
    %413 = vector.extract_strided_slice %408 {offsets = [0, 1], sizes = [1, 1], strides = [1, 1]} : vector<1x128xf32> to vector<1x1xf32>
    %414 = vector.extract_strided_slice %406 {offsets = [1, 0], sizes = [1, 64], strides = [1, 1]} : vector<3x64xf32> to vector<1x64xf32>
    %415 = vector.broadcast %413 : vector<1x1xf32> to vector<1x64xf32>
    %416 = arith.mulf %415, %414 : vector<1x64xf32>
    %417 = arith.addf %412, %416 : vector<1x64xf32>
    %418 = vector.extract_strided_slice %408 {offsets = [0, 2], sizes = [1, 1], strides = [1, 1]} : vector<1x128xf32> to vector<1x1xf32>
    %419 = vector.extract_strided_slice %406 {offsets = [2, 0], sizes = [1, 64], strides = [1, 1]} : vector<3x64xf32> to vector<1x64xf32>
    %420 = vector.broadcast %418 : vector<1x1xf32> to vector<1x64xf32>
    %421 = arith.mulf %420, %419 : vector<1x64xf32>
    %422 = arith.addf %417, %421 : vector<1x64xf32>
    %423 = vector.extract_strided_slice %408 {offsets = [0, 3], sizes = [1, 1], strides = [1, 1]} : vector<1x128xf32> to vector<1x1xf32>
    %424 = vector.extract_strided_slice %406 {offsets = [0, 0], sizes = [1, 64], strides = [1, 1]} : vector<3x64xf32> to vector<1x64xf32>
    %425 = vector.broadcast %423 : vector<1x1xf32> to vector<1x64xf32>
    %426 = arith.mulf %425, %424 : vector<1x64xf32>
    %427 = vector.extract_strided_slice %408 {offsets = [0, 4], sizes = [1, 1], strides = [1, 1]} : vector<1x128xf32> to vector<1x1xf32>
    %428 = vector.extract_strided_slice %406 {offsets = [1, 0], sizes = [1, 64], strides = [1, 1]} : vector<3x64xf32> to vector<1x64xf32>
    %429 = vector.broadcast %427 : vector<1x1xf32> to vector<1x64xf32>
    %430 = arith.mulf %429, %428 : vector<1x64xf32>
    %431 = arith.addf %426, %430 : vector<1x64xf32>
    %432 = vector.extract_strided_slice %408 {offsets = [0, 5], sizes = [1, 1], strides = [1, 1]} : vector<1x128xf32> to vector<1x1xf32>
    %433 = vector.extract_strided_slice %406 {offsets = [2, 0], sizes = [1, 64], strides = [1, 1]} : vector<3x64xf32> to vector<1x64xf32>
    %434 = vector.broadcast %432 : vector<1x1xf32> to vector<1x64xf32>
    %435 = arith.mulf %434, %433 : vector<1x64xf32>
    %436 = arith.addf %431, %435 : vector<1x64xf32>
    %437 = vector.extract_strided_slice %408 {offsets = [0, 6], sizes = [1, 1], strides = [1, 1]} : vector<1x128xf32> to vector<1x1xf32>
    %438 = vector.extract_strided_slice %406 {offsets = [0, 0], sizes = [1, 64], strides = [1, 1]} : vector<3x64xf32> to vector<1x64xf32>
    %439 = vector.broadcast %437 : vector<1x1xf32> to vector<1x64xf32>
    %440 = arith.mulf %439, %438 : vector<1x64xf32>
    %441 = vector.extract_strided_slice %408 {offsets = [0, 7], sizes = [1, 1], strides = [1, 1]} : vector<1x128xf32> to vector<1x1xf32>
    %442 = vector.extract_strided_slice %406 {offsets = [1, 0], sizes = [1, 64], strides = [1, 1]} : vector<3x64xf32> to vector<1x64xf32>
    %443 = vector.broadcast %441 : vector<1x1xf32> to vector<1x64xf32>
    %444 = arith.mulf %443, %442 : vector<1x64xf32>
    %445 = arith.addf %440, %444 : vector<1x64xf32>
    %446 = vector.extract_strided_slice %408 {offsets = [0, 8], sizes = [1, 1], strides = [1, 1]} : vector<1x128xf32> to vector<1x1xf32>
    %447 = vector.extract_strided_slice %406 {offsets = [2, 0], sizes = [1, 64], strides = [1, 1]} : vector<3x64xf32> to vector<1x64xf32>
    %448 = vector.broadcast %446 : vector<1x1xf32> to vector<1x64xf32>
    %449 = arith.mulf %448, %447 : vector<1x64xf32>
    %450 = arith.addf %445, %449 : vector<1x64xf32>
    %c0_i32_160 = arith.constant 0 : i32
    %451 = vector.broadcast %c0_i32_160 : i32 to vector<8x1xi32>
    %452 = arith.cmpi eq, %1, %451 : vector<8x1xi32>
    %cst_161 = arith.constant 1.000000e+00 : f32
    %cst_162 = arith.constant 0.000000e+00 : f32
    %453 = vector.broadcast %cst_161 : f32 to vector<8x1xf32>
    %454 = vector.broadcast %cst_162 : f32 to vector<8x1xf32>
    %455 = arith.select %452, %453, %454 : vector<8x1xi1>, vector<8x1xf32>
    %456 = vector.broadcast %455 : vector<8x1xf32> to vector<8x64xf32>
    %457 = vector.broadcast %422 : vector<1x64xf32> to vector<8x64xf32>
    %458 = arith.mulf %456, %457 : vector<8x64xf32>
    %c1_i32_163 = arith.constant 1 : i32
    %459 = vector.broadcast %c1_i32_163 : i32 to vector<8x1xi32>
    %460 = arith.cmpi eq, %1, %459 : vector<8x1xi32>
    %cst_164 = arith.constant 1.000000e+00 : f32
    %cst_165 = arith.constant 0.000000e+00 : f32
    %461 = vector.broadcast %cst_164 : f32 to vector<8x1xf32>
    %462 = vector.broadcast %cst_165 : f32 to vector<8x1xf32>
    %463 = arith.select %460, %461, %462 : vector<8x1xi1>, vector<8x1xf32>
    %464 = vector.broadcast %463 : vector<8x1xf32> to vector<8x64xf32>
    %465 = vector.broadcast %436 : vector<1x64xf32> to vector<8x64xf32>
    %466 = arith.mulf %464, %465 : vector<8x64xf32>
    %467 = arith.addf %458, %466 : vector<8x64xf32>
    %c2_i32_166 = arith.constant 2 : i32
    %468 = vector.broadcast %c2_i32_166 : i32 to vector<8x1xi32>
    %469 = arith.cmpi eq, %1, %468 : vector<8x1xi32>
    %cst_167 = arith.constant 1.000000e+00 : f32
    %cst_168 = arith.constant 0.000000e+00 : f32
    %470 = vector.broadcast %cst_167 : f32 to vector<8x1xf32>
    %471 = vector.broadcast %cst_168 : f32 to vector<8x1xf32>
    %472 = arith.select %469, %470, %471 : vector<8x1xi1>, vector<8x1xf32>
    %473 = vector.broadcast %472 : vector<8x1xf32> to vector<8x64xf32>
    %474 = vector.broadcast %450 : vector<1x64xf32> to vector<8x64xf32>
    %475 = arith.mulf %473, %474 : vector<8x64xf32>
    %476 = arith.addf %467, %475 : vector<8x64xf32>
    %cst_169 = arith.constant dense<0.000000e+00> : vector<64x64xf32>
    %477 = tpu.matmul %338, %476, %cst_169 {dimension_numbers = #tpu.dot_dimension_numbers<[1], [0], [0], [1], [0, 0, 1, 1], [], []>} : vector<64x8xf32>, vector<8x64xf32>, vector<64x64xf32> -> vector<64x64xf32>
    %c0_i32_170 = arith.constant 0 : i32
    %478 = vector.broadcast %c0_i32_170 : i32 to vector<64x1xi32>
    %479 = arith.cmpi sge, %3, %478 : vector<64x1xi32>
    %c32_i32_171 = arith.constant 32 : i32
    %480 = vector.broadcast %c32_i32_171 : i32 to vector<64x1xi32>
    %481 = arith.cmpi slt, %3, %480 : vector<64x1xi32>
    %482 = arith.andi %479, %481 : vector<64x1xi1>
    %cst_172 = arith.constant 1.000000e+00 : f32
    %cst_173 = arith.constant 0.000000e+00 : f32
    %483 = vector.broadcast %cst_172 : f32 to vector<64x1xf32>
    %484 = vector.broadcast %cst_173 : f32 to vector<64x1xf32>
    %485 = arith.select %482, %483, %484 : vector<64x1xi1>, vector<64x1xf32>
    %486 = vector.broadcast %485 : vector<64x1xf32> to vector<64x64xf32>
    %487 = arith.mulf %486, %477 : vector<64x64xf32>
    %488 = arith.addf %407, %487 : vector<64x64xf32>
    %489 = vector.extract_strided_slice %405 {offsets = [1, 0], sizes = [1, 128], strides = [1, 1]} : vector<2x128xf32> to vector<1x128xf32>
    %490 = vector.extract_strided_slice %489 {offsets = [0, 0], sizes = [1, 1], strides = [1, 1]} : vector<1x128xf32> to vector<1x1xf32>
    %491 = vector.extract_strided_slice %406 {offsets = [0, 0], sizes = [1, 64], strides = [1, 1]} : vector<3x64xf32> to vector<1x64xf32>
    %492 = vector.broadcast %490 : vector<1x1xf32> to vector<1x64xf32>
    %493 = arith.mulf %492, %491 : vector<1x64xf32>
    %494 = vector.extract_strided_slice %489 {offsets = [0, 1], sizes = [1, 1], strides = [1, 1]} : vector<1x128xf32> to vector<1x1xf32>
    %495 = vector.extract_strided_slice %406 {offsets = [1, 0], sizes = [1, 64], strides = [1, 1]} : vector<3x64xf32> to vector<1x64xf32>
    %496 = vector.broadcast %494 : vector<1x1xf32> to vector<1x64xf32>
    %497 = arith.mulf %496, %495 : vector<1x64xf32>
    %498 = arith.addf %493, %497 : vector<1x64xf32>
    %499 = vector.extract_strided_slice %489 {offsets = [0, 2], sizes = [1, 1], strides = [1, 1]} : vector<1x128xf32> to vector<1x1xf32>
    %500 = vector.extract_strided_slice %406 {offsets = [2, 0], sizes = [1, 64], strides = [1, 1]} : vector<3x64xf32> to vector<1x64xf32>
    %501 = vector.broadcast %499 : vector<1x1xf32> to vector<1x64xf32>
    %502 = arith.mulf %501, %500 : vector<1x64xf32>
    %503 = arith.addf %498, %502 : vector<1x64xf32>
    %504 = vector.extract_strided_slice %489 {offsets = [0, 3], sizes = [1, 1], strides = [1, 1]} : vector<1x128xf32> to vector<1x1xf32>
    %505 = vector.extract_strided_slice %406 {offsets = [0, 0], sizes = [1, 64], strides = [1, 1]} : vector<3x64xf32> to vector<1x64xf32>
    %506 = vector.broadcast %504 : vector<1x1xf32> to vector<1x64xf32>
    %507 = arith.mulf %506, %505 : vector<1x64xf32>
    %508 = vector.extract_strided_slice %489 {offsets = [0, 4], sizes = [1, 1], strides = [1, 1]} : vector<1x128xf32> to vector<1x1xf32>
    %509 = vector.extract_strided_slice %406 {offsets = [1, 0], sizes = [1, 64], strides = [1, 1]} : vector<3x64xf32> to vector<1x64xf32>
    %510 = vector.broadcast %508 : vector<1x1xf32> to vector<1x64xf32>
    %511 = arith.mulf %510, %509 : vector<1x64xf32>
    %512 = arith.addf %507, %511 : vector<1x64xf32>
    %513 = vector.extract_strided_slice %489 {offsets = [0, 5], sizes = [1, 1], strides = [1, 1]} : vector<1x128xf32> to vector<1x1xf32>
    %514 = vector.extract_strided_slice %406 {offsets = [2, 0], sizes = [1, 64], strides = [1, 1]} : vector<3x64xf32> to vector<1x64xf32>
    %515 = vector.broadcast %513 : vector<1x1xf32> to vector<1x64xf32>
    %516 = arith.mulf %515, %514 : vector<1x64xf32>
    %517 = arith.addf %512, %516 : vector<1x64xf32>
    %518 = vector.extract_strided_slice %489 {offsets = [0, 6], sizes = [1, 1], strides = [1, 1]} : vector<1x128xf32> to vector<1x1xf32>
    %519 = vector.extract_strided_slice %406 {offsets = [0, 0], sizes = [1, 64], strides = [1, 1]} : vector<3x64xf32> to vector<1x64xf32>
    %520 = vector.broadcast %518 : vector<1x1xf32> to vector<1x64xf32>
    %521 = arith.mulf %520, %519 : vector<1x64xf32>
    %522 = vector.extract_strided_slice %489 {offsets = [0, 7], sizes = [1, 1], strides = [1, 1]} : vector<1x128xf32> to vector<1x1xf32>
    %523 = vector.extract_strided_slice %406 {offsets = [1, 0], sizes = [1, 64], strides = [1, 1]} : vector<3x64xf32> to vector<1x64xf32>
    %524 = vector.broadcast %522 : vector<1x1xf32> to vector<1x64xf32>
    %525 = arith.mulf %524, %523 : vector<1x64xf32>
    %526 = arith.addf %521, %525 : vector<1x64xf32>
    %527 = vector.extract_strided_slice %489 {offsets = [0, 8], sizes = [1, 1], strides = [1, 1]} : vector<1x128xf32> to vector<1x1xf32>
    %528 = vector.extract_strided_slice %406 {offsets = [2, 0], sizes = [1, 64], strides = [1, 1]} : vector<3x64xf32> to vector<1x64xf32>
    %529 = vector.broadcast %527 : vector<1x1xf32> to vector<1x64xf32>
    %530 = arith.mulf %529, %528 : vector<1x64xf32>
    %531 = arith.addf %526, %530 : vector<1x64xf32>
    %c0_i32_174 = arith.constant 0 : i32
    %532 = vector.broadcast %c0_i32_174 : i32 to vector<8x1xi32>
    %533 = arith.cmpi eq, %1, %532 : vector<8x1xi32>
    %cst_175 = arith.constant 1.000000e+00 : f32
    %cst_176 = arith.constant 0.000000e+00 : f32
    %534 = vector.broadcast %cst_175 : f32 to vector<8x1xf32>
    %535 = vector.broadcast %cst_176 : f32 to vector<8x1xf32>
    %536 = arith.select %533, %534, %535 : vector<8x1xi1>, vector<8x1xf32>
    %537 = vector.broadcast %536 : vector<8x1xf32> to vector<8x64xf32>
    %538 = vector.broadcast %503 : vector<1x64xf32> to vector<8x64xf32>
    %539 = arith.mulf %537, %538 : vector<8x64xf32>
    %c1_i32_177 = arith.constant 1 : i32
    %540 = vector.broadcast %c1_i32_177 : i32 to vector<8x1xi32>
    %541 = arith.cmpi eq, %1, %540 : vector<8x1xi32>
    %cst_178 = arith.constant 1.000000e+00 : f32
    %cst_179 = arith.constant 0.000000e+00 : f32
    %542 = vector.broadcast %cst_178 : f32 to vector<8x1xf32>
    %543 = vector.broadcast %cst_179 : f32 to vector<8x1xf32>
    %544 = arith.select %541, %542, %543 : vector<8x1xi1>, vector<8x1xf32>
    %545 = vector.broadcast %544 : vector<8x1xf32> to vector<8x64xf32>
    %546 = vector.broadcast %517 : vector<1x64xf32> to vector<8x64xf32>
    %547 = arith.mulf %545, %546 : vector<8x64xf32>
    %548 = arith.addf %539, %547 : vector<8x64xf32>
    %c2_i32_180 = arith.constant 2 : i32
    %549 = vector.broadcast %c2_i32_180 : i32 to vector<8x1xi32>
    %550 = arith.cmpi eq, %1, %549 : vector<8x1xi32>
    %cst_181 = arith.constant 1.000000e+00 : f32
    %cst_182 = arith.constant 0.000000e+00 : f32
    %551 = vector.broadcast %cst_181 : f32 to vector<8x1xf32>
    %552 = vector.broadcast %cst_182 : f32 to vector<8x1xf32>
    %553 = arith.select %550, %551, %552 : vector<8x1xi1>, vector<8x1xf32>
    %554 = vector.broadcast %553 : vector<8x1xf32> to vector<8x64xf32>
    %555 = vector.broadcast %531 : vector<1x64xf32> to vector<8x64xf32>
    %556 = arith.mulf %554, %555 : vector<8x64xf32>
    %557 = arith.addf %548, %556 : vector<8x64xf32>
    %cst_183 = arith.constant dense<0.000000e+00> : vector<64x64xf32>
    %558 = tpu.matmul %338, %557, %cst_183 {dimension_numbers = #tpu.dot_dimension_numbers<[1], [0], [0], [1], [0, 0, 1, 1], [], []>} : vector<64x8xf32>, vector<8x64xf32>, vector<64x64xf32> -> vector<64x64xf32>
    %c32_i32_184 = arith.constant 32 : i32
    %559 = vector.broadcast %c32_i32_184 : i32 to vector<64x1xi32>
    %560 = arith.cmpi sge, %3, %559 : vector<64x1xi32>
    %c64_i32_185 = arith.constant 64 : i32
    %561 = vector.broadcast %c64_i32_185 : i32 to vector<64x1xi32>
    %562 = arith.cmpi slt, %3, %561 : vector<64x1xi32>
    %563 = arith.andi %560, %562 : vector<64x1xi1>
    %cst_186 = arith.constant 1.000000e+00 : f32
    %cst_187 = arith.constant 0.000000e+00 : f32
    %564 = vector.broadcast %cst_186 : f32 to vector<64x1xf32>
    %565 = vector.broadcast %cst_187 : f32 to vector<64x1xf32>
    %566 = arith.select %563, %564, %565 : vector<64x1xi1>, vector<64x1xf32>
    %567 = vector.broadcast %566 : vector<64x1xf32> to vector<64x64xf32>
    %568 = arith.mulf %567, %558 : vector<64x64xf32>
    %569 = arith.addf %488, %568 : vector<64x64xf32>
    %c0_188 = arith.constant 0 : index
    %c0_189 = arith.constant 0 : index
    %570 = vector.load %arg33[%c0_188, %c0_189] : memref<1x64xf32, #tpu.memory_space<vmem>>, vector<1x64xf32>
    %571 = vector.broadcast %570 : vector<1x64xf32> to vector<64x64xf32>
    %572 = arith.addf %569, %571 : vector<64x64xf32>
    %cst_190 = arith.constant 0.000000e+00 : f32
    %573 = vector.broadcast %cst_190 : f32 to vector<64x64xf32>
    %574 = arith.maximumf %572, %573 : vector<64x64xf32>
    %575 = arith.truncf %574 : vector<64x64xf32> to vector<64x64xbf16>
    %c0_191 = arith.constant 0 : index
    %c0_192 = arith.constant 0 : index
    %576 = vector.load %arg34[%c0_191, %c0_192] : memref<64x128xbf16, #tpu.memory_space<vmem>>, vector<64x128xbf16>
    %cst_193 = arith.constant dense<0.000000e+00> : vector<64x128xf32>
    %577 = tpu.matmul %575, %576, %cst_193 {dimension_numbers = #tpu.dot_dimension_numbers<[1], [0], [0], [1], [0, 0, 1, 1], [], []>} : vector<64x64xbf16>, vector<64x128xbf16>, vector<64x128xf32> -> vector<64x128xf32>
    %c0_194 = arith.constant 0 : index
    %c0_195 = arith.constant 0 : index
    %578 = vector.load %arg35[%c0_194, %c0_195] : memref<1x128xf32, #tpu.memory_space<vmem>>, vector<1x128xf32>
    %579 = vector.broadcast %578 : vector<1x128xf32> to vector<64x128xf32>
    %580 = arith.addf %577, %579 : vector<64x128xf32>
    %cst_196 = arith.constant 0.000000e+00 : f32
    %581 = vector.broadcast %cst_196 : f32 to vector<64x128xf32>
    %582 = arith.maximumf %580, %581 : vector<64x128xf32>
    %583 = arith.truncf %582 : vector<64x128xf32> to vector<64x128xbf16>
    %c0_197 = arith.constant 0 : index
    %c0_198 = arith.constant 0 : index
    %584 = vector.load %arg36[%c0_197, %c0_198] : memref<128x256xbf16, #tpu.memory_space<vmem>>, vector<128x256xbf16>
    %cst_199 = arith.constant dense<0.000000e+00> : vector<64x256xf32>
    %585 = tpu.matmul %583, %584, %cst_199 {dimension_numbers = #tpu.dot_dimension_numbers<[1], [0], [0], [1], [0, 0, 1, 1], [], []>} : vector<64x128xbf16>, vector<128x256xbf16>, vector<64x256xf32> -> vector<64x256xf32>
    %c0_200 = arith.constant 0 : index
    %c0_201 = arith.constant 0 : index
    %586 = vector.load %arg37[%c0_200, %c0_201] : memref<1x256xf32, #tpu.memory_space<vmem>>, vector<1x256xf32>
    %587 = vector.broadcast %586 : vector<1x256xf32> to vector<64x256xf32>
    %588 = arith.addf %585, %587 : vector<64x256xf32>
    %cst_202 = arith.constant 0.000000e+00 : f32
    %589 = vector.broadcast %cst_202 : f32 to vector<2x256xf32>
    %590 = vector.extract_strided_slice %588 {offsets = [0, 0], sizes = [32, 256], strides = [1, 1]} : vector<64x256xf32> to vector<32x256xf32>
    %cst_203 = arith.constant dense<0xFF800000> : vector<256xf32>
    %591 = vector.multi_reduction <maximumf>, %590, %cst_203 [0] : vector<32x256xf32> to vector<256xf32>
    %592 = vector.shape_cast %591 : vector<256xf32> to vector<1x256xf32>
    %c0_i32_204 = arith.constant 0 : i32
    %593 = vector.broadcast %c0_i32_204 : i32 to vector<2x1xi32>
    %594 = arith.cmpi eq, %2, %593 : vector<2x1xi32>
    %cst_205 = arith.constant 1.000000e+00 : f32
    %cst_206 = arith.constant 0.000000e+00 : f32
    %595 = vector.broadcast %cst_205 : f32 to vector<2x1xf32>
    %596 = vector.broadcast %cst_206 : f32 to vector<2x1xf32>
    %597 = arith.select %594, %595, %596 : vector<2x1xi1>, vector<2x1xf32>
    %598 = vector.broadcast %597 : vector<2x1xf32> to vector<2x256xf32>
    %599 = vector.broadcast %592 : vector<1x256xf32> to vector<2x256xf32>
    %600 = arith.mulf %598, %599 : vector<2x256xf32>
    %601 = arith.addf %589, %600 : vector<2x256xf32>
    %602 = vector.extract_strided_slice %588 {offsets = [32, 0], sizes = [32, 256], strides = [1, 1]} : vector<64x256xf32> to vector<32x256xf32>
    %cst_207 = arith.constant dense<0xFF800000> : vector<256xf32>
    %603 = vector.multi_reduction <maximumf>, %602, %cst_207 [0] : vector<32x256xf32> to vector<256xf32>
    %604 = vector.shape_cast %603 : vector<256xf32> to vector<1x256xf32>
    %c1_i32_208 = arith.constant 1 : i32
    %605 = vector.broadcast %c1_i32_208 : i32 to vector<2x1xi32>
    %606 = arith.cmpi eq, %2, %605 : vector<2x1xi32>
    %cst_209 = arith.constant 1.000000e+00 : f32
    %cst_210 = arith.constant 0.000000e+00 : f32
    %607 = vector.broadcast %cst_209 : f32 to vector<2x1xf32>
    %608 = vector.broadcast %cst_210 : f32 to vector<2x1xf32>
    %609 = arith.select %606, %607, %608 : vector<2x1xi1>, vector<2x1xf32>
    %610 = vector.broadcast %609 : vector<2x1xf32> to vector<2x256xf32>
    %611 = vector.broadcast %604 : vector<1x256xf32> to vector<2x256xf32>
    %612 = arith.mulf %610, %611 : vector<2x256xf32>
    %613 = arith.addf %601, %612 : vector<2x256xf32>
    %c0_211 = arith.constant 0 : index
    %c0_212 = arith.constant 0 : index
    %614 = vector.load %arg38[%c0_211, %c0_212] : memref<256x256xf32, #tpu.memory_space<vmem>>, vector<256x256xf32>
    %cst_213 = arith.constant dense<0.000000e+00> : vector<2x256xf32>
    %615 = tpu.matmul %308, %614, %cst_213 {dimension_numbers = #tpu.dot_dimension_numbers<[1], [0], [0], [1], [0, 0, 1, 1], [], []>} : vector<2x256xf32>, vector<256x256xf32>, vector<2x256xf32> -> vector<2x256xf32>
    %c0_214 = arith.constant 0 : index
    %c0_215 = arith.constant 0 : index
    %616 = vector.load %arg39[%c0_214, %c0_215] : memref<256x256xf32, #tpu.memory_space<vmem>>, vector<256x256xf32>
    %cst_216 = arith.constant dense<0.000000e+00> : vector<2x256xf32>
    %617 = tpu.matmul %613, %616, %cst_216 {dimension_numbers = #tpu.dot_dimension_numbers<[1], [0], [0], [1], [0, 0, 1, 1], [], []>} : vector<2x256xf32>, vector<256x256xf32>, vector<2x256xf32> -> vector<2x256xf32>
    %618 = arith.addf %615, %617 : vector<2x256xf32>
    %c0_217 = arith.constant 0 : index
    %c0_218 = arith.constant 0 : index
    %619 = vector.load %arg40[%c0_217, %c0_218] : memref<1x256xf32, #tpu.memory_space<vmem>>, vector<1x256xf32>
    %620 = vector.broadcast %619 : vector<1x256xf32> to vector<2x256xf32>
    %621 = arith.addf %618, %620 : vector<2x256xf32>
    %cst_219 = arith.constant 0.000000e+00 : f32
    %622 = vector.broadcast %cst_219 : f32 to vector<2x256xf32>
    %623 = arith.maximumf %621, %622 : vector<2x256xf32>
    %c0_220 = arith.constant 0 : index
    %c0_221 = arith.constant 0 : index
    %624 = vector.load %arg41[%c0_220, %c0_221] : memref<256x64xf32, #tpu.memory_space<vmem>>, vector<256x64xf32>
    %cst_222 = arith.constant dense<0.000000e+00> : vector<2x64xf32>
    %625 = tpu.matmul %623, %624, %cst_222 {dimension_numbers = #tpu.dot_dimension_numbers<[1], [0], [0], [1], [0, 0, 1, 1], [], []>} : vector<2x256xf32>, vector<256x64xf32>, vector<2x64xf32> -> vector<2x64xf32>
    %c0_223 = arith.constant 0 : index
    %c0_224 = arith.constant 0 : index
    %626 = vector.load %arg42[%c0_223, %c0_224] : memref<1x64xf32, #tpu.memory_space<vmem>>, vector<1x64xf32>
    %627 = vector.broadcast %626 : vector<1x64xf32> to vector<2x64xf32>
    %628 = arith.addf %625, %627 : vector<2x64xf32>
    %cst_225 = arith.constant 0.000000e+00 : f32
    %629 = vector.broadcast %cst_225 : f32 to vector<2x64xf32>
    %630 = arith.maximumf %628, %629 : vector<2x64xf32>
    %c0_226 = arith.constant 0 : index
    %c0_227 = arith.constant 0 : index
    %631 = vector.load %arg43[%c0_226, %c0_227] : memref<64x128xf32, #tpu.memory_space<vmem>>, vector<64x128xf32>
    %cst_228 = arith.constant dense<0.000000e+00> : vector<2x128xf32>
    %632 = tpu.matmul %630, %631, %cst_228 {dimension_numbers = #tpu.dot_dimension_numbers<[1], [0], [0], [1], [0, 0, 1, 1], [], []>} : vector<2x64xf32>, vector<64x128xf32>, vector<2x128xf32> -> vector<2x128xf32>
    %c0_229 = arith.constant 0 : index
    %c0_230 = arith.constant 0 : index
    %633 = vector.load %arg44[%c0_229, %c0_230] : memref<1x128xf32, #tpu.memory_space<vmem>>, vector<1x128xf32>
    %634 = vector.broadcast %633 : vector<1x128xf32> to vector<2x128xf32>
    %635 = arith.addf %632, %634 : vector<2x128xf32>
    %cst_231 = arith.constant dense<0xFF800000> : vector<128xf32>
    %636 = vector.multi_reduction <maximumf>, %635, %cst_231 [0] : vector<2x128xf32> to vector<128xf32>
    %637 = vector.shape_cast %636 : vector<128xf32> to vector<1x128xf32>
    %638 = vector.broadcast %637 : vector<1x128xf32> to vector<2x128xf32>
    %639 = arith.subf %635, %638 : vector<2x128xf32>
    %640 = math.exp %639 : vector<2x128xf32>
    %cst_232 = arith.constant dense<0.000000e+00> : vector<128xf32>
    %641 = vector.multi_reduction <add>, %640, %cst_232 [0] : vector<2x128xf32> to vector<128xf32>
    %642 = vector.shape_cast %641 : vector<128xf32> to vector<1x128xf32>
    %643 = math.log %642 : vector<1x128xf32>
    %644 = vector.broadcast %643 : vector<1x128xf32> to vector<2x128xf32>
    %645 = arith.subf %639, %644 : vector<2x128xf32>
    %c0_233 = arith.constant 0 : index
    %c0_234 = arith.constant 0 : index
    %646 = vector.load %arg45[%c0_233, %c0_234] : memref<2x128xf32, #tpu.memory_space<vmem>>, vector<2x128xf32>
    tpu.vector_store %arg45[%c0_233, %c0_234], %645 {strides = array<i32>} : memref<2x128xf32, #tpu.memory_space<vmem>>, vector<2x128xf32>,
    %c0_235 = arith.constant 0 : index
    %c0_236 = arith.constant 0 : index
    %647 = vector.load %arg46[%c0_235, %c0_236] : memref<2x128xf32, #tpu.memory_space<vmem>>, vector<2x128xf32>
    tpu.vector_store %arg46[%c0_235, %c0_236], %405 {strides = array<i32>} : memref<2x128xf32, #tpu.memory_space<vmem>>, vector<2x128xf32>,
    return
  }
}

</mosaic_0001>

<bundles_post_ra>
// kernel: dualnet_forward.1
= control target key start
LH: loop header
LB: loop body
LE: loop exit
PB: predicated region body
PF: predicated region fallthrough
CT: control target
= control target key end

     0   :  { %s6599_s6 = smov 1   ;;  %s6600_s10 = smov 2   ;;  %s7767_s0 = inlined_call_operand.smem [shape: u32[47], index: -1, kind: input, shape index: {}] }
   0x1   :  { %s6700_s5 = sld [smem:[%s7767_s0]]   ;;  %s6601_s14 = smov 3  }
   0x2   :  { %s6705_s9 = sld [smem:[%s7767_s0 + %s6599_s6]]   ;;  %s6602_s18 = smov 4  }
   0x3   :  { %s6710_s13 = sld [smem:[%s7767_s0 + %s6600_s10]]   ;;  %s6603_s22 = smov 5  }
   0x4   :  { %s6715_s17 = sld [smem:[%s7767_s0 + %s6601_s14]]   ;;  %s6604_s26 = smov 6  }
   0x5   :  { %s6720_s21 = sld [smem:[%s7767_s0 + %s6602_s18]]   ;;  %s6605_s30 = smov 7  }
   0x6   :  { %s6725_s25 = sld [smem:[%s7767_s0 + %s6603_s22]]   ;;  %s6606_s4 = smov 8  }
   0x7   :  { %7790 = sst [smem:[#allocation67_spill]] %s6700_s5  ;;  %s6607_s10 = smov 9  }
   0x8   :  { %7791 = sst [smem:[#allocation68_spill]] %s6705_s9  ;;  %s6608_s15 = smov 10  }
   0x9   :  { %7792 = sst [smem:[#allocation69_spill]] %s6710_s13  ;;  %s6609_s20 = smov 11  }
   0xa   :  { %7793 = sst [smem:[#allocation70_spill]] %s6715_s17  ;;  %s6611_s1 = smov 13  }
   0xb   :  { %s6730_s29 = sld [smem:[%s7767_s0 + %s6604_s26]]   ;;  %s6610_s26 = smov 12  }
   0xc   :  { %7794 = sst [smem:[#allocation71_spill]] %s6725_s25  ;;  %s6612_s7 = smov 14  }
   0xd   :  { %s6735_s3 = sld [smem:[%s7767_s0 + %s6605_s30]]   ;;  %s6614_s22 = smov 16  }
   0xe   :  { %s6740_s8 = sld [smem:[%s7767_s0 + %s6606_s4]]   ;;  %s6615_s28 = smov 17  }
   0xf   :  { %s6745_s14 = sld [smem:[%s7767_s0 + %s6607_s10]]  }
  0x10   :  { %s6750_s19 = sld [smem:[%s7767_s0 + %s6608_s15]]   ;;  %s6613_s15 = smov 15  }
  0x11   :  { %s6755_s24 = sld [smem:[%s7767_s0 + %s6609_s20]]  }
  0x12   :  { %s6760_s30 = sld [smem:[%s7767_s0 + %s6610_s26]]  }
  0x13   :  { %7795 = sst [smem:[#allocation72_spill]] %s6735_s3 }
  0x14   :  { %s6765_s6 = sld [smem:[%s7767_s0 + %s6611_s1]]  }
  0x15   :  { %7796 = sst [smem:[#allocation73_spill]] %s6745_s14 }
  0x16   :  { %7797 = sst [smem:[#allocation74_spill]] %s6750_s19 }
  0x17   :  { %s6770_s12 = sld [smem:[%s7767_s0 + %s6612_s7]]   ;;  %s6616_s7 = smov 18  }
  0x18   :  { %7798 = sst [smem:[#allocation75_spill]] %s6760_s30 }
  0x19   :  { %s6775_s20 = sld [smem:[%s7767_s0 + %s6613_s15]]   ;;  %s6617_s15 = smov 19  }
  0x1a   :  { %s6780_s27 = sld [smem:[%s7767_s0 + %s6614_s22]]   ;;  %s6618_s22 = smov 20  }
  0x1b   :  { %s6785_s4 = sld [smem:[%s7767_s0 + %s6615_s28]]   ;;  %s6619_s28 = smov 21  }
  0x1c   :  { %s6790_s9 = sld [smem:[%s7767_s0 + %s6616_s7]]   ;;  %s6620_s7 = smov 22  }
  0x1d   :  { %7799 = sst [smem:[#allocation76_spill]] %s6770_s12 }
  0x1e   :  { %s6795_s19 = sld [smem:[%s7767_s0 + %s6617_s15]]   ;;  %s6621_s15 = smov 23  }
  0x1f   :  { %s6800_s17 = sld [smem:[%s7767_s0 + %s6618_s22]]   ;;  %s6622_s22 = smov 24  }
  0x20   :  { %7800 = sst [smem:[#allocation77_spill]] %s6780_s27 }
  0x21   :  { %s6805_s5 = sld [smem:[%s7767_s0 + %s6619_s28]]   ;;  %s6623_s28 = smov 25  }
  0x22   :  { %7801 = sst [smem:[#allocation78_spill]] %s6790_s9 }
  0x23   :  { %s6810_s9 = sld [smem:[%s7767_s0 + %s6620_s7]]   ;;  %s6624_s7 = smov 26  }
  0x24   :  { %s6815_s27 = sld [smem:[%s7767_s0 + %s6621_s15]]   ;;  %s6625_s15 = smov 27  }
  0x25   :  { %7802 = sst [smem:[#allocation79_spill]] %s6800_s17 }
  0x26   :  { %s6820_s17 = sld [smem:[%s7767_s0 + %s6622_s22]]   ;;  %s6626_s22 = smov 28  }
  0x27   :  { %s6825_s12 = sld [smem:[%s7767_s0 + %s6623_s28]]   ;;  %s6627_s28 = smov 29  }
  0x28   :  { %s6835_s30 = sld [smem:[%s7767_s0 + %s6625_s15]]   ;;  %s6629_s15 = smov 31  }
  0x29   :  { %7803 = sst [smem:[#allocation80_spill]] %s6810_s9 }
  0x2a   :  { %s6830_s9 = sld [smem:[%s7767_s0 + %s6624_s7]]   ;;  %s6628_s7 = smov 30  }
  0x2b   :  { %s6845_s14 = sld [smem:[%s7767_s0 + %s6627_s28]]   ;;  %s6631_s28 = smov 33  }
  0x2c   :  { %7804 = sst [smem:[#allocation81_spill]] %s6820_s17 }
  0x2d   :  { %s6840_s17 = sld [smem:[%s7767_s0 + %s6626_s22]]   ;;  %s6630_s22 = smov 32  }
  0x2e   :  { %s6855_s3 = sld [smem:[%s7767_s0 + %s6629_s15]]   ;;  %s6633_s15 = smov 35  }
  0x30   :  { %7805 = sst [smem:[#allocation82_spill]] %s6830_s9 }
  0x31   :  { %7807 = sst [smem:[#allocation84_spill]] %s6845_s14 }
  0x32   :  { %s6850_s9 = sld [smem:[%s7767_s0 + %s6628_s7]]   ;;  %s6632_s7 = smov 34  }
  0x33   :  { %7806 = sst [smem:[#allocation83_spill]] %s6840_s17 }
  0x34   :  { %7808 = sst [smem:[#allocation85_spill]] %s6855_s3 }
  0x35   :  { %s6860_s17 = sld [smem:[%s7767_s0 + %s6630_s22]]   ;;  %s6634_s22 = smov 36  }
  0x36   :  { %s6865_s14 = sld [smem:[%s7767_s0 + %s6631_s28]]   ;;  %s6635_s28 = smov 37  }
  0x37   :  { %s6870_s25 = sld [smem:[%s7767_s0 + %s6632_s7]]   ;;  %s6636_s7 = smov 38  }
  0x38   :  { %s6875_s3 = sld [smem:[%s7767_s0 + %s6633_s15]]   ;;  %s6637_s15 = smov 39  }
  0x39   :  { %s6890_s13 = sld [smem:[%s7767_s0 + %s6636_s7]]   ;;  %s6640_s7 = smov 42  }
  0x3b   :  { %7809 = sst [smem:[#allocation86_spill]] %s6860_s17 }
  0x3c   :  { %7810 = sst [smem:[#allocation87_spill]] %s6865_s14 }
  0x3d   :  { %s6880_s17 = sld [smem:[%s7767_s0 + %s6634_s22]]   ;;  %s6638_s22 = smov 40  }
  0x3e   :  { %7811 = sst [smem:[#allocation88_spill]] %s6875_s3 }
  0x3f   :  { %s6885_s14 = sld [smem:[%s7767_s0 + %s6635_s28]]   ;;  %s6639_s28 = smov 41  }
  0x40   :  { %7814 = sst [smem:[#allocation91_spill]] %s6890_s13 }
  0x41   :  { %s6895_s3 = sld [smem:[%s7767_s0 + %s6637_s15]]   ;;  %s6641_s15 = smov 43  }
  0x42   :  { %s6910_s13 = sld [smem:[%s7767_s0 + %s6640_s7]]   ;;  %s6644_s7 = smov 46  }
  0x43   :  { %7812 = sst [smem:[#allocation89_spill]] %s6880_s17 }
  0x44   :  { %s6900_s17 = sld [smem:[%s7767_s0 + %s6638_s22]]   ;;  %s6642_s22 = smov 44  }
  0x45   :  { %7813 = sst [smem:[#allocation90_spill]] %s6885_s14 }
  0x46   :  { %s6905_s14 = sld [smem:[%s7767_s0 + %s6639_s28]]   ;;  %s6643_s28 = smov 45  }
  0x47   :  { %7815 = sst [smem:[#allocation92_spill]] %s6895_s3 }
  0x48   :  { %7818 = sst [smem:[#allocation95_spill]] %s6910_s13 }
  0x49   :  { %s6915_s3 = sld [smem:[%s7767_s0 + %s6641_s15]]  }
  0x4a   :  { %7816 = sst [smem:[#allocation93_spill]] %s6900_s17 }
  0x4b   :  { %s6920_s17 = sld [smem:[%s7767_s0 + %s6642_s22]]  }
  0x4c   :  { %7817 = sst [smem:[#allocation94_spill]] %s6905_s14 }
  0x4d   :  { %s6925_s14 = sld [smem:[%s7767_s0 + %s6643_s28]]  }
  0x4e   :  { %s6930_s13 = sld [smem:[%s7767_s0 + %s6644_s7]]  }
  0x4f   :  { %99 = vsyncpa [#allocation3], 0 }
  0x50   :  { %100 = vsyncpa [#allocation6], 0 }
  0x51   :  { %101 = vsyncpa [#allocation9], 0 }
  0x52   :  { %102 = vsyncpa [#allocation12], 0 }
  0x53   :  { %103 = vsyncpa [#allocation15], 0 }
  0x54   :  { %104 = vsyncpa [#allocation18], 0 }
  0x55   :  { %105 = vsyncpa [#allocation21], 0 }
  0x56   :  { %106 = vsyncpa [#allocation24], 0 }
  0x57   :  { %107 = vsyncpa [#allocation27], 0 }
  0x58   :  { %108 = vsyncpa [#allocation30], 0 }
  0x59   :  { %109 = vsyncpa [#allocation33], 0 }
  0x5a   :  { %110 = vsyncpa [#allocation36], 0 }
  0x5b   :  { %111 = vsyncpa [#allocation39], 0 }
  0x5c   :  { %112 = vsyncpa [#allocation42], 0 }
  0x5d   :  { %113 = vsyncpa [#allocation45], 0 }
  0x5e   :  { %114 = vsyncpa [#allocation48], 0 }
  0x5f   :  { %115 = vsyncpa [#allocation4], 0  ;;  %s6645_s0 = smov [#allocation5]   ;;  %s5883_s16 = scalar_lea.hbm %s6720_s21, 512 }
  0x60   :  { %s137_s15 = sshll.u32 %s6645_s0, 4  ;;  %p5884_p0 = scmp.ne.s32.totalorder %s6720_s21, %s5883_s16  ;;  %s138_s15 = int_to_ptr.vmem [resolvable:$true] %s137_s15 }
  0x61   :  { %p5887_p1 = scmp.lt.u32.totalorder %s5883_s16, %s6720_s21 }
  0x63   :  { %p5889_p2 = pnand %p5887_p1, %p5884_p0 }
  0x65   :  { %5892 = shalt.err (!%p5889_p2)
}
  0x66   :  { %s5893_s18 = scalar_lea.vmem %s138_s15, 512  ;;  %p5898_p4 = scmp.lt.s32.totalorder %s138_s15, %s138_s15 }
  0x67   :  { %p5894_p3 = scmp.ne.s32.totalorder %s138_s15, %s5893_s18  ;;  %p5899_p5 = scmp.lt.s32.totalorder %s5893_s18, %s5893_s18 }
  0x69   :  { %p5900_p6 = por %p5899_p5, %p5898_p4 }
  0x6b   :  { %p5901_p7 = pnand %p5900_p6, %p5894_p3 }
  0x6d   :  { %5904 = shalt.err (!%p5901_p7)
}
  0x6e   :  { %s6646_s22 = smov 64   ;;  %s6647_s23 = smov 4  }
  0x6f   :  { %143 = dma.hbm_to_vmem [thread:$0]  %s6720_s21, 512, %s138_s15, [#allocation6], %s6646_s22, %s6646_s22, %s6647_s23  }
  0x70   :  { %s6648_s26 = smov [#allocation8]   ;;  %s5905_s1 = scalar_lea.hbm %s6730_s29, 2048 }
  0x71   :  { %s159_s28 = sshll.u32 %s6648_s26, 4  ;;  %p5906_p8 = scmp.ne.s32.totalorder %s6730_s29, %s5905_s1  ;;  %s160_s28 = int_to_ptr.vmem [resolvable:$true] %s159_s28 }
  0x72   :  { %p5909_p9 = scmp.lt.u32.totalorder %s5905_s1, %s6730_s29 }
  0x74   :  { %p5911_p10 = pnand %p5909_p9, %p5906_p8 }
  0x76   :  { %5914 = shalt.err (!%p5911_p10)
}
  0x77   :  { %s5915_s2 = scalar_lea.vmem %s160_s28, 2048  ;;  %p5920_p12 = scmp.lt.s32.totalorder %s160_s28, %s160_s28 }
  0x78   :  { %p5916_p11 = scmp.ne.s32.totalorder %s160_s28, %s5915_s2  ;;  %p5921_p13 = scmp.lt.s32.totalorder %s5915_s2, %s5915_s2 }
  0x7a   :  { %p5922_p0 = por %p5921_p13, %p5920_p12 }
  0x7c   :  { %p5923_p1 = pnand %p5922_p0, %p5916_p11 }
  0x7e   :  { %5926 = shalt.err (!%p5923_p1)
}
  0x7f   :  { %s6649_s7 = smov 128   ;;  %s6650_s21 = smov 8  }
  0x80   :  { %165 = dma.hbm_to_vmem [thread:$0]  %s6730_s29, 2048, %s160_s28, [#allocation9], %s6649_s7, %s6649_s7, %s6650_s21  }
  0x81   :  { %s6651_s10 = smov [#allocation11]   ;;  %s6652_s0 = smov [#allocation14]  }
  0x82   :  { %s181_s11 = sshll.u32 %s6651_s10, 4  ;;  %s206_s15 = sshll.u32 %s6652_s0, 4  ;;  %s182_s11 = int_to_ptr.vmem [resolvable:$true] %s181_s11  ;;  %s207_s15 = int_to_ptr.vmem [resolvable:$true] %s206_s15 }
  0x83   :  { %s5927_s16 = scalar_lea.hbm %s6740_s8, 4096 }
  0x84   :  { %p5928_p2 = scmp.ne.s32.totalorder %s6740_s8, %s5927_s16  ;;  %p5931_p3 = scmp.lt.u32.totalorder %s5927_s16, %s6740_s8 }
  0x86   :  { %p5933_p4 = pnand %p5931_p3, %p5928_p2 }
  0x88   :  { %5936 = shalt.err (!%p5933_p4)
}
  0x89   :  { %s5937_s18 = scalar_lea.vmem %s182_s11, 4096  ;;  %p5942_p6 = scmp.lt.s32.totalorder %s182_s11, %s182_s11 }
  0x8a   :  { %p5938_p5 = scmp.ne.s32.totalorder %s182_s11, %s5937_s18  ;;  %p5943_p7 = scmp.lt.s32.totalorder %s5937_s18, %s5937_s18 }
  0x8c   :  { %p5944_p8 = por %p5943_p7, %p5942_p6 }
  0x8e   :  { %p5945_p9 = pnand %p5944_p8, %p5938_p5 }
  0x90   :  { %5948 = shalt.err (!%p5945_p9)
}
  0x91   :  { %187 = dma.hbm_to_vmem [thread:$0]  %s6740_s8, 4096, %s182_s11, [#allocation12], %s6649_s7, %s6649_s7, %s6650_s21  }
  0x92   :  { %s5949_s29 = scalar_lea.hbm %s6755_s24, 16 }
  0x93   :  { %p5950_p10 = scmp.ne.s32.totalorder %s6755_s24, %s5949_s29  ;;  %p5953_p11 = scmp.lt.u32.totalorder %s5949_s29, %s6755_s24 }
  0x95   :  { %p5955_p12 = pnand %p5953_p11, %p5950_p10 }
  0x97   :  { %5958 = shalt.err (!%p5955_p12)
}
  0x98   :  { %s5959_s26 = scalar_lea.vmem %s207_s15, 16  ;;  %s5963_s28 = scalar_lea.vmem %s207_s15, 32 }
  0x99   :  { %p5960_p13 = scmp.ne.s32.totalorder %s207_s15, %s5959_s26  ;;  %p5964_p0 = scmp.lt.s32.totalorder %s207_s15, %s207_s15 }
  0x9a   :  { %p5965_p1 = scmp.lt.s32.totalorder %s5963_s28, %s5959_s26 }
  0x9c   :  { %p5966_p2 = por %p5965_p1, %p5964_p0 }
  0x9e   :  { %p5967_p3 = pnand %p5966_p2, %p5960_p13 }
  0xa0   :  { %5970 = shalt.err (!%p5967_p3)
}
  0xa1   :  { %209 = dma.hbm_to_vmem [thread:$0]  %s6755_s24, 16, %s207_s15, [#allocation15]  }
  0xa2   :  { %s6653_s1 = smov [#allocation17]   ;;  %s6654_s2 = smov [#allocation20]  }
  0xa3   :  { %s228_s8 = sshll.u32 %s6653_s1, 4  ;;  %s248_s10 = sshll.u32 %s6654_s2, 4  ;;  %s229_s8 = int_to_ptr.vmem [resolvable:$true] %s228_s8  ;;  %s249_s10 = int_to_ptr.vmem [resolvable:$true] %s248_s10 }
  0xa4   :  { %s5971_s11 = scalar_lea.hbm %s6765_s6, 16 }
  0xa5   :  { %p5972_p4 = scmp.ne.s32.totalorder %s6765_s6, %s5971_s11  ;;  %p5975_p5 = scmp.lt.u32.totalorder %s5971_s11, %s6765_s6 }
  0xa7   :  { %p5977_p6 = pnand %p5975_p5, %p5972_p4 }
  0xa9   :  { %5980 = shalt.err (!%p5977_p6)
}
  0xaa   :  { %s5981_s0 = scalar_lea.vmem %s229_s8, 16  ;;  %s5985_s16 = scalar_lea.vmem %s229_s8, 32 }
  0xab   :  { %p5982_p7 = scmp.ne.s32.totalorder %s229_s8, %s5981_s0  ;;  %p5986_p8 = scmp.lt.s32.totalorder %s229_s8, %s229_s8 }
  0xac   :  { %p5987_p9 = scmp.lt.s32.totalorder %s5985_s16, %s5981_s0 }
  0xae   :  { %p5988_p10 = por %p5987_p9, %p5986_p8 }
  0xb0   :  { %p5989_p11 = pnand %p5988_p10, %p5982_p7 }
  0xb2   :  { %5992 = shalt.err (!%p5989_p11)
}
  0xb3   :  { %231 = dma.hbm_to_vmem [thread:$0]  %s6765_s6, 16, %s229_s8, [#allocation18]  }
  0xb4   :  { %s5993_s24 = scalar_lea.hbm %s6775_s20, 16 }
  0xb5   :  { %p5994_p12 = scmp.ne.s32.totalorder %s6775_s20, %s5993_s24  ;;  %p5997_p13 = scmp.lt.u32.totalorder %s5993_s24, %s6775_s20 }
  0xb7   :  { %p5999_p0 = pnand %p5997_p13, %p5994_p12 }
  0xb9   :  { %6002 = shalt.err (!%p5999_p0)
}
  0xba   :  { %s6003_s15 = scalar_lea.vmem %s249_s10, 16  ;;  %s6007_s18 = scalar_lea.vmem %s249_s10, 32 }
  0xbb   :  { %p6004_p1 = scmp.ne.s32.totalorder %s249_s10, %s6003_s15  ;;  %p6008_p2 = scmp.lt.s32.totalorder %s249_s10, %s249_s10 }
  0xbc   :  { %p6009_p3 = scmp.lt.s32.totalorder %s6007_s18, %s6003_s15 }
  0xbe   :  { %p6010_p4 = por %p6009_p3, %p6008_p2 }
  0xc0   :  { %p6011_p5 = pnand %p6010_p4, %p6004_p1 }
  0xc2   :  { %6014 = shalt.err (!%p6011_p5)
}
  0xc3   :  { %251 = dma.hbm_to_vmem [thread:$0]  %s6775_s20, 16, %s249_s10, [#allocation21]  }
  0xc4   :  { %s6655_s29 = smov [#allocation23]   ;;  %s6656_s26 = smov [#allocation26]  }
  0xc5   :  { %s270_s6 = sshll.u32 %s6655_s29, 4  ;;  %s292_s28 = sshll.u32 %s6656_s26, 4  ;;  %s271_s6 = int_to_ptr.vmem [resolvable:$true] %s270_s6  ;;  %s293_s28 = int_to_ptr.vmem [resolvable:$true] %s292_s28 }
  0xc6   :  { %s6015_s1 = scalar_lea.hbm %s6785_s4, 16 }
  0xc7   :  { %p6016_p6 = scmp.ne.s32.totalorder %s6785_s4, %s6015_s1  ;;  %p6019_p7 = scmp.lt.u32.totalorder %s6015_s1, %s6785_s4 }
  0xc9   :  { %p6021_p8 = pnand %p6019_p7, %p6016_p6 }
  0xcb   :  { %6024 = shalt.err (!%p6021_p8)
}
  0xcc   :  { %s6025_s8 = scalar_lea.vmem %s271_s6, 16  ;;  %s6029_s2 = scalar_lea.vmem %s271_s6, 32 }
  0xcd   :  { %p6026_p9 = scmp.ne.s32.totalorder %s271_s6, %s6025_s8  ;;  %p6030_p10 = scmp.lt.s32.totalorder %s271_s6, %s271_s6 }
  0xce   :  { %p6031_p11 = scmp.lt.s32.totalorder %s6029_s2, %s6025_s8 }
  0xd0   :  { %p6032_p12 = por %p6031_p11, %p6030_p10 }
  0xd2   :  { %p6033_p13 = pnand %p6032_p12, %p6026_p9 }
  0xd4   :  { %6036 = shalt.err (!%p6033_p13)
}
  0xd5   :  { %273 = dma.hbm_to_vmem [thread:$0]  %s6785_s4, 16, %s271_s6, [#allocation24]  }
  0xd6   :  { %s6037_s20 = scalar_lea.hbm %s6795_s19, 32 }
  0xd7   :  { %p6038_p0 = scmp.ne.s32.totalorder %s6795_s19, %s6037_s20  ;;  %p6041_p1 = scmp.lt.u32.totalorder %s6037_s20, %s6795_s19 }
  0xd9   :  { %p6043_p2 = pnand %p6041_p1, %p6038_p0 }
  0xdb   :  { %6046 = shalt.err (!%p6043_p2)
}
  0xdc   :  { %s6047_s10 = scalar_lea.vmem %s293_s28, 32  ;;  %p6052_p4 = scmp.lt.s32.totalorder %s293_s28, %s293_s28 }
  0xdd   :  { %p6048_p3 = scmp.ne.s32.totalorder %s293_s28, %s6047_s10  ;;  %p6053_p5 = scmp.lt.s32.totalorder %s6047_s10, %s6047_s10 }
  0xdf   :  { %p6054_p6 = por %p6053_p5, %p6052_p4 }
  0xe1   :  { %p6055_p7 = pnand %p6054_p6, %p6048_p3 }
  0xe3   :  { %6058 = shalt.err (!%p6055_p7)
}
  0xe4   :  { %295 = dma.hbm_to_vmem [thread:$0]  %s6795_s19, 32, %s293_s28, [#allocation27]  }
  0xe5   :  { %s6657_s11 = smov [#allocation29]   ;;  %s6658_s4 = smov [#allocation32]  }
  0xe6   :  { %s312_s0 = sshll.u32 %s6657_s11, 4  ;;  %s334_s16 = sshll.u32 %s6658_s4, 4  ;;  %s313_s0 = int_to_ptr.vmem [resolvable:$true] %s312_s0  ;;  %s335_s16 = int_to_ptr.vmem [resolvable:$true] %s334_s16 }
  0xe7   :  { %s6059_s24 = scalar_lea.hbm %s6805_s5, 16 }
  0xe8   :  { %p6060_p8 = scmp.ne.s32.totalorder %s6805_s5, %s6059_s24  ;;  %p6063_p9 = scmp.lt.u32.totalorder %s6059_s24, %s6805_s5 }
  0xea   :  { %p6065_p10 = pnand %p6063_p9, %p6060_p8 }
  0xec   :  { %6068 = shalt.err (!%p6065_p10)
}
  0xed   :  { %s6069_s15 = scalar_lea.vmem %s313_s0, 16  ;;  %s6073_s18 = scalar_lea.vmem %s313_s0, 32 }
  0xee   :  { %p6070_p11 = scmp.ne.s32.totalorder %s313_s0, %s6069_s15  ;;  %p6074_p12 = scmp.lt.s32.totalorder %s313_s0, %s313_s0 }
  0xef   :  { %p6075_p13 = scmp.lt.s32.totalorder %s6073_s18, %s6069_s15 }
  0xf1   :  { %p6076_p0 = por %p6075_p13, %p6074_p12 }
  0xf3   :  { %p6077_p1 = pnand %p6076_p0, %p6070_p11 }
  0xf5   :  { %6080 = shalt.err (!%p6077_p1)
}
  0xf6   :  { %315 = dma.hbm_to_vmem [thread:$0]  %s6805_s5, 16, %s313_s0, [#allocation30]  }
  0xf7   :  { %s6081_s19 = scalar_lea.hbm %s6815_s27, 16 }
  0xf8   :  { %p6082_p2 = scmp.ne.s32.totalorder %s6815_s27, %s6081_s19  ;;  %p6085_p3 = scmp.lt.u32.totalorder %s6081_s19, %s6815_s27 }
  0xfa   :  { %p6087_p4 = pnand %p6085_p3, %p6082_p2 }
  0xfc   :  { %6090 = shalt.err (!%p6087_p4)
}
  0xfd   :  { %s6091_s29 = scalar_lea.vmem %s335_s16, 16  ;;  %s6095_s6 = scalar_lea.vmem %s335_s16, 32 }
  0xfe   :  { %p6092_p5 = scmp.ne.s32.totalorder %s335_s16, %s6091_s29  ;;  %p6096_p6 = scmp.lt.s32.totalorder %s335_s16, %s335_s16 }
  0xff   :  { %p6097_p7 = scmp.lt.s32.totalorder %s6095_s6, %s6091_s29 }
 0x101   :  { %p6098_p8 = por %p6097_p7, %p6096_p6 }
 0x103   :  { %p6099_p9 = pnand %p6098_p8, %p6092_p5 }
 0x105   :  { %6102 = shalt.err (!%p6099_p9)
}
 0x106   :  { %337 = dma.hbm_to_vmem [thread:$0]  %s6815_s27, 16, %s335_s16, [#allocation33]  }
 0x107   :  { %s6659_s26 = smov [#allocation35]   ;;  %s6660_s28 = smov [#allocation38]  }
 0x108   :  { %s356_s5 = sshll.u32 %s6659_s26, 4  ;;  %s378_s1 = sshll.u32 %s6660_s28, 4  ;;  %s357_s5 = int_to_ptr.vmem [resolvable:$true] %s356_s5  ;;  %s379_s1 = int_to_ptr.vmem [resolvable:$true] %s378_s1 }
 0x109   :  { %s6103_s8 = scalar_lea.hbm %s6825_s12, 32 }
 0x10a   :  { %p6104_p10 = scmp.ne.s32.totalorder %s6825_s12, %s6103_s8  ;;  %p6107_p11 = scmp.lt.u32.totalorder %s6103_s8, %s6825_s12 }
 0x10c   :  { %p6109_p12 = pnand %p6107_p11, %p6104_p10 }
 0x10e   :  { %6112 = shalt.err (!%p6109_p12)
}
 0x10f   :  { %s6113_s2 = scalar_lea.vmem %s357_s5, 32  ;;  %p6118_p0 = scmp.lt.s32.totalorder %s357_s5, %s357_s5 }
 0x110   :  { %p6114_p13 = scmp.ne.s32.totalorder %s357_s5, %s6113_s2  ;;  %p6119_p1 = scmp.lt.s32.totalorder %s6113_s2, %s6113_s2 }
 0x112   :  { %p6120_p2 = por %p6119_p1, %p6118_p0 }
 0x114   :  { %p6121_p3 = pnand %p6120_p2, %p6114_p13 }
 0x116   :  { %6124 = shalt.err (!%p6121_p3)
}
 0x117   :  { %359 = dma.hbm_to_vmem [thread:$0]  %s6825_s12, 32, %s357_s5, [#allocation36]  }
 0x118   :  { %s6125_s27 = scalar_lea.hbm %s6835_s30, 16 }
 0x119   :  { %p6126_p4 = scmp.ne.s32.totalorder %s6835_s30, %s6125_s27  ;;  %p6129_p5 = scmp.lt.u32.totalorder %s6125_s27, %s6835_s30 }
 0x11b   :  { %p6131_p6 = pnand %p6129_p5, %p6126_p4 }
 0x11d   :  { %6134 = shalt.err (!%p6131_p6)
}
 0x11e   :  { %s6135_s20 = scalar_lea.vmem %s379_s1, 16  ;;  %s6139_s10 = scalar_lea.vmem %s379_s1, 32 }
 0x11f   :  { %p6136_p7 = scmp.ne.s32.totalorder %s379_s1, %s6135_s20  ;;  %p6140_p8 = scmp.lt.s32.totalorder %s379_s1, %s379_s1 }
 0x120   :  { %p6141_p9 = scmp.lt.s32.totalorder %s6139_s10, %s6135_s20 }
 0x122   :  { %p6142_p10 = por %p6141_p9, %p6140_p8 }
 0x124   :  { %p6143_p11 = pnand %p6142_p10, %p6136_p7 }
 0x126   :  { %6146 = shalt.err (!%p6143_p11)
}
 0x127   :  { %381 = dma.hbm_to_vmem [thread:$0]  %s6835_s30, 16, %s379_s1, [#allocation39]  }
 0x128   :  { %s6661_s11 = smov [#allocation41]   ;;  %s6662_s0 = smov [#allocation44]  }
 0x129   :  { %s399_s12 = sshll.u32 %s6661_s11, 4  ;;  %s425_s4 = sshll.u32 %s6662_s0, 4  ;;  %s400_s12 = int_to_ptr.vmem [resolvable:$true] %s399_s12  ;;  %s6989_s4 = int_to_ptr.vmem [resolvable:$true] %s425_s4 }
 0x12a   :  { %s6147_s16 = scalar_lea.hbm %s6850_s9, 1024 }
 0x12b   :  { %p6148_p12 = scmp.ne.s32.totalorder %s6850_s9, %s6147_s16  ;;  %p6151_p13 = scmp.lt.u32.totalorder %s6147_s16, %s6850_s9 }
 0x12d   :  { %p6153_p0 = pnand %p6151_p13, %p6148_p12 }
 0x12f   :  { %6156 = shalt.err (!%p6153_p0)
}
 0x130   :  { %s6157_s24 = scalar_lea.vmem %s400_s12, 1024  ;;  %p6162_p2 = scmp.lt.s32.totalorder %s400_s12, %s400_s12 }
 0x131   :  { %p6158_p1 = scmp.ne.s32.totalorder %s400_s12, %s6157_s24  ;;  %p6163_p3 = scmp.lt.s32.totalorder %s6157_s24, %s6157_s24 }
 0x133   :  { %p6164_p4 = por %p6163_p3, %p6162_p2 }
 0x135   :  { %p6165_p5 = pnand %p6164_p4, %p6158_p1 }
 0x137   :  { %6168 = shalt.err (!%p6165_p5)
}
 0x138   :  { %405 = dma.hbm_to_vmem [thread:$0]  %s6850_s9, 1024, %s400_s12, [#allocation42], %s6649_s7, %s6649_s7, %s6650_s21  }
 0x139   :  { %s6169_s30 = scalar_lea.hbm %s6870_s25, 512 }
 0x13a   :  { %p6170_p6 = scmp.ne.s32.totalorder %s6870_s25, %s6169_s30  ;;  %p6173_p7 = scmp.lt.u32.totalorder %s6169_s30, %s6870_s25 }
 0x13c   :  { %p6175_p8 = pnand %p6173_p7, %p6170_p6 }
 0x13e   :  { %6178 = shalt.err (!%p6175_p8)
}
 0x13f   :  { %s6179_s15 = scalar_lea.vmem %s6989_s4, 512  ;;  %p6184_p10 = scmp.lt.s32.totalorder %s6989_s4, %s6989_s4 }
 0x140   :  { %p6180_p9 = scmp.ne.s32.totalorder %s6989_s4, %s6179_s15  ;;  %p6185_p11 = scmp.lt.s32.totalorder %s6179_s15, %s6179_s15 }
 0x142   :  { %p6186_p12 = por %p6185_p11, %p6184_p10 }
 0x144   :  { %p6187_p13 = pnand %p6186_p12, %p6180_p9 }
 0x146   :  { %6190 = shalt.err (!%p6187_p13)
}
 0x147   :  { %s7819_s9 = sld [smem:[#allocation69_spill]]  ;;  %s6663_s18 = smov [#allocation2]  }
 0x148   :  { %431 = dma.hbm_to_vmem [thread:$0]  %s6870_s25, 512, %s6989_s4, [#allocation45], %s6646_s22, %s6646_s22, %s6647_s23  }
 0x149   :  { %s126_s19 = sshll.u32 %s6663_s18, 4  ;;  %s6664_s29 = smov [#allocation7]   ;;  %s127_s19 = int_to_ptr.vmem [resolvable:$true] %s126_s19 }
 0x14a   :  { %s150_s6 = sshll.u32 %s6664_s29, 4  ;;  %s151_s6 = int_to_ptr.vmem [resolvable:$true] %s150_s6 }
 0x14d   :  { %s6191_s26 = scalar_lea.hbm %s7819_s9, 128 }
 0x14e   :  { %p6192_p0 = scmp.ne.s32.totalorder %s7819_s9, %s6191_s26  ;;  %p6195_p1 = scmp.lt.u32.totalorder %s6191_s26, %s7819_s9 }
 0x150   :  { %p6197_p2 = pnand %p6195_p1, %p6192_p0 }
 0x152   :  { %6200 = shalt.err (!%p6197_p2)
}
 0x153   :  { %s6201_s5 = scalar_lea.vmem %s127_s19, 128  ;;  %p6206_p4 = scmp.lt.s32.totalorder %s127_s19, %s127_s19 }
 0x154   :  { %p6202_p3 = scmp.ne.s32.totalorder %s127_s19, %s6201_s5  ;;  %p6207_p5 = scmp.lt.s32.totalorder %s6201_s5, %s6201_s5 }
 0x156   :  { %p6208_p6 = por %p6207_p5, %p6206_p4 }
 0x158   :  { %p6209_p7 = pnand %p6208_p6, %p6202_p3 }
 0x15a   :  { %6212 = shalt.err (!%p6209_p7)
}
 0x15b   :  { %s7820_s25 = sld [smem:[#allocation71_spill]] }
 0x15c   :  { %129 = dma.hbm_to_vmem [thread:$0]  %s7819_s9, 128, %s127_s19, [#allocation3]  }
 0x161   :  { %s6213_s28 = scalar_lea.hbm %s7820_s25, 16 }
 0x162   :  { %p6214_p8 = scmp.ne.s32.totalorder %s7820_s25, %s6213_s28  ;;  %p6217_p9 = scmp.lt.u32.totalorder %s6213_s28, %s7820_s25 }
 0x164   :  { %p6219_p10 = pnand %p6217_p9, %p6214_p8 }
 0x166   :  { %6222 = shalt.err (!%p6219_p10)
}
 0x167   :  { %s6223_s1 = scalar_lea.vmem %s151_s6, 16  ;;  %s6227_s8 = scalar_lea.vmem %s151_s6, 32 }
 0x168   :  { %p6224_p11 = scmp.ne.s32.totalorder %s151_s6, %s6223_s1  ;;  %p6228_p12 = scmp.lt.s32.totalorder %s151_s6, %s151_s6 }
 0x169   :  { %p6229_p13 = scmp.lt.s32.totalorder %s6227_s8, %s6223_s1 }
 0x16b   :  { %p6230_p0 = por %p6229_p13, %p6228_p12 }
 0x16d   :  { %p6231_p1 = pnand %p6230_p0, %p6224_p11 }
 0x16f   :  { %6234 = shalt.err (!%p6231_p1)
}
 0x170   :  { %s7821_s2 = sld [smem:[#allocation72_spill]]  ;;  %s6665_s27 = smov [#allocation10]  }
 0x171   :  { %153 = dma.hbm_to_vmem [thread:$0]  %s7820_s25, 16, %s151_s6, [#allocation6]  }
 0x172   :  { %s172_s20 = sshll.u32 %s6665_s27, 4  ;;  %s6666_s10 = smov [#allocation13]   ;;  %s173_s20 = int_to_ptr.vmem [resolvable:$true] %s172_s20 }
 0x173   :  { %s194_s11 = sshll.u32 %s6666_s10, 4  ;;  %s195_s11 = int_to_ptr.vmem [resolvable:$true] %s194_s11 }
 0x176   :  { %s6235_s12 = scalar_lea.hbm %s7821_s2, 32 }
 0x177   :  { %p6236_p2 = scmp.ne.s32.totalorder %s7821_s2, %s6235_s12  ;;  %p6239_p3 = scmp.lt.u32.totalorder %s6235_s12, %s7821_s2 }
 0x179   :  { %p6241_p4 = pnand %p6239_p3, %p6236_p2 }
 0x17b   :  { %6244 = shalt.err (!%p6241_p4)
}
 0x17c   :  { %s6245_s0 = scalar_lea.vmem %s173_s20, 32  ;;  %p6250_p6 = scmp.lt.s32.totalorder %s173_s20, %s173_s20 }
 0x17d   :  { %p6246_p5 = scmp.ne.s32.totalorder %s173_s20, %s6245_s0  ;;  %p6251_p7 = scmp.lt.s32.totalorder %s6245_s0, %s6245_s0 }
 0x17f   :  { %p6252_p8 = por %p6251_p7, %p6250_p6 }
 0x181   :  { %p6253_p9 = pnand %p6252_p8, %p6246_p5 }
 0x183   :  { %6256 = shalt.err (!%p6253_p9)
}
 0x184   :  { %s7822_s4 = sld [smem:[#allocation73_spill]] }
 0x185   :  { %175 = dma.hbm_to_vmem [thread:$0]  %s7821_s2, 32, %s173_s20, [#allocation9]  }
 0x18a   :  { %s6257_s16 = scalar_lea.hbm %s7822_s4, 16 }
 0x18b   :  { %p6258_p10 = scmp.ne.s32.totalorder %s7822_s4, %s6257_s16  ;;  %p6261_p11 = scmp.lt.u32.totalorder %s6257_s16, %s7822_s4 }
 0x18d   :  { %p6263_p12 = pnand %p6261_p11, %p6258_p10 }
 0x18f   :  { %6266 = shalt.err (!%p6263_p12)
}
 0x190   :  { %s6267_s24 = scalar_lea.vmem %s195_s11, 16  ;;  %s6271_s30 = scalar_lea.vmem %s195_s11, 32 }
 0x191   :  { %p6268_p13 = scmp.ne.s32.totalorder %s195_s11, %s6267_s24  ;;  %p6272_p0 = scmp.lt.s32.totalorder %s195_s11, %s195_s11 }
 0x192   :  { %p6273_p1 = scmp.lt.s32.totalorder %s6271_s30, %s6267_s24 }
 0x194   :  { %p6274_p2 = por %p6273_p1, %p6272_p0 }
 0x196   :  { %p6275_p3 = pnand %p6274_p2, %p6268_p13 }
 0x198   :  { %6278 = shalt.err (!%p6275_p3)
}
 0x199   :  { %s7823_s15 = sld [smem:[#allocation75_spill]]  ;;  %s6667_s9 = smov [#allocation16]  }
 0x19a   :  { %197 = dma.hbm_to_vmem [thread:$0]  %s7822_s4, 16, %s195_s11, [#allocation12]  }
 0x19b   :  { %s215_s18 = sshll.u32 %s6667_s9, 4  ;;  %s6668_s19 = smov [#allocation19]   ;;  %s216_s18 = int_to_ptr.vmem [resolvable:$true] %s215_s18 }
 0x19c   :  { %s238_s29 = sshll.u32 %s6668_s19, 4  ;;  %s239_s29 = int_to_ptr.vmem [resolvable:$true] %s238_s29 }
 0x19f   :  { %s6279_s6 = scalar_lea.hbm %s7823_s15, 1024 }
 0x1a0   :  { %p6280_p4 = scmp.ne.s32.totalorder %s7823_s15, %s6279_s6  ;;  %p6283_p5 = scmp.lt.u32.totalorder %s6279_s6, %s7823_s15 }
 0x1a2   :  { %p6285_p6 = pnand %p6283_p5, %p6280_p4 }
 0x1a4   :  { %6288 = shalt.err (!%p6285_p6)
}
 0x1a5   :  { %s6289_s26 = scalar_lea.vmem %s216_s18, 1024  ;;  %p6294_p8 = scmp.lt.s32.totalorder %s216_s18, %s216_s18 }
 0x1a6   :  { %p6290_p7 = scmp.ne.s32.totalorder %s216_s18, %s6289_s26  ;;  %p6295_p9 = scmp.lt.s32.totalorder %s6289_s26, %s6289_s26 }
 0x1a8   :  { %p6296_p10 = por %p6295_p9, %p6294_p8 }
 0x1aa   :  { %p6297_p11 = pnand %p6296_p10, %p6290_p7 }
 0x1ac   :  { %6300 = shalt.err (!%p6297_p11)
}
 0x1ad   :  { %s7824_s5 = sld [smem:[#allocation76_spill]] }
 0x1ae   :  { %221 = dma.hbm_to_vmem [thread:$0]  %s7823_s15, 1024, %s216_s18, [#allocation15], %s6649_s7, %s6649_s7, %s6650_s21  }
 0x1b3   :  { %s6301_s25 = scalar_lea.hbm %s7824_s5, 64 }
 0x1b4   :  { %p6302_p12 = scmp.ne.s32.totalorder %s7824_s5, %s6301_s25  ;;  %p6305_p13 = scmp.lt.u32.totalorder %s6301_s25, %s7824_s5 }
 0x1b6   :  { %p6307_p0 = pnand %p6305_p13, %p6302_p12 }
 0x1b8   :  { %6310 = shalt.err (!%p6307_p0)
}
 0x1b9   :  { %s6311_s28 = scalar_lea.vmem %s239_s29, 64  ;;  %p6316_p2 = scmp.lt.s32.totalorder %s239_s29, %s239_s29 }
 0x1ba   :  { %p6312_p1 = scmp.ne.s32.totalorder %s239_s29, %s6311_s28  ;;  %p6317_p3 = scmp.lt.s32.totalorder %s6311_s28, %s6311_s28 }
 0x1bc   :  { %p6318_p4 = por %p6317_p3, %p6316_p2 }
 0x1be   :  { %p6319_p5 = pnand %p6318_p4, %p6312_p1 }
 0x1c0   :  { %6322 = shalt.err (!%p6319_p5)
}
 0x1c1   :  { %s7825_s1 = sld [smem:[#allocation77_spill]]  ;;  %s6669_s8 = smov [#allocation22]  }
 0x1c2   :  { %241 = dma.hbm_to_vmem [thread:$0]  %s7824_s5, 64, %s239_s29, [#allocation18]  }
 0x1c3   :  { %s257_s2 = sshll.u32 %s6669_s8, 4  ;;  %s6670_s27 = smov [#allocation25]   ;;  %s258_s2 = int_to_ptr.vmem [resolvable:$true] %s257_s2 }
 0x1c4   :  { %s279_s20 = sshll.u32 %s6670_s27, 4  ;;  %s7037_s20 = int_to_ptr.vmem [resolvable:$true] %s279_s20 }
 0x1c7   :  { %s6323_s10 = scalar_lea.hbm %s7825_s1, 512 }
 0x1c8   :  { %p6324_p6 = scmp.ne.s32.totalorder %s7825_s1, %s6323_s10  ;;  %p6327_p7 = scmp.lt.u32.totalorder %s6323_s10, %s7825_s1 }
 0x1ca   :  { %p6329_p8 = pnand %p6327_p7, %p6324_p6 }
 0x1cc   :  { %6332 = shalt.err (!%p6329_p8)
}
 0x1cd   :  { %s6333_s11 = scalar_lea.vmem %s258_s2, 512  ;;  %p6338_p10 = scmp.lt.s32.totalorder %s258_s2, %s258_s2 }
 0x1ce   :  { %p6334_p9 = scmp.ne.s32.totalorder %s258_s2, %s6333_s11  ;;  %p6339_p11 = scmp.lt.s32.totalorder %s6333_s11, %s6333_s11 }
 0x1d0   :  { %p6340_p12 = por %p6339_p11, %p6338_p10 }
 0x1d2   :  { %p6341_p13 = pnand %p6340_p12, %p6334_p9 }
 0x1d4   :  { %6344 = shalt.err (!%p6341_p13)
}
 0x1d5   :  { %s7826_s12 = sld [smem:[#allocation78_spill]] }
 0x1d6   :  { %263 = dma.hbm_to_vmem [thread:$0]  %s7825_s1, 512, %s258_s2, [#allocation21], %s6646_s22, %s6646_s22, %s6647_s23  }
 0x1db   :  { %s6345_s0 = scalar_lea.hbm %s7826_s12, 2048 }
 0x1dc   :  { %p6346_p0 = scmp.ne.s32.totalorder %s7826_s12, %s6345_s0  ;;  %p6349_p1 = scmp.lt.u32.totalorder %s6345_s0, %s7826_s12 }
 0x1de   :  { %p6351_p2 = pnand %p6349_p1, %p6346_p0 }
 0x1e0   :  { %6354 = shalt.err (!%p6351_p2)
}
 0x1e1   :  { %s6355_s4 = scalar_lea.vmem %s7037_s20, 2048  ;;  %p6360_p4 = scmp.lt.s32.totalorder %s7037_s20, %s7037_s20 }
 0x1e2   :  { %p6356_p3 = scmp.ne.s32.totalorder %s7037_s20, %s6355_s4  ;;  %p6361_p5 = scmp.lt.s32.totalorder %s6355_s4, %s6355_s4 }
 0x1e4   :  { %p6362_p6 = por %p6361_p5, %p6360_p4 }
 0x1e6   :  { %p6363_p7 = pnand %p6362_p6, %p6356_p3 }
 0x1e8   :  { %6366 = shalt.err (!%p6363_p7)
}
 0x1e9   :  { %s7827_s16 = sld [smem:[#allocation79_spill]]  ;;  %s6671_s24 = smov [#allocation28]  }
 0x1ea   :  { %285 = dma.hbm_to_vmem [thread:$0]  %s7826_s12, 2048, %s7037_s20, [#allocation24], %s6649_s7, %s6649_s7, %s6650_s21  }
 0x1eb   :  { %s302_s30 = sshll.u32 %s6671_s24, 4  ;;  %s6672_s15 = smov [#allocation31]   ;;  %s303_s30 = int_to_ptr.vmem [resolvable:$true] %s302_s30 }
 0x1ec   :  { %s321_s9 = sshll.u32 %s6672_s15, 4  ;;  %s7058_s9 = int_to_ptr.vmem [resolvable:$true] %s321_s9 }
 0x1ef   :  { %s6367_s18 = scalar_lea.hbm %s7827_s16, 128 }
 0x1f0   :  { %p6368_p8 = scmp.ne.s32.totalorder %s7827_s16, %s6367_s18  ;;  %p6371_p9 = scmp.lt.u32.totalorder %s6367_s18, %s7827_s16 }
 0x1f2   :  { %p6373_p10 = pnand %p6371_p9, %p6368_p8 }
 0x1f4   :  { %6376 = shalt.err (!%p6373_p10)
}
 0x1f5   :  { %s6377_s19 = scalar_lea.vmem %s303_s30, 128  ;;  %p6382_p12 = scmp.lt.s32.totalorder %s303_s30, %s303_s30 }
 0x1f6   :  { %p6378_p11 = scmp.ne.s32.totalorder %s303_s30, %s6377_s19  ;;  %p6383_p13 = scmp.lt.s32.totalorder %s6377_s19, %s6377_s19 }
 0x1f8   :  { %p6384_p0 = por %p6383_p13, %p6382_p12 }
 0x1fa   :  { %p6385_p1 = pnand %p6384_p0, %p6378_p11 }
 0x1fc   :  { %6388 = shalt.err (!%p6385_p1)
}
 0x1fd   :  { %s7828_s29 = sld [smem:[#allocation80_spill]] }
 0x1fe   :  { %305 = dma.hbm_to_vmem [thread:$0]  %s7827_s16, 128, %s303_s30, [#allocation27]  }
 0x203   :  { %s6389_s6 = scalar_lea.hbm %s7828_s29, 512 }
 0x204   :  { %p6390_p2 = scmp.ne.s32.totalorder %s7828_s29, %s6389_s6  ;;  %p6393_p3 = scmp.lt.u32.totalorder %s6389_s6, %s7828_s29 }
 0x206   :  { %p6395_p4 = pnand %p6393_p3, %p6390_p2 }
 0x208   :  { %6398 = shalt.err (!%p6395_p4)
}
 0x209   :  { %s6399_s26 = scalar_lea.vmem %s7058_s9, 512  ;;  %p6404_p6 = scmp.lt.s32.totalorder %s7058_s9, %s7058_s9 }
 0x20a   :  { %p6400_p5 = scmp.ne.s32.totalorder %s7058_s9, %s6399_s26  ;;  %p6405_p7 = scmp.lt.s32.totalorder %s6399_s26, %s6399_s26 }
 0x20c   :  { %p6406_p8 = por %p6405_p7, %p6404_p6 }
 0x20e   :  { %p6407_p9 = pnand %p6406_p8, %p6400_p5 }
 0x210   :  { %6410 = shalt.err (!%p6407_p9)
}
 0x211   :  { %s7829_s5 = sld [smem:[#allocation81_spill]]  ;;  %s6673_s25 = smov [#allocation34]  }
 0x212   :  { %327 = dma.hbm_to_vmem [thread:$0]  %s7828_s29, 512, %s7058_s9, [#allocation30], %s6646_s22, %s6646_s22, %s6647_s23  }
 0x213   :  { %s343_s28 = sshll.u32 %s6673_s25, 4  ;;  %s6674_s1 = smov [#allocation37]   ;;  %s344_s28 = int_to_ptr.vmem [resolvable:$true] %s343_s28 }
 0x214   :  { %s365_s8 = sshll.u32 %s6674_s1, 4  ;;  %s7076_s8 = int_to_ptr.vmem [resolvable:$true] %s365_s8 }
 0x217   :  { %s6411_s2 = scalar_lea.hbm %s7829_s5, 2048 }
 0x218   :  { %p6412_p10 = scmp.ne.s32.totalorder %s7829_s5, %s6411_s2  ;;  %p6415_p11 = scmp.lt.u32.totalorder %s6411_s2, %s7829_s5 }
 0x21a   :  { %p6417_p12 = pnand %p6415_p11, %p6412_p10 }
 0x21c   :  { %6420 = shalt.err (!%p6417_p12)
}
 0x21d   :  { %s6421_s27 = scalar_lea.vmem %s344_s28, 2048  ;;  %p6426_p0 = scmp.lt.s32.totalorder %s344_s28, %s344_s28 }
 0x21e   :  { %p6422_p13 = scmp.ne.s32.totalorder %s344_s28, %s6421_s27  ;;  %p6427_p1 = scmp.lt.s32.totalorder %s6421_s27, %s6421_s27 }
 0x220   :  { %p6428_p2 = por %p6427_p1, %p6426_p0 }
 0x222   :  { %p6429_p3 = pnand %p6428_p2, %p6422_p13 }
 0x224   :  { %6432 = shalt.err (!%p6429_p3)
}
 0x225   :  { %s7830_s22 = sld [smem:[#allocation82_spill]] }
 0x226   :  { %349 = dma.hbm_to_vmem [thread:$0]  %s7829_s5, 2048, %s344_s28, [#allocation33], %s6649_s7, %s6649_s7, %s6650_s21  }
 0x22b   :  { %s6433_s23 = scalar_lea.hbm %s7830_s22, 4096 }
 0x22c   :  { %p6434_p4 = scmp.ne.s32.totalorder %s7830_s22, %s6433_s23  ;;  %p6437_p5 = scmp.lt.u32.totalorder %s6433_s23, %s7830_s22 }
 0x22e   :  { %p6439_p6 = pnand %p6437_p5, %p6434_p4 }
 0x230   :  { %6442 = shalt.err (!%p6439_p6)
}
 0x231   :  { %s6443_s20 = scalar_lea.vmem %s7076_s8, 4096  ;;  %p6448_p8 = scmp.lt.s32.totalorder %s7076_s8, %s7076_s8 }
 0x232   :  { %p6444_p7 = scmp.ne.s32.totalorder %s7076_s8, %s6443_s20  ;;  %p6449_p9 = scmp.lt.s32.totalorder %s6443_s20, %s6443_s20 }
 0x234   :  { %p6450_p10 = por %p6449_p9, %p6448_p8 }
 0x236   :  { %p6451_p11 = pnand %p6450_p10, %p6444_p7 }
 0x238   :  { %6454 = shalt.err (!%p6451_p11)
}
 0x239   :  { %s7831_s10 = sld [smem:[#allocation84_spill]]  ;;  %s6675_s11 = smov [#allocation40]  }
 0x23a   :  { %371 = dma.hbm_to_vmem [thread:$0]  %s7830_s22, 4096, %s7076_s8, [#allocation36], %s6649_s7, %s6649_s7, %s6650_s21  }
 0x23b   :  { %s390_s12 = sshll.u32 %s6675_s11, 4  ;;  %s6676_s0 = smov [#allocation43]   ;;  %s391_s12 = int_to_ptr.vmem [resolvable:$true] %s390_s12 }
 0x23c   :  { %s412_s4 = sshll.u32 %s6676_s0, 4  ;;  %s413_s4 = int_to_ptr.vmem [resolvable:$true] %s412_s4 }
 0x23f   :  { %s6455_s16 = scalar_lea.hbm %s7831_s10, 16 }
 0x240   :  { %p6456_p12 = scmp.ne.s32.totalorder %s7831_s10, %s6455_s16  ;;  %p6459_p13 = scmp.lt.u32.totalorder %s6455_s16, %s7831_s10 }
 0x242   :  { %p6461_p0 = pnand %p6459_p13, %p6456_p12 }
 0x244   :  { %6464 = shalt.err (!%p6461_p0)
}
 0x245   :  { %s6465_s24 = scalar_lea.vmem %s391_s12, 16  ;;  %s6469_s30 = scalar_lea.vmem %s391_s12, 32 }
 0x246   :  { %p6466_p1 = scmp.ne.s32.totalorder %s391_s12, %s6465_s24  ;;  %p6470_p2 = scmp.lt.s32.totalorder %s391_s12, %s391_s12 }
 0x247   :  { %p6471_p3 = scmp.lt.s32.totalorder %s6469_s30, %s6465_s24 }
 0x249   :  { %p6472_p4 = por %p6471_p3, %p6470_p2 }
 0x24b   :  { %p6473_p5 = pnand %p6472_p4, %p6466_p1 }
 0x24d   :  { %6476 = shalt.err (!%p6473_p5)
}
 0x24e   :  { %s7832_s15 = sld [smem:[#allocation85_spill]] }
 0x24f   :  { %393 = dma.hbm_to_vmem [thread:$0]  %s7831_s10, 16, %s391_s12, [#allocation39]  }
 0x254   :  { %s6477_s9 = scalar_lea.hbm %s7832_s15, 16 }
 0x255   :  { %p6478_p6 = scmp.ne.s32.totalorder %s7832_s15, %s6477_s9  ;;  %p6481_p7 = scmp.lt.u32.totalorder %s6477_s9, %s7832_s15 }
 0x257   :  { %p6483_p8 = pnand %p6481_p7, %p6478_p6 }
 0x259   :  { %6486 = shalt.err (!%p6483_p8)
}
 0x25a   :  { %s6487_s18 = scalar_lea.vmem %s413_s4, 16  ;;  %s6491_s19 = scalar_lea.vmem %s413_s4, 32 }
 0x25b   :  { %p6488_p9 = scmp.ne.s32.totalorder %s413_s4, %s6487_s18  ;;  %p6492_p10 = scmp.lt.s32.totalorder %s413_s4, %s413_s4 }
 0x25c   :  { %p6493_p11 = scmp.lt.s32.totalorder %s6491_s19, %s6487_s18 }
 0x25e   :  { %p6494_p12 = por %p6493_p11, %p6492_p10 }
 0x260   :  { %p6495_p13 = pnand %p6494_p12, %p6488_p9 }
 0x262   :  { %6498 = shalt.err (!%p6495_p13)
}
 0x263   :  { %s7833_s29 = sld [smem:[#allocation89_spill]]  ;;  %s6677_s6 = smov [#allocation46]  }
 0x264   :  { %415 = dma.hbm_to_vmem [thread:$0]  %s7832_s15, 16, %s413_s4, [#allocation42]  }
 0x265   :  { %s439_s26 = sshll.u32 %s6677_s6, 4  ;;  %s6678_s5 = smov [#allocation47]   ;;  %s440_s26 = int_to_ptr.vmem [resolvable:$true] %s439_s26 }
 0x266   :  { %s463_s25 = sshll.u32 %s6678_s5, 4  ;;  %s7105_s25 = int_to_ptr.vmem [resolvable:$true] %s463_s25 }
 0x269   :  { %s6499_s28 = scalar_lea.hbm %s7833_s29, 2048 }
 0x26a   :  { %p6500_p0 = scmp.ne.s32.totalorder %s7833_s29, %s6499_s28  ;;  %p6503_p1 = scmp.lt.u32.totalorder %s6499_s28, %s7833_s29 }
 0x26c   :  { %p6505_p2 = pnand %p6503_p1, %p6500_p0 }
 0x26e   :  { %6508 = shalt.err (!%p6505_p2)
}
 0x26f   :  { %s6509_s1 = scalar_lea.vmem %s440_s26, 2048  ;;  %p6514_p4 = scmp.lt.s32.totalorder %s440_s26, %s440_s26 }
 0x270   :  { %p6510_p3 = scmp.ne.s32.totalorder %s440_s26, %s6509_s1  ;;  %p6515_p5 = scmp.lt.s32.totalorder %s6509_s1, %s6509_s1 }
 0x272   :  { %p6516_p6 = por %p6515_p5, %p6514_p4 }
 0x274   :  { %p6517_p7 = pnand %p6516_p6, %p6510_p3 }
 0x276   :  { %6520 = shalt.err (!%p6517_p7)
}
 0x277   :  { %445 = dma.hbm_to_vmem [thread:$0]  %s7833_s29, 2048, %s440_s26, [#allocation45], %s6649_s7, %s6649_s7, %s6650_s21  }
 0x278   :  { %s6521_s8 = scalar_lea.hbm %s6915_s3, 1024 }
 0x279   :  { %p6522_p8 = scmp.ne.s32.totalorder %s6915_s3, %s6521_s8  ;;  %p6525_p9 = scmp.lt.u32.totalorder %s6521_s8, %s6915_s3 }
 0x27b   :  { %p6527_p10 = pnand %p6525_p9, %p6522_p8 }
 0x27d   :  { %6530 = shalt.err (!%p6527_p10)
}
 0x27e   :  { %s6531_s2 = scalar_lea.vmem %s7105_s25, 1024  ;;  %p6536_p12 = scmp.lt.s32.totalorder %s7105_s25, %s7105_s25 }
 0x27f   :  { %p6532_p11 = scmp.ne.s32.totalorder %s7105_s25, %s6531_s2  ;;  %p6537_p13 = scmp.lt.s32.totalorder %s6531_s2, %s6531_s2 }
 0x281   :  { %p6538_p0 = por %p6537_p13, %p6536_p12 }
 0x283   :  { %p6539_p1 = pnand %p6538_p0, %p6532_p11 }
 0x285   :  { %6542 = shalt.err (!%p6539_p1)
}
 0x286   :  { %469 = dma.hbm_to_vmem [thread:$0]  %s6915_s3, 1024, %s7105_s25, [#allocation48], %s6649_s7, %s6649_s7, %s6650_s21  }
 0x287   :  { %6565 = dma.done.wait [#allocation3], 128  }
 0x288   :  { %6566 = vsyncadd [#allocation3], 4294967168 }
 0x289   :  { %6567 = dma.done.wait [#allocation6], 528  }
 0x28a   :  { %6568 = vsyncadd [#allocation6], 4294966768 }
 0x28b   :  { %6569 = dma.done.wait [#allocation9], 2080  }
 0x28c   :  { %6570 = vsyncadd [#allocation9], 4294965216 }
 0x28d   :  { %6571 = dma.done.wait [#allocation12], 4112  }
 0x28e   :  { %6572 = vsyncadd [#allocation12], 4294963184 }
 0x28f   :  { %6573 = dma.done.wait [#allocation15], 1040  }
 0x290   :  { %6574 = vsyncadd [#allocation15], 4294966256 }
 0x291   :  { %6575 = dma.done.wait [#allocation18], 80  }
 0x292   :  { %6576 = vsyncadd [#allocation18], 4294967216 }
 0x293   :  { %6577 = dma.done.wait [#allocation21], 528  }
 0x294   :  { %6578 = vsyncadd [#allocation21], 4294966768 }
 0x295   :  { %6579 = dma.done.wait [#allocation24], 2064  }
 0x296   :  { %6580 = vsyncadd [#allocation24], 4294965232 }
 0x297   :  { %6581 = dma.done.wait [#allocation27], 160  }
 0x298   :  { %6582 = vsyncadd [#allocation27], 4294967136 }
 0x299   :  { %6583 = dma.done.wait [#allocation30], 528  }
 0x29a   :  { %6584 = vsyncadd [#allocation30], 4294966768 }
 0x29b   :  { %6585 = dma.done.wait [#allocation33], 2064  }
 0x29c   :  { %6586 = vsyncadd [#allocation33], 4294965232 }
 0x29d   :  { %6587 = dma.done.wait [#allocation36], 4128  }
 0x29e   :  { %6588 = vsyncadd [#allocation36], 4294963168 }
 0x29f   :  { %6589 = dma.done.wait [#allocation39], 32  }
 0x2a0   :  { %6590 = vsyncadd [#allocation39], 4294967264 }
 0x2a1   :  { %6591 = dma.done.wait [#allocation42], 1040  }
 0x2a2   :  { %6592 = vsyncadd [#allocation42], 4294966256 }
 0x2a3   :  { %6593 = dma.done.wait [#allocation45], 2560  }
 0x2a4   :  { %6594 = vsyncadd [#allocation45], 4294964736 }
 0x2a5   :  { %6595 = dma.done.wait [#allocation48], 1024  }
 0x2a6   :  { %6596 = vsyncadd [#allocation48], 4294966272  ;;  %s7834_s3 = sld [smem:[#allocation67_spill]]  ;;  %v6679_v0 = vmov 1   ;;  %v6680_v1 = vmov 0   ;;  %v6681_v4 = vmov 2   ;;  %v563_v12 = vlaneseq }
 0x2a7   :  { %5718 = vset.pattern.permute.xlu0 %v6679_v0  ;;  %5719 = vset.pattern.permute.xlu1 %v6680_v1  ;;  %v732_v7 = vld [vmem:[#allocation2] sm:$0xff]  ;;  %v6682_v18 = vmov 0.0   ;;  %vm740_vm3 = vcmask 64512   ;;  %s7835_s7 = sld [smem:[#allocation70_spill]]  ;;  %vm921_vm4 = vcmask 523264   ;;  %s7836_s21 = sld [smem:[#allocation74_spill]] }
 0x2a8   :  { %5040 = vmatprep.subr.mxu0 %v732_v7  ;;  %v564_v15 = vand.u32 127, %v563_v12  ;;  %vm6684_vm7 = vmmov 0   ;;  %s7837_s27 = sld [smem:[#allocation68_spill]]  ;;  %s7838_s22 = sld [smem:[#allocation83_spill]]  ;;  %vm4522_vm9 = vcmask 1041408  }
 0x2a9   :  { %5041 = vmatpush3.msra.mxu0 %v732_v7  ;;  %s7839_s23 = sld [smem:[#allocation86_spill]]  ;;  %s7841_s20 = sld [smem:[#allocation92_spill]] }
 0x2aa   :  { %vm632_vm0 = vcmp.eq.s32.totalorder %v564_v15, 1  ;;  %vm582_vm1 = vcmp.eq.s32.totalorder %v564_v15, 0  ;;  %vm682_vm2 = vcmp.eq.s32.totalorder %v564_v15, 2  ;;  %s7842_s10 = sld [smem:[#allocation88_spill]]  ;;  %s7843_s11 = sld [smem:[#allocation91_spill]] }
 0x2ab   :  { %v7153_v19 = vsel %vm632_vm0, 1.0, %v6682_v18  ;;  %v7156_v22 = vsel %vm582_vm1, 1.0, %v6682_v18  ;;  %v7161_v25 = vsel %vm682_vm2, 1.0, %v6682_v18  ;;  %s7844_s12 = sld [smem:[#allocation94_spill]]  ;;  %s7845_s0 = sld [smem:[#allocation90_spill]] }
 0x2ac   :  { %v575_v2 = vld [vmem:[%s7834_s3 + $0x8] sm:$0xff]  ;;  %v574_v3 = vld [vmem:[%s7834_s3] sm:$0xff]  ;;  %v577_v5 = vld [vmem:[%s7834_s3 + $0x18] sm:$0xff]  ;;  %s7846_s4 = sld [smem:[#allocation93_spill]]  ;;  %s7847_s16 = sld [smem:[#allocation95_spill]] }
 0x2ad   :  { %591 = vperm.xlu1 %5719, %v575_v2   ;;  %635 = vperm.xlu0 %5718, %v574_v3   ;;  %v576_v6 = vld [vmem:[%s7834_s3 + $0x10] sm:$0xff]  ;;  %v579_v8 = vld [vmem:[%s7834_s3 + $0x28] sm:$0xff]  ;;  %v581_v9 = vld [vmem:[%s7834_s3 + $0x38] sm:$0xff] }
 0x2ae   :  { %v578_v10 = vld [vmem:[%s7834_s3 + $0x20] sm:$0xff]  ;;  %v580_v11 = vld [vmem:[%s7834_s3 + $0x30] sm:$0xff] }
 0x2b1   :  { %5720 = vset.pattern.permute.xlu1 %v6679_v0  ;;  %5722 = vset.pattern.permute.xlu0 %v6681_v4 }
 0x2b2   :  { %639 = vperm.xlu1 %5720, %v575_v2   ;;  %689 = vperm.xlu0 %5722, %v575_v2  }
 0x2b6   :  { %5721 = vset.pattern.permute.xlu1 %v6681_v4  ;;  %697 = vperm.xlu0 %5722, %v577_v5  }
 0x2b7   :  { %685 = vperm.xlu1 %5721, %v574_v3  }
 0x2ba   :  { %5726 = vset.pattern.permute.xlu0 %v6680_v1 }
 0x2bb   :  { %5723 = vset.pattern.permute.xlu1 %v6680_v1  ;;  %586 = vperm.xlu0 %5726, %v574_v3  }
 0x2bc   :  { %596 = vperm.xlu1 %5723, %v576_v6  }
 0x2bf   :  { %601 = vperm.xlu0 %5726, %v577_v5  }
 0x2c0   :  { %5724 = vset.pattern.permute.xlu1 %v6679_v0 }
 0x2c1   :  { %643 = vperm.xlu1 %5724, %v576_v6  }
 0x2c3   :  { %611 = vperm.xlu0 %5726, %v579_v8  }
 0x2c5   :  { %647 = vperm.xlu1 %5724, %v577_v5  }
 0x2c7   :  { %621 = vperm.xlu0 %5726, %v581_v9  }
 0x2c9   :  { %5725 = vset.pattern.permute.xlu1 %v6681_v4 }
 0x2ca   :  { %693 = vperm.xlu1 %5725, %v576_v6  }
 0x2cb   :  { %5732 = vset.pattern.permute.xlu0 %v6681_v4 }
 0x2cc   :  { %705 = vperm.xlu0 %5732, %v579_v8  }
 0x2ce   :  { %5727 = vset.pattern.permute.xlu1 %v6680_v1 }
 0x2cf   :  { %606 = vperm.xlu1 %5727, %v578_v10  }
 0x2d0   :  { %713 = vperm.xlu0 %5732, %v581_v9  }
 0x2d3   :  { %5728 = vset.pattern.permute.xlu1 %v6679_v0 }
 0x2d4   :  { %651 = vperm.xlu1 %5728, %v578_v10  }
 0x2d8   :  { %655 = vperm.xlu1 %5728, %v579_v8  }
 0x2dc   :  { %5729 = vset.pattern.permute.xlu1 %v6681_v4 }
 0x2dd   :  { %701 = vperm.xlu1 %5729, %v578_v10  }
 0x2e1   :  { %5730 = vset.pattern.permute.xlu1 %v6680_v1 }
 0x2e2   :  { %616 = vperm.xlu1 %5730, %v580_v11  }
 0x2e6   :  { %5731 = vset.pattern.permute.xlu1 %v6679_v0 }
 0x2e7   :  { %659 = vperm.xlu1 %5731, %v580_v11  }
 0x2eb   :  { %663 = vperm.xlu1 %5731, %v581_v9  }
 0x2ef   :  { %5733 = vset.pattern.permute.xlu1 %v6681_v4 }
 0x2f0   :  { %709 = vperm.xlu1 %5733, %v580_v11  }
 0x2f4   :  { %5734 = vset.pattern.permute.xlu1 %v6680_v1 }
 0x32c   :  { %v592_v13 = vpop.permute.xlu1 %591  ;;  %v636_v14 = vpop.permute.xlu0 %635 }
 0x32d   :  { %v666_v24 = vmul.f32 %v636_v14, %v7153_v19  ;;  %v625_v26 = vmul.f32 %v592_v13, %v7156_v22 }
 0x331   :  { %v640_v16 = vpop.permute.xlu1 %639  ;;  %v690_v17 = vpop.permute.xlu0 %689 }
 0x332   :  { %v667_v23 = vmul.f32 %v640_v16, %v7153_v19  ;;  %v717_v31 = vmul.f32 %v690_v17, %v7161_v25 }
 0x334   :  { %v675_v30 = vadd.f32 %v667_v23, %v625_v26  ;;  %v5767_v26 = vld [vmem:[#allocation5] sm:$0xff]  }
 0x335   :  { %v698_v20 = vpop.permute.xlu0 %697  ;;  %5054 = vmatprep.subr.bf16.mxu1 %v5767_v26 }
 0x336   :  { %v686_v21 = vpop.permute.xlu1 %685  ;;  %v7169_v35 = vadd.f32 %v717_v31, %v675_v30  ;;  %v719_v43 = vmul.f32 %v698_v20, %v7161_v25  ;;  %5055 = vmatpush3.bf16.msra.mxu1 %v5767_v26  ;;  %v5771_v30 = vld [vmem:[#allocation8] ss:$8 sps:$4 sm:$0xff]   ;;  %v5773_v31 = vld [vmem:[#allocation8 + $0x4] ss:$8 sps:$4 sm:$0xff]   ;;  %v5792_v26 = vld [vmem:[#allocation8 + $0x70] ss:$8 sps:$4 sm:$0xff]  }
 0x337   :  { %v716_v32 = vmul.f32 %v686_v21, %v7161_v25  ;;  %1119 = vmatprep.subr.bf16.mxu0 %v5773_v31 }
 0x33a   :  { %v587_v27 = vpop.permute.xlu0 %586 }
 0x33b   :  { %v624_v28 = vmul.f32 %v587_v27, %v7156_v22  ;;  %v597_v29 = vpop.permute.xlu1 %596  ;;  %v5768_v27 = vld [vmem:[#allocation5 + $0x8] sm:$0xff]  }
 0x33c   :  { %v626_v42 = vmul.f32 %v597_v29, %v7156_v22  ;;  %5056 = vmatprep.subr.bf16.mxu1 %v5768_v27  ;;  %v5770_v29 = vld [vmem:[#allocation5 + $0x18] sm:$0xff]  }
 0x33d   :  { %v674_v33 = vadd.f32 %v666_v24, %v624_v28  ;;  %5057 = vmatpush3.bf16.msra.mxu1 %v5768_v27  ;;  %v5769_v28 = vld [vmem:[#allocation5 + $0x10] sm:$0xff]   ;;  %v4634_v27 = vld [vmem:[#allocation7] ss:$0 sm:$0xff] }
 0x33e   :  { %v602_v37 = vpop.permute.xlu0 %601  ;;  %5058 = vmatprep.subr.bf16.mxu1 %v5769_v28 }
 0x33f   :  { %v7167_v34 = vadd.f32 %v716_v32, %v674_v33  ;;  %v627_v40 = vmul.f32 %v602_v37, %v7156_v22  ;;  %v5776_v32 = vld [vmem:[#allocation8 + $0x14] ss:$8 sps:$4 sm:$0xff]   ;;  %v5774_v33 = vld [vmem:[#allocation8 + $0x10] ss:$8 sps:$4 sm:$0xff]   ;;  %v5777_v37 = vld [vmem:[#allocation8 + $0x20] ss:$8 sps:$4 sm:$0xff]  }
 0x340   :  { %v644_v36 = vpop.permute.xlu1 %643 }
 0x341   :  { %5042 = vmatprep.mubr.msk.f32.mxu0 %vm740_vm3, %v7167_v34  ;;  %v668_v41 = vmul.f32 %v644_v36, %v7153_v19  ;;  %5059 = vmatpush3.bf16.msra.mxu1 %v5769_v28  ;;  %v5779_v36 = vld [vmem:[#allocation8 + $0x24] ss:$8 sps:$4 sm:$0xff]  }
 0x342   :  { %5043 = vmatmul.mubr.msk.f32.vlgmr.msra.gmra.mrb[0].mxu0 %vm740_vm3, %v7169_v35  ;;  %v612_v50 = vpop.permute.xlu0 %611  ;;  %5060 = vmatprep.subr.bf16.mxu1 %v5770_v29 }
 0x343   :  { %v676_v46 = vadd.f32 %v668_v41, %v626_v42  ;;  %v629_v55 = vmul.f32 %v612_v50, %v7156_v22  ;;  %1120 = vmatpush1.bf16.msra.mxu0 %v5771_v30  ;;  %v5783_v41 = vld [vmem:[#allocation8 + $0x40] ss:$8 sps:$4 sm:$0xff]   ;;  %v5788_v42 = vld [vmem:[#allocation8 + $0x54] ss:$8 sps:$4 sm:$0xff]  }
 0x344   :  { %v648_v38 = vpop.permute.xlu1 %647  ;;  %1121 = vmatprep.subr.bf16.mxu0 %v5776_v32 }
 0x345   :  { %v669_v39 = vmul.f32 %v648_v38, %v7153_v19  ;;  %5061 = vmatpush3.bf16.msra.mxu1 %v5770_v29  ;;  %v5782_v38 = vld [vmem:[#allocation8 + $0x34] ss:$8 sps:$4 sm:$0xff]  }
 0x346   :  { %v622_v53 = vpop.permute.xlu0 %621 }
 0x347   :  { %v677_v44 = vadd.f32 %v669_v39, %v627_v40  ;;  %v631_v13 = vmul.f32 %v622_v53, %v7156_v22  ;;  %1122 = vmatpush1.bf16.msra.mxu0 %v5774_v33  ;;  %v5780_v39 = vld [vmem:[#allocation8 + $0x30] ss:$8 sps:$4 sm:$0xff]   ;;  %v5785_v40 = vld [vmem:[#allocation8 + $0x44] ss:$8 sps:$4 sm:$0xff]  }
 0x348   :  { %1123 = vmatprep.subr.bf16.mxu0 %v5779_v36 }
 0x349   :  { %v694_v45 = vpop.permute.xlu1 %693  ;;  %v7183_v49 = vadd.f32 %v719_v43, %v677_v44  ;;  %v5786_v43 = vld [vmem:[#allocation8 + $0x50] ss:$8 sps:$4 sm:$0xff]   ;;  %v4625_v44 = vld [vmem:[%s7835_s7] ss:$0 sm:$0xff] }
 0x34a   :  { %v718_v47 = vmul.f32 %v694_v45, %v7161_v25 }
 0x34b   :  { %v706_v58 = vpop.permute.xlu0 %705  ;;  %1124 = vmatpush1.bf16.msra.mxu0 %v5777_v37 }
 0x34c   :  { %v7181_v48 = vadd.f32 %v718_v47, %v676_v46  ;;  %v721_v61 = vmul.f32 %v706_v58, %v7161_v25  ;;  %1125 = vmatprep.subr.bf16.mxu0 %v5782_v38 }
 0x34e   :  { %v607_v51 = vpop.permute.xlu1 %606  ;;  %5045 = vmatprep.mubr.msk.f32.mxu0 %vm740_vm3, %v7181_v48 }
 0x34f   :  { %5046 = vmatmul.mubr.msk.f32.gmra.mrb[2].mxu0 %vm740_vm3, %v7183_v49  ;;  %v628_v59 = vmul.f32 %v607_v51, %v7156_v22  ;;  %v714_v11 = vpop.permute.xlu0 %713 }
 0x350   :  { %v723_v16 = vmul.f32 %v714_v11, %v7161_v25  ;;  %1126 = vmatpush1.bf16.msra.mxu0 %v5780_v39 }
 0x351   :  { %1127 = vmatprep.subr.bf16.mxu0 %v5785_v40 }
 0x353   :  { %v652_v52 = vpop.permute.xlu1 %651 }
 0x354   :  { %v670_v57 = vmul.f32 %v652_v52, %v7153_v19  ;;  %1128 = vmatpush1.bf16.msra.mxu0 %v5783_v41 }
 0x355   :  { %1129 = vmatprep.subr.bf16.mxu0 %v5788_v42 }
 0x356   :  { %v678_v63 = vadd.f32 %v670_v57, %v628_v59 }
 0x357   :  { %v656_v54 = vpop.permute.xlu1 %655 }
 0x358   :  { %v671_v56 = vmul.f32 %v656_v54, %v7153_v19  ;;  %1130 = vmatpush1.bf16.msra.mxu0 %v5786_v43 }
 0x35a   :  { %v679_v60 = vadd.f32 %v671_v56, %v629_v55 }
 0x35c   :  { %v702_v62 = vpop.permute.xlu1 %701  ;;  %v7197_v5 = vadd.f32 %v721_v61, %v679_v60 }
 0x35d   :  { %v720_v2 = vmul.f32 %v702_v62, %v7161_v25 }
 0x35f   :  { %v7195_v3 = vadd.f32 %v720_v2, %v678_v63 }
 0x361   :  { %v617_v6 = vpop.permute.xlu1 %616  ;;  %5048 = vmatprep.mubr.msk.f32.mxu0 %vm740_vm3, %v7195_v3 }
 0x362   :  { %5049 = vmatmul.mubr.msk.f32.gmra.mrb[4].mxu0 %vm740_vm3, %v7197_v5  ;;  %v630_v14 = vmul.f32 %v617_v6, %v7156_v22 }
 0x366   :  { %v660_v7 = vpop.permute.xlu1 %659 }
 0x367   :  { %v672_v10 = vmul.f32 %v660_v7, %v7153_v19 }
 0x369   :  { %v680_v20 = vadd.f32 %v672_v10, %v630_v14 }
 0x36a   :  { %v664_v8 = vpop.permute.xlu1 %663 }
 0x36b   :  { %v673_v9 = vmul.f32 %v664_v8, %v7153_v19 }
 0x36d   :  { %v681_v15 = vadd.f32 %v673_v9, %v631_v13 }
 0x36f   :  { %v710_v17 = vpop.permute.xlu1 %709  ;;  %v7211_v24 = vadd.f32 %v723_v16, %v681_v15 }
 0x370   :  { %v722_v21 = vmul.f32 %v710_v17, %v7161_v25  ;;  %v5791_v17 = vld [vmem:[#allocation8 + $0x64] ss:$8 sps:$4 sm:$0xff]  }
 0x371   :  { %1131 = vmatprep.subr.bf16.mxu0 %v5791_v17  ;;  %v1260_v17 = vld [vmem:[#allocation11 + $0x20] sm:$0xff] }
 0x372   :  { %v7209_v23 = vadd.f32 %v722_v21, %v680_v20  ;;  %v5789_v20 = vld [vmem:[#allocation8 + $0x60] ss:$8 sps:$4 sm:$0xff]   ;;  %v5794_v21 = vld [vmem:[#allocation8 + $0x74] ss:$8 sps:$4 sm:$0xff]  }
 0x373   :  { %1132 = vmatpush1.bf16.msra.mxu0 %v5789_v20  ;;  %v1261_v20 = vld [vmem:[#allocation11 + $0x28] sm:$0xff] }
 0x374   :  { %5051 = vmatprep.mubr.msk.f32.mxu0 %vm740_vm3, %v7209_v23  ;;  %1133 = vmatprep.subr.bf16.mxu0 %v5794_v21  ;;  %v5325_v21 = vpack.c.bf16 %v1261_v20, %v1260_v17 }
 0x375   :  { %5052 = vmatmul.mubr.msk.f32.gmra.mrb[6].mxu0 %vm740_vm3, %v7211_v24 }
 0x376   :  { %1151 = vmatprep.mubr.bf16.mxu0 %v6680_v1 }
 0x377   :  { %1134 = vmatpush1.bf16.msra.mxu0 %v5792_v26  ;;  %v1278_v26 = vld [vmem:[#allocation11 + $0xb0] sm:$0xff] }
 0x415   :  { %v5044_v45 = vpop.f32.mrb[0].mxu0 }
 0x416   :  { %v837_v46 = vadd.f32 %v5044_v45, %v4625_v44  ;;  %v831_v47 = vpop.f32.mrb[1].mxu0 }
 0x417   :  { %v832_v50 = vadd.f32 %v4625_v44, %v831_v47 }
 0x418   :  { %v871_v51 = vmax.f32 %v837_v46, 0.0 }
 0x419   :  { %v870_v52 = vmax.f32 %v832_v50, 0.0 }
 0x41b   :  { %v878_v53 = vpack.c.bf16 %v871_v51, %v870_v52 }
 0x41d   :  { %5062 = vmatprep.mubr.msk.bf16.mxu1 %vm921_vm4, %v878_v53 }
 0x422   :  { %v5047_v54 = vpop.f32.mrb[2].mxu0 }
 0x423   :  { %v847_v55 = vadd.f32 %v5047_v54, %v4625_v44  ;;  %v841_v56 = vpop.f32.mrb[3].mxu0 }
 0x424   :  { %v842_v57 = vadd.f32 %v4625_v44, %v841_v56 }
 0x425   :  { %v873_v58 = vmax.f32 %v847_v55, 0.0 }
 0x426   :  { %v872_v59 = vmax.f32 %v842_v57, 0.0 }
 0x428   :  { %v879_v60 = vpack.c.bf16 %v873_v58, %v872_v59 }
 0x42a   :  { %5063 = vmatmul.mubr.msk.bf16.vlgmr.msra.gmra.mrb[0].mxu1 %vm921_vm4, %v879_v60  ;;  %v1272_v60 = vld [vmem:[#allocation11 + $0x80] sm:$0xff] }
 0x435   :  { %v5050_v61 = vpop.f32.mrb[4].mxu0 }
 0x436   :  { %v857_v62 = vadd.f32 %v5050_v61, %v4625_v44  ;;  %v851_v63 = vpop.f32.mrb[5].mxu0  ;;  %v1273_v61 = vld [vmem:[#allocation11 + $0x88] sm:$0xff] }
 0x437   :  { %v852_v2 = vadd.f32 %v4625_v44, %v851_v63  ;;  %v1256_v63 = vld [vmem:[#allocation11] sm:$0xff] }
 0x438   :  { %v875_v6 = vmax.f32 %v857_v62, 0.0  ;;  %v5315_v62 = vpack.c.bf16 %v1273_v61, %v1272_v60  ;;  %v6683_v60 = vmov 0.0|0.0   ;;  %v7229_v61 = vshrl.u32 %v563_v12, 7 }
 0x439   :  { %v874_v7 = vmax.f32 %v852_v2, 0.0  ;;  %v1257_v2 = vld [vmem:[#allocation11 + $0x8] sm:$0xff]  ;;  %5371 = vmatprep.subr.bf16.mxu1 %v6683_v60 }
 0x43a   :  { %5316 = vmatprep.subr.bf16.mxu0 %v5315_v62  ;;  %v7232_v62 = vsub.s32 0, %v7229_v61  ;;  %vm1226_vm5 = vcmp.eq.s32.totalorder %v7229_v61, 0  ;;  %vm1250_vm6 = vcmp.eq.s32.totalorder %v7229_v61, 1  ;;  %vm1617_vm8 = vcmp.eq.s32.totalorder %v7229_v61, 2 }
 0x43b   :  { %v880_v8 = vpack.c.bf16 %v875_v6, %v874_v7  ;;  %v5317_v6 = vpack.c.bf16 %v1257_v2, %v1256_v63  ;;  %v1274_v7 = vld [vmem:[#allocation11 + $0x90] sm:$0xff]  ;;  %v1027_v63 = vld [vmem:[#allocation10] sm:$0x3] }
 0x43d   :  { %5066 = vmatprep.mubr.msk.bf16.mxu1 %vm921_vm4, %v880_v8  ;;  %v1275_v8 = vld [vmem:[#allocation11 + $0x98] sm:$0xff] }
 0x448   :  { %v5053_v9 = vpop.f32.mrb[6].mxu0 }
 0x449   :  { %v867_v10 = vadd.f32 %v5053_v9, %v4625_v44  ;;  %v861_v11 = vpop.f32.mrb[7].mxu0  ;;  %v5319_v9 = vpack.c.bf16 %v1275_v8, %v1274_v7 }
 0x44a   :  { %v862_v13 = vadd.f32 %v4625_v44, %v861_v11  ;;  %v1259_v11 = vld [vmem:[#allocation11 + $0x18] sm:$0xff] }
 0x44b   :  { %v877_v14 = vmax.f32 %v867_v10, 0.0  ;;  %v1258_v10 = vld [vmem:[#allocation11 + $0x10] sm:$0xff] }
 0x44c   :  { %v876_v15 = vmax.f32 %v862_v13, 0.0  ;;  %v5321_v13 = vpack.c.bf16 %v1259_v11, %v1258_v10 }
 0x44e   :  { %v881_v16 = vpack.c.bf16 %v877_v14, %v876_v15  ;;  %v1276_v14 = vld [vmem:[#allocation11 + $0xa0] sm:$0xff]  ;;  %v1277_v15 = vld [vmem:[#allocation11 + $0xa8] sm:$0xff] }
 0x450   :  { %5067 = vmatmul.mubr.msk.bf16.gmra.mrb[4].mxu1 %vm921_vm4, %v881_v16  ;;  %v5323_v16 = vpack.c.bf16 %v1277_v15, %v1276_v14 }
 0x451   :  { %5121 = vmatprep.mubr.msk.f32.mxu1 %vm6684_vm7, %v6682_v18 }
 0x4fd   :  { %v5064_v28 = vpop.f32.mrb[0].mxu1 }
 0x4fe   :  { %v977_v29 = vadd.f32 %v5064_v28, %v4634_v27  ;;  %v968_v30 = vpop.f32.mrb[1].mxu1 }
 0x4ff   :  { %v969_v31 = vadd.f32 %v4634_v27, %v968_v30  ;;  %v5065_v32 = vpop.f32.mrb[2].mxu1  ;;  %v1263_v30 = vld [vmem:[#allocation11 + $0x38] sm:$0xff] }
 0x500   :  { %v980_v33 = vadd.f32 %v5065_v32, %v4634_v27  ;;  %v971_v36 = vpop.f32.mrb[3].mxu1  ;;  %v1001_v38 = vmax.f32 %v977_v29, 0.0  ;;  %v1262_v29 = vld [vmem:[#allocation11 + $0x30] sm:$0xff]  ;;  %v1280_v32 = vld [vmem:[#allocation11 + $0xc0] sm:$0xff] }
 0x501   :  { %v972_v37 = vadd.f32 %v4634_v27, %v971_v36  ;;  %v999_v40 = vmax.f32 %v969_v31, 0.0  ;;  %v5329_v31 = vpack.c.bf16 %v1263_v30, %v1262_v29 }
 0x502   :  { %v1002_v39 = vmax.f32 %v980_v33, 0.0  ;;  %v1281_v33 = vld [vmem:[#allocation11 + $0xc8] sm:$0xff] }
 0x503   :  { %v1000_v41 = vmax.f32 %v972_v37, 0.0  ;;  %v5331_v36 = vpack.c.bf16 %v1281_v33, %v1280_v32  ;;  %v1264_v37 = vld [vmem:[#allocation11 + $0x40] sm:$0xff] }
 0x504   :  { %v1008_v42 = vpack.c.bf16 %v1002_v39, %v1001_v38  ;;  %v1265_v38 = vld [vmem:[#allocation11 + $0x48] sm:$0xff] }
 0x505   :  { %v1007_v43 = vpack.c.bf16 %v1000_v41, %v999_v40  ;;  %v5333_v39 = vpack.c.bf16 %v1265_v38, %v1264_v37  ;;  %v1282_v40 = vld [vmem:[#allocation11 + $0xd0] sm:$0xff]  ;;  %v1283_v41 = vld [vmem:[#allocation11 + $0xd8] sm:$0xff] }
 0x507   :  { %1152 = vmatmul.mubr.bf16.vlgmr.msra.gmra.mrb[8].mxu0 %v1007_v43  ;;  %v1266_v43 = vld [vmem:[#allocation11 + $0x50] sm:$0xff] }
 0x508   :  { %1161 = vmatprep.mubr.bf16.mxu0 %v6680_v1  ;;  %5318 = vmatpush3.bf16.msra.mxu0 %v5317_v6  ;;  %v7235_v6 = vsub.s32 1, %v7229_v61 }
 0x509   :  { %5320 = vmatprep.subr.bf16.mxu0 %v5319_v9  ;;  %v1032_v9 = vrot.slane %v1027_v63, %v7232_v62 }
 0x50a   :  { %v1036_v11 = vrot.slane %v1027_v63, %v7235_v6 }
 0x50c   :  { %5322 = vmatpush3.bf16.msra.mxu0 %v5321_v13 }
 0x50d   :  { %5324 = vmatprep.subr.bf16.mxu0 %v5323_v16 }
 0x50f   :  { %1162 = vmatmul.mubr.bf16.gmra.mrb[12].mxu0 %v1008_v42  ;;  %v5335_v42 = vpack.c.bf16 %v1283_v41, %v1282_v40 }
 0x510   :  { %1171 = vmatprep.mubr.bf16.mxu0 %v6680_v1  ;;  %5326 = vmatpush3.bf16.msra.mxu0 %v5325_v21 }
 0x523   :  { %v5068_v44 = vpop.f32.mrb[4].mxu1 }
 0x524   :  { %v993_v45 = vadd.f32 %v5068_v44, %v4634_v27  ;;  %v984_v46 = vpop.f32.mrb[5].mxu1  ;;  %v1267_v44 = vld [vmem:[#allocation11 + $0x58] sm:$0xff] }
 0x525   :  { %v985_v47 = vadd.f32 %v4634_v27, %v984_v46  ;;  %v5069_v50 = vpop.f32.mrb[6].mxu1  ;;  %v1284_v46 = vld [vmem:[#allocation11 + $0xe0] sm:$0xff] }
 0x526   :  { %v996_v51 = vadd.f32 %v5069_v50, %v4634_v27  ;;  %v987_v52 = vpop.f32.mrb[7].mxu1  ;;  %v1005_v54 = vmax.f32 %v993_v45, 0.0  ;;  %v5337_v45 = vpack.c.bf16 %v1267_v44, %v1266_v43 }
 0x527   :  { %v988_v53 = vadd.f32 %v4634_v27, %v987_v52  ;;  %v1003_v56 = vmax.f32 %v985_v47, 0.0  ;;  %v1279_v27 = vld [vmem:[#allocation11 + $0xb8] sm:$0xff]  ;;  %v1285_v47 = vld [vmem:[#allocation11 + $0xe8] sm:$0xff] }
 0x528   :  { %v1006_v55 = vmax.f32 %v996_v51, 0.0  ;;  %v5327_v28 = vpack.c.bf16 %v1279_v27, %v1278_v26  ;;  %v5339_v50 = vpack.c.bf16 %v1285_v47, %v1284_v46  ;;  %v1268_v51 = vld [vmem:[#allocation11 + $0x60] sm:$0xff]  ;;  %v1269_v52 = vld [vmem:[#allocation11 + $0x68] sm:$0xff] }
 0x529   :  { %v1004_v57 = vmax.f32 %v988_v53, 0.0  ;;  %v5341_v53 = vpack.c.bf16 %v1269_v52, %v1268_v51 }
 0x52a   :  { %v1010_v58 = vpack.c.bf16 %v1006_v55, %v1005_v54  ;;  %5328 = vmatprep.subr.bf16.mxu0 %v5327_v28  ;;  %v1286_v54 = vld [vmem:[#allocation11 + $0xf0] sm:$0xff]  ;;  %v1287_v55 = vld [vmem:[#allocation11 + $0xf8] sm:$0xff] }
 0x52b   :  { %v1009_v59 = vpack.c.bf16 %v1004_v57, %v1003_v56  ;;  %5330 = vmatpush3.bf16.msra.mxu0 %v5329_v31  ;;  %v5343_v56 = vpack.c.bf16 %v1287_v55, %v1286_v54  ;;  %v1270_v57 = vld [vmem:[#allocation11 + $0x70] sm:$0xff] }
 0x52c   :  { %5332 = vmatprep.subr.bf16.mxu0 %v5331_v36 }
 0x52d   :  { %1172 = vmatmul.mubr.bf16.gmra.mrb[16].mxu0 %v1009_v59 }
 0x52e   :  { %1181 = vmatprep.mubr.bf16.mxu0 %v6680_v1 }
 0x52f   :  { %5334 = vmatpush3.bf16.msra.mxu0 %v5333_v39 }
 0x530   :  { %5336 = vmatprep.subr.bf16.mxu0 %v5335_v42 }
 0x533   :  { %5338 = vmatpush3.bf16.msra.mxu0 %v5337_v45 }
 0x534   :  { %5340 = vmatprep.subr.bf16.mxu0 %v5339_v50 }
 0x535   :  { %1182 = vmatmul.mubr.bf16.gmra.mrb[20].mxu0 %v1010_v58  ;;  %v1271_v58 = vld [vmem:[#allocation11 + $0x78] sm:$0xff] }
 0x536   :  { %v5345_v59 = vpack.c.bf16 %v1271_v58, %v1270_v57 }
 0x537   :  { %5342 = vmatpush3.bf16.msra.mxu0 %v5341_v53 }
 0x538   :  { %5344 = vmatprep.subr.bf16.mxu0 %v5343_v56 }
 0x53b   :  { %5346 = vmatpush3.bf16.msra.mxu0 %v5345_v59 }
 0x53c   :  { %5347 = vmatprep.subr.bf16.mxu0 %v6683_v60 }
 0x5da   :  { %v1153_v2 = vpop.f32.mrb[8].mxu0 }
 0x5db   :  { %v1155_v7 = vpop.f32.mrb[9].mxu0  ;;  %v1154_v13 = vadd.f32 %v1153_v2, %v1032_v9 }
 0x5dc   :  { %v1157_v8 = vpop.f32.mrb[10].mxu0  ;;  %v1156_v14 = vadd.f32 %v1155_v7, %v1036_v11 }
 0x5dd   :  { %v1159_v10 = vpop.f32.mrb[11].mxu0  ;;  %v1158_v12 = vadd.f32 %v1157_v8, %v1032_v9  ;;  %v1192_v27 = vmax.f32 %v1154_v13, 0.0 }
 0x5de   :  { %v1160_v20 = vadd.f32 %v1159_v10, %v1036_v11  ;;  %v1193_v31 = vmax.f32 %v1156_v14, 0.0 }
 0x5df   :  { %v1194_v36 = vmax.f32 %v1158_v12, 0.0 }
 0x5e0   :  { %v1195_v39 = vmax.f32 %v1160_v20, 0.0 }
 0x5e2   :  { %v1163_v15 = vpop.f32.mrb[12].mxu0 }
 0x5e3   :  { %v1164_v16 = vadd.f32 %v1163_v15, %v1032_v9  ;;  %v1165_v17 = vpop.f32.mrb[13].mxu0 }
 0x5e4   :  { %v1166_v21 = vadd.f32 %v1165_v17, %v1036_v11  ;;  %v1167_v26 = vpop.f32.mrb[14].mxu0 }
 0x5e5   :  { %v1196_v28 = vmax.f32 %v1164_v16, 0.0  ;;  %v1168_v29 = vadd.f32 %v1167_v26, %v1032_v9  ;;  %v1169_v30 = vpop.f32.mrb[15].mxu0 }
 0x5e6   :  { %v1197_v32 = vmax.f32 %v1166_v21, 0.0  ;;  %v1170_v33 = vadd.f32 %v1169_v30, %v1036_v11 }
 0x5e7   :  { %v1208_v37 = vmax.f32 %v1192_v27, %v1196_v28  ;;  %v1198_v38 = vmax.f32 %v1168_v29, 0.0 }
 0x5e8   :  { %v1217_v40 = vmax.f32 %v1193_v31, %v1197_v32  ;;  %v1199_v41 = vmax.f32 %v1170_v33, 0.0 }
 0x5e9   :  { %v1209_v42 = vmax.f32 %v1194_v36, %v1198_v38 }
 0x5ea   :  { %v1218_v43 = vmax.f32 %v1195_v39, %v1199_v41 }
 0x5eb   :  { %v1210_v44 = vmax.f32 %v1208_v37, %v1209_v42 }
 0x5ec   :  { %v1219_v45 = vmax.f32 %v1217_v40, %v1218_v43 }
 0x5ed   :  { %v1211_v52 = vrot.slane %v1210_v44, 4 }
 0x5ee   :  { %v1220_v54 = vrot.slane %v1219_v45, 4 }
 0x5ef   :  { %v1212_v8 = vmax.f32 %v1210_v44, %v1211_v52 }
 0x5f0   :  { %v1221_v12 = vmax.f32 %v1219_v45, %v1220_v54  ;;  %v7245_v54 = vsel %vm1250_vm6, 1.0, %v6682_v18 }
 0x5f1   :  { %v1213_v31 = vrot.slane %v1212_v8, 2 }
 0x5f2   :  { %v1222_v33 = vrot.slane %v1221_v12, 2 }
 0x5f3   :  { %v1214_v39 = vmax.f32 %v1212_v8, %v1213_v31  ;;  %v1375_v31 = vld [vmem:[%s7836_s21 + $0x48] sm:$0xff] }
 0x5f5   :  { %v1215_v44 = vrot.slane %v1214_v39, 1 }
 0x600   :  { %v1173_v46 = vpop.f32.mrb[16].mxu0 }
 0x601   :  { %v1175_v47 = vpop.f32.mrb[17].mxu0  ;;  %v1174_v53 = vadd.f32 %v1173_v46, %v1032_v9 }
 0x602   :  { %v1177_v50 = vpop.f32.mrb[18].mxu0  ;;  %v1176_v55 = vadd.f32 %v1175_v47, %v1036_v11 }
 0x603   :  { %v1179_v51 = vpop.f32.mrb[19].mxu0  ;;  %v1178_v57 = vadd.f32 %v1177_v50, %v1032_v9  ;;  %v1200_v10 = vmax.f32 %v1174_v53, 0.0  ;;  %v7242_v53 = vsel %vm1226_vm5, 1.0, %v6682_v18 }
 0x604   :  { %v1180_v63 = vadd.f32 %v1179_v51, %v1036_v11  ;;  %v1201_v16 = vmax.f32 %v1176_v55, 0.0  ;;  %v1216_v51 = vmax.f32 %v1214_v39, %v1215_v44  ;;  %v1379_v39 = vld [vmem:[%s7836_s21 + $0x68] sm:$0xff]  ;;  %v1461_v44 = vld [vmem:[#allocation16 + $0x8] sm:$0xff] }
 0x605   :  { %v1202_v21 = vmax.f32 %v1178_v57, 0.0 }
 0x606   :  { %v1203_v28 = vmax.f32 %v1180_v63, 0.0 }
 0x608   :  { %v1183_v56 = vpop.f32.mrb[20].mxu0 }
 0x609   :  { %v1184_v58 = vadd.f32 %v1183_v56, %v1032_v9  ;;  %v1185_v59 = vpop.f32.mrb[21].mxu0 }
 0x60a   :  { %v1186_v2 = vadd.f32 %v1185_v59, %v1036_v11  ;;  %v1187_v7 = vpop.f32.mrb[22].mxu0  ;;  %v1228_v59 = vmul.f32 %v7242_v53, %v1216_v51  ;;  %v1465_v51 = vld [vmem:[#allocation16 + $0x28] sm:$0xff] }
 0x60b   :  { %v1204_v13 = vmax.f32 %v1184_v58, 0.0  ;;  %v1188_v14 = vadd.f32 %v1187_v7, %v1032_v9  ;;  %v1189_v15 = vpop.f32.mrb[23].mxu0  ;;  %v1223_v9 = vmax.f32 %v1221_v12, %v1222_v33  ;;  %v1367_v7 = vld [vmem:[%s7836_s21 + $0x8] sm:$0xff]  ;;  %v1368_v12 = vld [vmem:[%s7836_s21 + $0x10] sm:$0xff] }
 0x60c   :  { %v1205_v17 = vmax.f32 %v1186_v2, 0.0  ;;  %v1190_v20 = vadd.f32 %v1189_v15, %v1036_v11  ;;  %v1366_v2 = vld [vmem:[%s7836_s21] sm:$0xff]  ;;  %v1376_v33 = vld [vmem:[%s7836_s21 + $0x50] sm:$0xff] }
 0x60d   :  { %v1232_v26 = vmax.f32 %v1200_v10, %v1204_v13  ;;  %v1206_v27 = vmax.f32 %v1188_v14, 0.0  ;;  %v1224_v46 = vrot.slane %v1223_v9, 1  ;;  %v5348_v15 = vpack.c.bf16 %v1367_v7, %v1366_v2  ;;  %v1466_v2 = vld [vmem:[#allocation16 + $0x30] sm:$0xff]  ;;  %v1467_v7 = vld [vmem:[#allocation16 + $0x38] sm:$0xff] }
 0x60e   :  { %v1241_v29 = vmax.f32 %v1201_v16, %v1205_v17  ;;  %v1207_v30 = vmax.f32 %v1190_v20, 0.0  ;;  %v1369_v16 = vld [vmem:[%s7836_s21 + $0x18] sm:$0xff]  ;;  %v1370_v20 = vld [vmem:[%s7836_s21 + $0x20] sm:$0xff] }
 0x60f   :  { %v1233_v32 = vmax.f32 %v1202_v21, %v1206_v27  ;;  %v1225_v55 = vmax.f32 %v1223_v9, %v1224_v46  ;;  %v5351_v17 = vpack.c.bf16 %v1369_v16, %v1368_v12  ;;  %v1371_v21 = vld [vmem:[%s7836_s21 + $0x28] sm:$0xff]  ;;  %v1372_v27 = vld [vmem:[%s7836_s21 + $0x30] sm:$0xff]  ;;  %v6685_v16 = vmov 3  }
 0x610   :  { %v1242_v36 = vmax.f32 %v1203_v28, %v1207_v30  ;;  %v1373_v28 = vld [vmem:[%s7836_s21 + $0x38] sm:$0xff]  ;;  %v1374_v30 = vld [vmem:[%s7836_s21 + $0x40] sm:$0xff]  ;;  %v1380_v9 = vld [vmem:[%s7836_s21 + $0x70] sm:$0xff]  ;;  %5736 = vset.pattern.permute.xlu0 %v6685_v16 }
 0x611   :  { %v1234_v37 = vmax.f32 %v1232_v26, %v1233_v32  ;;  %v1229_v8 = vmul.f32 %v7242_v53, %v1225_v55  ;;  %v5354_v26 = vpack.c.bf16 %v1371_v21, %v1370_v20  ;;  %v5360_v32 = vpack.c.bf16 %v1375_v31, %v1374_v30  ;;  %v1463_v46 = vld [vmem:[#allocation16 + $0x18] sm:$0xff]  ;;  %v2345_v31 = vld [vmem:[%s7837_s27] sm:$0xff] }
 0x612   :  { %v1243_v38 = vmax.f32 %v1241_v29, %v1242_v36  ;;  %v5357_v29 = vpack.c.bf16 %v1373_v28, %v1372_v27  ;;  %v1377_v36 = vld [vmem:[%s7836_s21 + $0x58] sm:$0xff]  ;;  %v6686_v27 = vmov 5   ;;  %v6687_v28 = vmov 8  }
 0x613   :  { %v1235_v40 = vrot.slane %v1234_v37, 4  ;;  %v6690_v30 = vmov 7  }
 0x614   :  { %v1244_v41 = vrot.slane %v1243_v38, 4 }
 0x615   :  { %v1236_v42 = vmax.f32 %v1234_v37, %v1235_v40  ;;  %v5363_v37 = vpack.c.bf16 %v1377_v36, %v1376_v33  ;;  %v2348_v33 = vld [vmem:[%s7837_s27 + $0x18] sm:$0xff]  ;;  %v2347_v36 = vld [vmem:[%s7837_s27 + $0x10] sm:$0xff] }
 0x616   :  { %v1245_v43 = vmax.f32 %v1243_v38, %v1244_v41  ;;  %v1378_v38 = vld [vmem:[%s7836_s21 + $0x60] sm:$0xff]  ;;  %v1381_v41 = vld [vmem:[%s7836_s21 + $0x78] sm:$0xff] }
 0x617   :  { %v1237_v11 = vrot.slane %v1236_v42, 2  ;;  %v5366_v40 = vpack.c.bf16 %v1379_v39, %v1378_v38  ;;  %v2352_v38 = vld [vmem:[%s7837_s27 + $0x38] sm:$0xff]  ;;  %v2349_v39 = vld [vmem:[%s7837_s27 + $0x20] sm:$0xff] }
 0x618   :  { %v1246_v45 = vrot.slane %v1245_v43, 2 }
 0x619   :  { %v1238_v47 = vmax.f32 %v1236_v42, %v1237_v11  ;;  %v5369_v42 = vpack.c.bf16 %v1381_v41, %v1380_v9  ;;  %v1462_v11 = vld [vmem:[#allocation16 + $0x10] sm:$0xff] }
 0x61a   :  { %v1247_v50 = vmax.f32 %v1245_v43, %v1246_v45  ;;  %v1460_v43 = vld [vmem:[#allocation16] sm:$0xff] }
 0x61b   :  { %v1239_v52 = vrot.slane %v1238_v47, 1  ;;  %v5372_v45 = vpack.c.bf16 %v1461_v44, %v1460_v43 }
 0x61c   :  { %v1248_v56 = vrot.slane %v1247_v50, 1 }
 0x61d   :  { %v1240_v57 = vmax.f32 %v1238_v47, %v1239_v52  ;;  %5373 = vmatpush3.bf16.msra.mxu1 %v5372_v45  ;;  %v5375_v47 = vpack.c.bf16 %v1463_v46, %v1462_v11 }
 0x61e   :  { %v1249_v58 = vmax.f32 %v1247_v50, %v1248_v56  ;;  %5374 = vmatprep.subr.bf16.mxu1 %v6683_v60  ;;  %v1464_v50 = vld [vmem:[#allocation16 + $0x20] sm:$0xff]  ;;  %v4659_v56 = vld [vmem:[#allocation13] ss:$0 sm:$0xff] }
 0x61f   :  { %v1252_v63 = vmul.f32 %v7245_v54, %v1240_v57  ;;  %v5378_v52 = vpack.c.bf16 %v1465_v51, %v1464_v50 }
 0x620   :  { %v1253_v10 = vmul.f32 %v7245_v54, %v1249_v58 }
 0x621   :  { %v1254_v13 = vadd.f32 %v1252_v63, %v1228_v59  ;;  %5376 = vmatpush3.bf16.msra.mxu1 %v5375_v47 }
 0x622   :  { %v1255_v14 = vadd.f32 %v1253_v10, %v1229_v8  ;;  %5377 = vmatprep.subr.bf16.mxu1 %v6683_v60  ;;  %v5381_v8 = vpack.c.bf16 %v1467_v7, %v1466_v2  ;;  %v4660_v10 = vld [vmem:[#allocation14] ss:$0 sm:$0xff] }
 0x624   :  { %1359 = vmatprep.mubr.f32.mxu0 %v1255_v14 }
 0x625   :  { %1360 = vmatmul.mubr.f32.vlgmr.msra.gmra.mrb[24].mxu0 %v1254_v13  ;;  %5379 = vmatpush3.bf16.msra.mxu1 %v5378_v52 }
 0x626   :  { %5349 = vmatpush3.bf16.msra.mxu0 %v5348_v15  ;;  %5102 = vmatprep.mubr.msk.f32.mxu0 %vm6684_vm7, %v6682_v18 }
 0x627   :  { %5350 = vmatprep.subr.bf16.mxu0 %v6683_v60  ;;  %5380 = vmatprep.subr.bf16.mxu1 %v6683_v60 }
 0x629   :  { %5382 = vmatpush3.bf16.msra.mxu1 %v5381_v8 }
 0x62a   :  { %5352 = vmatpush3.bf16.msra.mxu0 %v5351_v17  ;;  %v4661_v17 = vld [vmem:[#allocation17] ss:$0 sm:$0xff] }
 0x62b   :  { %5353 = vmatprep.subr.bf16.mxu0 %v6683_v60 }
 0x62e   :  { %5355 = vmatpush3.bf16.msra.mxu0 %v5354_v26 }
 0x62f   :  { %5356 = vmatprep.subr.bf16.mxu0 %v6683_v60 }
 0x632   :  { %5358 = vmatpush3.bf16.msra.mxu0 %v5357_v29  ;;  %v6689_v29 = vmov 6  }
 0x633   :  { %5359 = vmatprep.subr.bf16.mxu0 %v6683_v60 }
 0x636   :  { %5361 = vmatpush3.bf16.msra.mxu0 %v5360_v32  ;;  %v2346_v32 = vld [vmem:[%s7837_s27 + $0x8] sm:$0xff] }
 0x637   :  { %5362 = vmatprep.subr.bf16.mxu0 %v6683_v60 }
 0x63a   :  { %5364 = vmatpush3.bf16.msra.mxu0 %v5363_v37  ;;  %v2350_v37 = vld [vmem:[%s7837_s27 + $0x28] sm:$0xff] }
 0x63b   :  { %5365 = vmatprep.subr.bf16.mxu0 %v6683_v60 }
 0x63e   :  { %5367 = vmatpush3.bf16.msra.mxu0 %v5366_v40  ;;  %v2351_v40 = vld [vmem:[%s7837_s27 + $0x30] sm:$0xff] }
 0x63f   :  { %5368 = vmatprep.subr.bf16.mxu0 %v6683_v60 }
 0x642   :  { %5370 = vmatpush3.bf16.msra.mxu0 %v5369_v42  ;;  %v1548_v42 = vld [vmem:[#allocation19] sm:$0x7] }
 0x643   :  { %v1560_v44 = vrot.slane %v1548_v42, 1  ;;  %v1778_v45 = vrot.slane %v1548_v42, 7  ;;  %v1568_v46 = vrot.slane %v1548_v42, 2 }
 0x6f8   :  { %v4837_v55 = vpop.f32.mrb[24].mxu0 }
 0x6f9   :  { %v4838_v57 = vpop.f32.mrb[25].mxu0 }
 0x6fa   :  { %v4839_v58 = vadd.f32 %v4838_v57, %v4837_v55 }
 0x6fc   :  { %v1362_v59 = vadd.f32 %v4839_v58, %v4659_v56 }
 0x6fe   :  { %v1365_v63 = vmax.f32 %v1362_v59, 0.0 }
 0x700   :  { %5103 = vmatmul.mubr.f32.vlgmr.msra.gmra.mrb[26].mxu0 %v1365_v63 }
 0x701   :  { %5140 = vmatprep.mubr.msk.f32.mxu0 %vm740_vm3, %v7167_v34 }
 0x7d3   :  { %v1455_v13 = vpop.f32.mrb[26].mxu0 }
 0x7d4   :  { %v1456_v14 = vadd.f32 %v4660_v10, %v1455_v13  ;;  %v5104_v15 = vpop.f32.mrb[27].mxu0 }
 0x7d6   :  { %v1459_v12 = vmax.f32 %v1456_v14, 0.0 }
 0x7d8   :  { %5122 = vmatmul.mubr.msk.f32.vlgmr.msra.gmra.mrb[8].mxu1 %vm921_vm4, %v1459_v12 }
 0x7d9   :  { %5126 = vmatprep.mubr.msk.f32.mxu1 %vm740_vm3, %v7167_v34  ;;  %v6688_v34 = vmov 4  }
 0x8ab   :  { %v1544_v20 = vpop.f32.mrb[8].mxu1 }
 0x8ac   :  { %v1545_v21 = vadd.f32 %v4661_v17, %v1544_v20  ;;  %v5123_v26 = vpop.f32.mrb[9].mxu1 }
 0x8ae   :  { %1573 = vperm.xlu0 %5736, %v1545_v21   ;;  %1551 = vperm.xlu1 %5734, %v1545_v21  }
 0x8b2   :  { %5739 = vset.pattern.permute.xlu0 %v6686_v27  ;;  %5735 = vset.pattern.permute.xlu1 %v6679_v0 }
 0x8b3   :  { %1584 = vperm.xlu0 %5739, %v1545_v21   ;;  %1556 = vperm.xlu1 %5735, %v1545_v21  }
 0x8b7   :  { %5742 = vset.pattern.permute.xlu0 %v6687_v28  ;;  %5737 = vset.pattern.permute.xlu1 %v6688_v34 }
 0x8b8   :  { %1601 = vperm.xlu0 %5742, %v1545_v21   ;;  %1578 = vperm.xlu1 %5737, %v1545_v21  }
 0x8bc   :  { %5738 = vset.pattern.permute.xlu1 %v6681_v4  ;;  %5746 = vset.pattern.permute.xlu0 %v6681_v4 }
 0x8bd   :  { %1565 = vperm.xlu1 %5738, %v1545_v21   ;;  %2454 = vperm.xlu0 %5746, %v2346_v32  }
 0x8c1   :  { %5740 = vset.pattern.permute.xlu1 %v6689_v29  ;;  %2462 = vperm.xlu0 %5746, %v2348_v33  }
 0x8c2   :  { %1590 = vperm.xlu1 %5740, %v1545_v21  }
 0x8c5   :  { %5750 = vset.pattern.permute.xlu0 %v6680_v1 }
 0x8c6   :  { %5741 = vset.pattern.permute.xlu1 %v6690_v30  ;;  %2360 = vperm.xlu0 %5750, %v2346_v32  }
 0x8c7   :  { %1595 = vperm.xlu1 %5741, %v1545_v21  }
 0x8ca   :  { %2370 = vperm.xlu0 %5750, %v2348_v33  }
 0x8cb   :  { %5743 = vset.pattern.permute.xlu1 %v6680_v1 }
 0x8cc   :  { %2355 = vperm.xlu1 %5743, %v2345_v31  }
 0x8ce   :  { %2380 = vperm.xlu0 %5750, %v2350_v37  }
 0x8d0   :  { %5744 = vset.pattern.permute.xlu1 %v6679_v0 }
 0x8d1   :  { %2402 = vperm.xlu1 %5744, %v2345_v31  }
 0x8d2   :  { %2390 = vperm.xlu0 %5750, %v2352_v38  }
 0x8d5   :  { %2406 = vperm.xlu1 %5744, %v2346_v32  }
 0x8d6   :  { %5756 = vset.pattern.permute.xlu0 %v6681_v4 }
 0x8d7   :  { %2470 = vperm.xlu0 %5756, %v2350_v37  }
 0x8d9   :  { %5745 = vset.pattern.permute.xlu1 %v6681_v4 }
 0x8da   :  { %2450 = vperm.xlu1 %5745, %v2345_v31  }
 0x8db   :  { %2478 = vperm.xlu0 %5756, %v2352_v38  }
 0x8de   :  { %5747 = vset.pattern.permute.xlu1 %v6680_v1 }
 0x8df   :  { %2365 = vperm.xlu1 %5747, %v2347_v36   ;;  %5760 = vset.pattern.permute.xlu0 %v6685_v16 }
 0x8e3   :  { %5748 = vset.pattern.permute.xlu1 %v6679_v0 }
 0x8e4   :  { %2410 = vperm.xlu1 %5748, %v2347_v36  }
 0x8e8   :  { %2414 = vperm.xlu1 %5748, %v2348_v33  }
 0x8ec   :  { %5749 = vset.pattern.permute.xlu1 %v6681_v4 }
 0x8ed   :  { %2458 = vperm.xlu1 %5749, %v2347_v36  }
 0x8f1   :  { %5751 = vset.pattern.permute.xlu1 %v6680_v1 }
 0x8f2   :  { %2375 = vperm.xlu1 %5751, %v2349_v39  }
 0x8f6   :  { %5752 = vset.pattern.permute.xlu1 %v6679_v0 }
 0x8f7   :  { %2418 = vperm.xlu1 %5752, %v2349_v39  }
 0x8fb   :  { %2422 = vperm.xlu1 %5752, %v2350_v37  }
 0x8ff   :  { %5753 = vset.pattern.permute.xlu1 %v6681_v4 }
 0x900   :  { %2466 = vperm.xlu1 %5753, %v2349_v39  }
 0x904   :  { %5754 = vset.pattern.permute.xlu1 %v6680_v1 }
 0x905   :  { %2385 = vperm.xlu1 %5754, %v2351_v40  }
 0x909   :  { %5755 = vset.pattern.permute.xlu1 %v6679_v0 }
 0x90a   :  { %2426 = vperm.xlu1 %5755, %v2351_v40  }
 0x90e   :  { %2430 = vperm.xlu1 %5755, %v2352_v38  }
 0x912   :  { %5757 = vset.pattern.permute.xlu1 %v6681_v4 }
 0x913   :  { %2474 = vperm.xlu1 %5757, %v2351_v40  }
 0x917   :  { %5758 = vset.pattern.permute.xlu1 %v6680_v1 }
 0x92d   :  { %v1552_v9 = vpop.permute.xlu1 %1551  ;;  %v1574_v11 = vpop.permute.xlu0 %1573 }
 0x92e   :  { %v1554_v56 = vmul.f32 %v1552_v9, %v1548_v42  ;;  %v1780_v57 = vmul.f32 %v1778_v45, %v1552_v9  ;;  %v1576_v63 = vmul.f32 %v1574_v11, %v1548_v42  ;;  %v1785_v2 = vmul.f32 %v1778_v45, %v1574_v11 }
 0x932   :  { %v1557_v41 = vpop.permute.xlu1 %1556  ;;  %v1585_v7 = vpop.permute.xlu0 %1584 }
 0x933   :  { %v1562_v47 = vmul.f32 %v1560_v44, %v1557_v41  ;;  %v1781_v50 = vmul.f32 %v1557_v41, %v1548_v42  ;;  %v1587_v17 = vmul.f32 %v1585_v7, %v1568_v46  ;;  %v1788_v20 = vmul.f32 %v1585_v7, %v1560_v44 }
 0x935   :  { %v1563_v8 = vadd.f32 %v1562_v47, %v1554_v56  ;;  %v1782_v10 = vadd.f32 %v1781_v50, %v1780_v57 }
 0x937   :  { %v1579_v43 = vpop.permute.xlu1 %1578  ;;  %v1602_v21 = vpop.permute.xlu0 %1601 }
 0x938   :  { %v1581_v52 = vmul.f32 %v1579_v43, %v1560_v44  ;;  %v1786_v55 = vmul.f32 %v1579_v43, %v1548_v42  ;;  %v1604_v9 = vmul.f32 %v1602_v21, %v1568_v46  ;;  %v1793_v41 = vmul.f32 %v1602_v21, %v1560_v44  ;;  %v5814_v21 = vld [vmem:[#allocation25 + $0x50] ss:$8 sps:$4 sm:$0xff]  }
 0x93a   :  { %v1582_v13 = vadd.f32 %v1581_v52, %v1576_v63  ;;  %v1787_v14 = vadd.f32 %v1786_v55, %v1785_v2 }
 0x93c   :  { %v1566_v51 = vpop.permute.xlu1 %1565  ;;  %v1588_v26 = vadd.f32 %v1587_v17, %v1582_v13  ;;  %v1789_v31 = vadd.f32 %v1788_v20, %v1787_v14  ;;  %v5807_v13 = vld [vmem:[#allocation25 + $0x24] ss:$8 sps:$4 sm:$0xff]   ;;  %v5805_v14 = vld [vmem:[#allocation25 + $0x20] ss:$8 sps:$4 sm:$0xff]   ;;  %v5816_v20 = vld [vmem:[#allocation25 + $0x54] ss:$8 sps:$4 sm:$0xff]  }
 0x93d   :  { %v1570_v58 = vmul.f32 %v1568_v46, %v1566_v51  ;;  %v1783_v59 = vmul.f32 %v1566_v51, %v1560_v44  ;;  %v5811_v17 = vld [vmem:[#allocation25 + $0x40] ss:$8 sps:$4 sm:$0xff]  }
 0x93e   :  { %v1614_v43 = vrot.slane %v1588_v26, %v7232_v62  ;;  %v1803_v11 = vrot.slane %v1789_v31, %v7235_v6 }
 0x93f   :  { %v1571_v12 = vadd.f32 %v1570_v58, %v1563_v8  ;;  %v1784_v16 = vadd.f32 %v1783_v59, %v1782_v10  ;;  %v5804_v8 = vld [vmem:[#allocation25 + $0x14] ss:$8 sps:$4 sm:$0xff]   ;;  %v5802_v10 = vld [vmem:[#allocation25 + $0x10] ss:$8 sps:$4 sm:$0xff]  }
 0x940   :  { %v1615_v61 = vmul.f32 %v1614_v43, %v7245_v54  ;;  %v1804_v46 = vmul.f32 %v1803_v11, %v7245_v54 }
 0x941   :  { %v1591_v15 = vpop.permute.xlu1 %1590  ;;  %v1609_v32 = vrot.slane %v1571_v12, %v7232_v62  ;;  %v1798_v33 = vrot.slane %v1784_v16, %v7235_v6  ;;  %v5808_v12 = vld [vmem:[#allocation25 + $0x30] ss:$8 sps:$4 sm:$0xff]   ;;  %v5813_v16 = vld [vmem:[#allocation25 + $0x44] ss:$8 sps:$4 sm:$0xff]  }
 0x942   :  { %v1593_v37 = vmul.f32 %v1591_v15, %v1548_v42  ;;  %v1790_v38 = vmul.f32 %v1778_v45, %v1591_v15  ;;  %v7325_v45 = vsel %vm1617_vm8, 1.0, %v6682_v18  ;;  %v5810_v15 = vld [vmem:[#allocation25 + $0x34] ss:$8 sps:$4 sm:$0xff]  }
 0x943   :  { %v1610_v51 = vmul.f32 %v1609_v32, %v7242_v53  ;;  %v1799_v52 = vmul.f32 %v1798_v33, %v7242_v53 }
 0x945   :  { %v1616_v57 = vadd.f32 %v1615_v61, %v1610_v51  ;;  %v1805_v59 = vadd.f32 %v1804_v46, %v1799_v52  ;;  %v4679_v52 = vld [vmem:[#allocation20] ss:$0 sm:$0xff] }
 0x946   :  { %v1596_v36 = vpop.permute.xlu1 %1595 }
 0x947   :  { %v1598_v39 = vmul.f32 %v1596_v36, %v1560_v44  ;;  %v1791_v40 = vmul.f32 %v1596_v36, %v1548_v42 }
 0x949   :  { %v1599_v47 = vadd.f32 %v1598_v39, %v1593_v37  ;;  %v1792_v50 = vadd.f32 %v1791_v40, %v1790_v38 }
 0x94b   :  { %v1605_v55 = vadd.f32 %v1604_v9, %v1599_v47  ;;  %v1794_v56 = vadd.f32 %v1793_v41, %v1792_v50  ;;  %v2356_v26 = vpop.permute.xlu1 %2355  ;;  %v7379_v9 = vpop.permute.xlu0 %2454 }
 0x94d   :  { %v1622_v42 = vrot.slane %v1605_v55, %v7232_v62  ;;  %v1809_v44 = vrot.slane %v1794_v56, %v7235_v6 }
 0x94f   :  { %v1623_v58 = vmul.f32 %v1622_v42, %v7325_v45  ;;  %v1810_v63 = vmul.f32 %v1809_v44, %v7325_v45  ;;  %v7383_v56 = vpop.permute.xlu0 %2462 }
 0x950   :  { %v2403_v31 = vpop.permute.xlu1 %2402 }
 0x951   :  { %v1624_v2 = vadd.f32 %v1623_v58, %v1616_v57  ;;  %v1811_v7 = vadd.f32 %v1810_v63, %v1805_v59 }
 0x953   :  { %5124 = vmatprep.subr.mxu1 %v1624_v2  ;;  %5138 = vmatprep.subr.mxu0 %v1811_v7 }
 0x954   :  { %5125 = vmatpush3.msra.mxu1 %v1624_v2  ;;  %5139 = vmatpush3.msra.mxu0 %v1811_v7  ;;  %v7365_v32 = vpop.permute.xlu1 %2406 }
 0x955   :  { %5127 = vmatmul.mubr.msk.f32.vlgmr.msra.gmra.mrb[10].mxu1 %vm740_vm3, %v7169_v35  ;;  %5141 = vmatmul.mubr.msk.f32.vlgmr.msra.gmra.mrb[28].mxu0 %vm740_vm3, %v7169_v35  ;;  %v5795_v35 = vld [vmem:[#allocation22] sm:$0xff]  }
 0x956   :  { %5129 = vmatprep.mubr.msk.f32.mxu1 %vm740_vm3, %v7181_v48  ;;  %5143 = vmatprep.mubr.msk.f32.mxu0 %vm740_vm3, %v7181_v48  ;;  %v5796_v48 = vld [vmem:[#allocation22 + $0x8] sm:$0xff]  }
 0x957   :  { %5152 = vmatprep.subr.bf16.mxu1 %v5795_v35 }
 0x958   :  { %5153 = vmatpush3.bf16.msra.mxu1 %v5795_v35 }
 0x959   :  { %5130 = vmatmul.mubr.msk.f32.gmra.mrb[12].mxu1 %vm740_vm3, %v7183_v49  ;;  %5144 = vmatmul.mubr.msk.f32.gmra.mrb[30].mxu0 %vm740_vm3, %v7183_v49  ;;  %v5797_v49 = vld [vmem:[#allocation22 + $0x10] sm:$0xff]   ;;  %v7367_v33 = vpop.permute.xlu1 %2450 }
 0x95a   :  { %5132 = vmatprep.mubr.msk.f32.mxu1 %vm740_vm3, %v7195_v3  ;;  %5146 = vmatprep.mubr.msk.f32.mxu0 %vm740_vm3, %v7195_v3  ;;  %v5798_v3 = vld [vmem:[#allocation22 + $0x18] sm:$0xff]  }
 0x95b   :  { %5154 = vmatprep.subr.bf16.mxu1 %v5796_v48 }
 0x95c   :  { %5155 = vmatpush3.bf16.msra.mxu1 %v5796_v48 }
 0x95d   :  { %5133 = vmatmul.mubr.msk.f32.gmra.mrb[14].mxu1 %vm740_vm3, %v7197_v5  ;;  %5147 = vmatmul.mubr.msk.f32.gmra.mrb[32].mxu0 %vm740_vm3, %v7197_v5  ;;  %v7362_v5 = vld [vmem:[#allocation28] sm:$0xff] }
 0x95e   :  { %5135 = vmatprep.mubr.msk.f32.mxu1 %vm740_vm3, %v7209_v23  ;;  %5149 = vmatprep.mubr.msk.f32.mxu0 %vm740_vm3, %v7209_v23  ;;  %v5799_v23 = vld [vmem:[#allocation25] ss:$8 sps:$4 sm:$0xff]   ;;  %v7369_v36 = vpop.permute.xlu1 %2365 }
 0x95f   :  { %5156 = vmatprep.subr.bf16.mxu1 %v5797_v49 }
 0x960   :  { %5157 = vmatpush3.bf16.msra.mxu1 %v5797_v49 }
 0x961   :  { %5136 = vmatmul.mubr.msk.f32.gmra.mrb[16].mxu1 %vm740_vm3, %v7211_v24  ;;  %5150 = vmatmul.mubr.msk.f32.gmra.mrb[34].mxu0 %vm740_vm3, %v7211_v24  ;;  %v5801_v24 = vld [vmem:[#allocation25 + $0x4] ss:$8 sps:$4 sm:$0xff]  }
 0x962   :  { %2260 = vmatprep.mubr.bf16.mxu0 %v6680_v1  ;;  %5158 = vmatprep.subr.bf16.mxu1 %v5798_v3 }
 0x963   :  { %2228 = vmatprep.subr.bf16.mxu0 %v5801_v24  ;;  %v7371_v37 = vpop.permute.xlu1 %2410 }
 0x964   :  { %5159 = vmatpush3.bf16.msra.mxu1 %v5798_v3  ;;  %2229 = vmatpush1.bf16.msra.mxu0 %v5799_v23 }
 0x965   :  { %5168 = vmatprep.subr.mxu1 %v7362_v5  ;;  %2230 = vmatprep.subr.bf16.mxu0 %v5804_v8 }
 0x967   :  { %v7373_v38 = vpop.permute.xlu1 %2414 }
 0x968   :  { %2231 = vmatpush1.bf16.msra.mxu0 %v5802_v10 }
 0x969   :  { %2232 = vmatprep.subr.bf16.mxu0 %v5807_v13 }
 0x96c   :  { %2233 = vmatpush1.bf16.msra.mxu0 %v5805_v14  ;;  %v7375_v39 = vpop.permute.xlu1 %2458 }
 0x96d   :  { %2234 = vmatprep.subr.bf16.mxu0 %v5810_v15 }
 0x970   :  { %2235 = vmatpush1.bf16.msra.mxu0 %v5808_v12 }
 0x971   :  { %2236 = vmatprep.subr.bf16.mxu0 %v5813_v16  ;;  %v7377_v40 = vpop.permute.xlu1 %2375 }
 0x974   :  { %2237 = vmatpush1.bf16.msra.mxu0 %v5811_v17 }
 0x975   :  { %2238 = vmatprep.subr.bf16.mxu0 %v5816_v20 }
 0x976   :  { %v7381_v41 = vpop.permute.xlu1 %2418 }
 0x978   :  { %2239 = vmatpush1.bf16.msra.mxu0 %v5814_v21  ;;  %v2361_v21 = vpop.permute.xlu0 %2360 }
 0x97a   :  { %v7385_v44 = vpop.permute.xlu1 %2422 }
 0x97f   :  { %v2467_v20 = vpop.permute.xlu1 %2466 }
 0xa28   :  { %v5128_v43 = vpop.f32.mrb[10].mxu1  ;;  %v5142_v11 = vpop.f32.mrb[28].mxu0 }
 0xa29   :  { %v1950_v47 = vmul.f32 0.0, %v5142_v11  ;;  %v1691_v50 = vpop.f32.mrb[11].mxu1  ;;  %v1878_v51 = vpop.f32.mrb[29].mxu0 }
 0xa2a   :  { %v1949_v55 = vmul.f32 0.0, %v1878_v51 }
 0xa2b   :  { %v1958_v42 = vadd.f32 %v5128_v43, %v1950_v47 }
 0xa2c   :  { %v1957_v61 = vadd.f32 %v1949_v55, %v1691_v50  ;;  %v5131_v46 = vpop.f32.mrb[12].mxu1  ;;  %v5145_v57 = vpop.f32.mrb[30].mxu0 }
 0xa2d   :  { %v1973_v58 = vadd.f32 %v4679_v52, %v1958_v42  ;;  %v1952_v59 = vmul.f32 0.0, %v5145_v57  ;;  %v1701_v63 = vpop.f32.mrb[13].mxu1  ;;  %v1888_v2 = vpop.f32.mrb[31].mxu0 }
 0xa2e   :  { %v1972_v7 = vadd.f32 %v4679_v52, %v1957_v61  ;;  %v1951_v35 = vmul.f32 0.0, %v1888_v2  ;;  %v2393_v2 = vmul.f32 %v2356_v26, %v7156_v22 }
 0xa2f   :  { %v1981_v48 = vmax.f32 %v1973_v58, 0.0  ;;  %v1960_v49 = vadd.f32 %v5131_v46, %v1952_v59 }
 0xa30   :  { %v1980_v3 = vmax.f32 %v1972_v7, 0.0  ;;  %v1959_v23 = vadd.f32 %v1951_v35, %v1701_v63  ;;  %v5134_v24 = vpop.f32.mrb[14].mxu1  ;;  %v5148_v8 = vpop.f32.mrb[32].mxu0  ;;  %v2433_v7 = vmul.f32 %v2403_v31, %v7153_v19 }
 0xa31   :  { %v1975_v10 = vadd.f32 %v4679_v52, %v1960_v49  ;;  %v1767_v13 = vmul.f32 0.0, %v5134_v24  ;;  %v1711_v14 = vpop.f32.mrb[15].mxu1  ;;  %v1898_v15 = vpop.f32.mrb[33].mxu0 }
 0xa32   :  { %v1988_v12 = vpack.c.bf16 %v1981_v48, %v1980_v3  ;;  %v1974_v16 = vadd.f32 %v4679_v52, %v1959_v23  ;;  %v1766_v17 = vmul.f32 0.0, %v1711_v14  ;;  %v2371_v35 = vpop.permute.xlu0 %2370  ;;  %v2386_v24 = vpop.permute.xlu1 %2385  ;;  %v2441_v14 = vadd.f32 %v2433_v7, %v2393_v2 }
 0xa33   :  { %v1983_v43 = vmax.f32 %v1975_v10, 0.0  ;;  %v1962_v11 = vadd.f32 %v5148_v8, %v1767_v13 }
 0xa34   :  { %v1982_v47 = vmax.f32 %v1974_v16, 0.0  ;;  %v1961_v50 = vadd.f32 %v1898_v15, %v1766_v17  ;;  %v5137_v51 = vpop.f32.mrb[16].mxu1  ;;  %v5151_v55 = vpop.f32.mrb[34].mxu0  ;;  %5160 = vmatprep.mubr.msk.bf16.mxu1 %vm921_vm4, %v1988_v12  ;;  %v2481_v15 = vmul.f32 %v7367_v33, %v7161_v25  ;;  %v2434_v16 = vmul.f32 %v7365_v32, %v7153_v19 }
 0xa35   :  { %v1977_v42 = vadd.f32 %v4679_v52, %v1962_v11  ;;  %v1769_v61 = vmul.f32 0.0, %v5137_v51  ;;  %v1721_v46 = vpop.f32.mrb[17].mxu1  ;;  %v1908_v57 = vpop.f32.mrb[35].mxu0  ;;  %v2394_v17 = vmul.f32 %v2361_v21, %v7156_v22  ;;  %v2436_v33 = vmul.f32 %v7373_v38, %v7153_v19 }
 0xa36   :  { %v1989_v58 = vpack.c.bf16 %v1983_v43, %v1982_v47  ;;  %v1976_v59 = vadd.f32 %v4679_v52, %v1961_v50  ;;  %v1768_v63 = vmul.f32 0.0, %v1721_v46  ;;  %v2381_v26 = vpop.permute.xlu0 %2380  ;;  %v2395_v43 = vmul.f32 %v7369_v36, %v7156_v22  ;;  %v2427_v11 = vpop.permute.xlu1 %2426 }
 0xa37   :  { %v1985_v48 = vmax.f32 %v1977_v42, 0.0  ;;  %v1964_v49 = vadd.f32 %v5151_v55, %v1769_v61  ;;  %v7402_v47 = vadd.f32 %v2481_v15, %v2441_v14  ;;  %v2396_v50 = vmul.f32 %v2371_v35, %v7156_v22  ;;  %v5819_v14 = vld [vmem:[#allocation25 + $0x64] ss:$8 sps:$4 sm:$0xff]   ;;  %v5817_v15 = vld [vmem:[#allocation25 + $0x60] ss:$8 sps:$4 sm:$0xff]  }
 0xa38   :  { %v1984_v3 = vmax.f32 %v1976_v59, 0.0  ;;  %v1963_v23 = vadd.f32 %v1908_v57, %v1768_v63  ;;  %5161 = vmatmul.mubr.msk.bf16.vlgmr.msra.gmra.mrb[20].mxu1 %vm921_vm4, %v1989_v58  ;;  %v2482_v36 = vmul.f32 %v7379_v9, %v7161_v25  ;;  %v2442_v21 = vadd.f32 %v2434_v16, %v2394_v17  ;;  %2240 = vmatprep.subr.bf16.mxu0 %v5819_v14  ;;  %v5825_v16 = vld [vmem:[#allocation31 + $0x10] sm:$0xff]   ;;  %v5826_v17 = vld [vmem:[#allocation31 + $0x18] sm:$0xff]  }
 0xa39   :  { %v1979_v8 = vadd.f32 %v4679_v52, %v1964_v49  ;;  %5169 = vmatpush3.msra.mxu1 %v7362_v5  ;;  %v2435_v5 = vmul.f32 %v7371_v37, %v7153_v19  ;;  %v2483_v51 = vmul.f32 %v7375_v39, %v7161_v25  ;;  %v2397_v55 = vmul.f32 %v7377_v40, %v7156_v22 }
 0xa3a   :  { %v1990_v10 = vpack.c.bf16 %v1985_v48, %v1984_v3  ;;  %v1978_v13 = vadd.f32 %v4679_v52, %v1963_v23  ;;  %v2391_v32 = vpop.permute.xlu0 %2390  ;;  %v2437_v38 = vmul.f32 %v7381_v41, %v7153_v19  ;;  %v2431_v42 = vpop.permute.xlu1 %2430  ;;  %v2484_v61 = vmul.f32 %v7383_v56, %v7161_v25  ;;  %2241 = vmatpush1.bf16.msra.mxu0 %v5817_v15 }
 0xa3b   :  { %v1987_v12 = vmax.f32 %v1979_v8, 0.0  ;;  %v2443_v37 = vadd.f32 %v2435_v5, %v2395_v43  ;;  %v2444_v46 = vadd.f32 %v2436_v33, %v2396_v50  ;;  %v7420_v57 = vadd.f32 %v2482_v36, %v2442_v21  ;;  %v5829_v43 = vld [vmem:[#allocation34 + $0x4] ss:$8 sps:$4 sm:$0xff]   ;;  %v4680_v5 = vld [vmem:[#allocation23] ss:$0 sm:$0xff] }
 0xa3c   :  { %v1986_v31 = vmax.f32 %v1978_v13, 0.0  ;;  %5164 = vmatprep.mubr.msk.bf16.mxu1 %vm921_vm4, %v1990_v10  ;;  %v2438_v9 = vmul.f32 %v7385_v44, %v7153_v19  ;;  %v2398_v39 = vmul.f32 %v2381_v26, %v7156_v22  ;;  %v2445_v59 = vadd.f32 %v2437_v38, %v2397_v55  ;;  %v5822_v26 = vld [vmem:[#allocation25 + $0x74] ss:$8 sps:$4 sm:$0xff]  }
 0xa3d   :  { %v7422_v58 = vadd.f32 %v2483_v51, %v2443_v37  ;;  %v2485_v40 = vmul.f32 %v2467_v20, %v7161_v25  ;;  %v2399_v63 = vmul.f32 %v2386_v24, %v7156_v22  ;;  %v2439_v2 = vmul.f32 %v2427_v11, %v7153_v19  ;;  %2242 = vmatprep.subr.bf16.mxu0 %v5822_v26 }
 0xa3e   :  { %v1991_v52 = vpack.c.bf16 %v1987_v12, %v1986_v31  ;;  %v2471_v41 = vpop.permute.xlu0 %2470  ;;  %v2475_v56 = vpop.permute.xlu1 %2474  ;;  %v7432_v7 = vadd.f32 %v2484_v61, %v2444_v46  ;;  %v2446_v44 = vadd.f32 %v2438_v9, %v2398_v39  ;;  %v2400_v35 = vmul.f32 %v2391_v32, %v7156_v22  ;;  %v5820_v12 = vld [vmem:[#allocation25 + $0x70] ss:$8 sps:$4 sm:$0xff]  }
 0xa3f   :  { %v2486_v48 = vmul.f32 %v2471_v41, %v7161_v25  ;;  %v2440_v20 = vmul.f32 %v2431_v42, %v7153_v19  ;;  %v7439_v49 = vadd.f32 %v2485_v40, %v2445_v59  ;;  %v2447_v3 = vadd.f32 %v2439_v2, %v2399_v63  ;;  %2243 = vmatpush1.bf16.msra.mxu0 %v5820_v12  ;;  %v5824_v31 = vld [vmem:[#allocation31 + $0x8] sm:$0xff]  }
 0xa40   :  { %5165 = vmatmul.mubr.msk.bf16.gmra.mrb[24].mxu1 %vm921_vm4, %v1991_v52  ;;  %v2487_v24 = vmul.f32 %v2475_v56, %v7161_v25  ;;  %2882 = vmatprep.subr.bf16.mxu0 %v5829_v43  ;;  %v5827_v46 = vld [vmem:[#allocation34] ss:$8 sps:$4 sm:$0xff]  }
 0xa41   :  { %5170 = vmatprep.mubr.msk.f32.mxu1 %vm740_vm3, %v7402_v47  ;;  %v7446_v8 = vadd.f32 %v2486_v48, %v2446_v44  ;;  %v2448_v10 = vadd.f32 %v2440_v20, %v2400_v35 }
 0xa42   :  { %v2479_v23 = vpop.permute.xlu0 %2478  ;;  %v7449_v13 = vadd.f32 %v2487_v24, %v2447_v3 }
 0xa43   :  { %v2488_v22 = vmul.f32 %v2479_v23, %v7161_v25  ;;  %v5823_v25 = vld [vmem:[#allocation31] sm:$0xff]   ;;  %v4705_v23 = vld [vmem:[#allocation29] ss:$0 sm:$0xff] }
 0xa44   :  { %5182 = vmatprep.subr.bf16.mxu1 %v5823_v25 }
 0xa45   :  { %v7455_v19 = vadd.f32 %v2488_v22, %v2448_v10 }
 0xa48   :  { %5171 = vmatmul.mubr.msk.f32.vlgmr.msra.gmra.mrb[18].mxu1 %vm740_vm3, %v7420_v57 }
 0xa49   :  { %5173 = vmatprep.mubr.msk.f32.mxu1 %vm740_vm3, %v7422_v58  ;;  %5183 = vmatpush3.bf16.msra.mxu1 %v5823_v25 }
 0xa4a   :  { %5184 = vmatprep.subr.bf16.mxu1 %v5824_v31 }
 0xa4c   :  { %5174 = vmatmul.mubr.msk.f32.gmra.mrb[28].mxu1 %vm740_vm3, %v7432_v7 }
 0xa4d   :  { %5176 = vmatprep.mubr.msk.f32.mxu1 %vm740_vm3, %v7439_v49  ;;  %5185 = vmatpush3.bf16.msra.mxu1 %v5824_v31 }
 0xa4e   :  { %5186 = vmatprep.subr.bf16.mxu1 %v5825_v16 }
 0xa50   :  { %5177 = vmatmul.mubr.msk.f32.gmra.mrb[30].mxu1 %vm740_vm3, %v7446_v8 }
 0xa51   :  { %5179 = vmatprep.mubr.msk.f32.mxu1 %vm740_vm3, %v7449_v13  ;;  %5187 = vmatpush3.bf16.msra.mxu1 %v5825_v16 }
 0xa52   :  { %5188 = vmatprep.subr.bf16.mxu1 %v5826_v17 }
 0xa54   :  { %5180 = vmatmul.mubr.msk.f32.gmra.mrb[32].mxu1 %vm740_vm3, %v7455_v19 }
 0xa55   :  { %5189 = vmatpush3.bf16.msra.mxu1 %v5826_v17 }
 0xb0b   :  { %v5162_v52 = vpop.f32.mrb[20].mxu1 }
 0xb0c   :  { %v2086_v11 = vadd.f32 %v5162_v52, %v4680_v5  ;;  %v2077_v33 = vpop.f32.mrb[21].mxu1 }
 0xb0d   :  { %v2078_v50 = vadd.f32 %v4680_v5, %v2077_v33  ;;  %v5163_v32 = vpop.f32.mrb[22].mxu1 }
 0xb0e   :  { %v2089_v36 = vadd.f32 %v5163_v32, %v4680_v5  ;;  %v2080_v21 = vpop.f32.mrb[23].mxu1  ;;  %v2110_v51 = vmax.f32 %v2086_v11, 0.0 }
 0xb0f   :  { %v2081_v37 = vadd.f32 %v4680_v5, %v2080_v21  ;;  %v2108_v38 = vmax.f32 %v2078_v50, 0.0 }
 0xb10   :  { %v2111_v55 = vmax.f32 %v2089_v36, 0.0 }
 0xb11   :  { %v2109_v42 = vmax.f32 %v2081_v37, 0.0 }
 0xb12   :  { %v2117_v61 = vpack.c.bf16 %v2111_v55, %v2110_v51 }
 0xb13   :  { %v2116_v9 = vpack.c.bf16 %v2109_v42, %v2108_v38  ;;  %v5166_v39 = vpop.f32.mrb[24].mxu1 }
 0xb14   :  { %v2102_v59 = vadd.f32 %v5166_v39, %v4680_v5  ;;  %v2093_v40 = vpop.f32.mrb[25].mxu1 }
 0xb15   :  { %v2094_v63 = vadd.f32 %v4680_v5, %v2093_v40  ;;  %v5167_v41 = vpop.f32.mrb[26].mxu1  ;;  %2261 = vmatmul.mubr.bf16.vlgmr.msra.gmra.mrb[36].mxu0 %v2116_v9  ;;  %v5832_v40 = vld [vmem:[#allocation34 + $0x14] ss:$8 sps:$4 sm:$0xff]  }
 0xb16   :  { %v2105_v2 = vadd.f32 %v5167_v41, %v4680_v5  ;;  %v2096_v56 = vpop.f32.mrb[27].mxu1  ;;  %2270 = vmatprep.mubr.bf16.mxu0 %v6680_v1  ;;  %2883 = vmatpush1.bf16.msra.mxu0 %v5827_v46  ;;  %v2114_v35 = vmax.f32 %v2102_v59, 0.0  ;;  %v5835_v41 = vld [vmem:[#allocation34 + $0x24] ss:$8 sps:$4 sm:$0xff]  }
 0xb17   :  { %v2097_v44 = vadd.f32 %v4680_v5, %v2096_v56  ;;  %v2112_v20 = vmax.f32 %v2094_v63, 0.0  ;;  %v5830_v63 = vld [vmem:[#allocation34 + $0x10] ss:$8 sps:$4 sm:$0xff]   ;;  %2884 = vmatprep.subr.bf16.mxu0 %v5832_v40  ;;  %v5838_v56 = vld [vmem:[#allocation34 + $0x34] ss:$8 sps:$4 sm:$0xff]  }
 0xb18   :  { %v2115_v48 = vmax.f32 %v2105_v2, 0.0  ;;  %v5833_v2 = vld [vmem:[#allocation34 + $0x20] ss:$8 sps:$4 sm:$0xff]  }
 0xb19   :  { %v2113_v3 = vmax.f32 %v2097_v44, 0.0  ;;  %v5836_v44 = vld [vmem:[#allocation34 + $0x30] ss:$8 sps:$4 sm:$0xff]  }
 0xb1a   :  { %v2119_v24 = vpack.c.bf16 %v2115_v48, %v2114_v35  ;;  %2885 = vmatpush1.bf16.msra.mxu0 %v5830_v63  ;;  %v5841_v35 = vld [vmem:[#allocation34 + $0x44] ss:$8 sps:$4 sm:$0xff]   ;;  %v5839_v48 = vld [vmem:[#allocation34 + $0x40] ss:$8 sps:$4 sm:$0xff]  }
 0xb1b   :  { %v2118_v10 = vpack.c.bf16 %v2113_v3, %v2112_v20  ;;  %v5172_v22 = vpop.f32.mrb[18].mxu1  ;;  %2886 = vmatprep.subr.bf16.mxu0 %v5835_v41  ;;  %v5844_v20 = vld [vmem:[#allocation34 + $0x54] ss:$8 sps:$4 sm:$0xff]   ;;  %v5842_v3 = vld [vmem:[#allocation34 + $0x50] ss:$8 sps:$4 sm:$0xff]  }
 0xb1c   :  { %v2601_v14 = vadd.f32 %v5172_v22, %v4705_v23  ;;  %v2595_v15 = vpop.f32.mrb[19].mxu1  ;;  %v5848_v22 = vld [vmem:[#allocation34 + $0x70] ss:$8 sps:$4 sm:$0xff]  }
 0xb1d   :  { %v2596_v26 = vadd.f32 %v4705_v23, %v2595_v15  ;;  %2271 = vmatmul.mubr.bf16.gmra.mrb[40].mxu0 %v2117_v61 }
 0xb1e   :  { %v2635_v12 = vmax.f32 %v2601_v14, 0.0  ;;  %2280 = vmatprep.mubr.bf16.mxu0 %v6680_v1  ;;  %2887 = vmatpush1.bf16.msra.mxu0 %v5833_v2 }
 0xb1f   :  { %v2634_v25 = vmax.f32 %v2596_v26, 0.0  ;;  %v5175_v31 = vpop.f32.mrb[28].mxu1  ;;  %2888 = vmatprep.subr.bf16.mxu0 %v5838_v56  ;;  %v2136_v26 = vld [vmem:[#allocation26] sm:$0x3] }
 0xb20   :  { %v2611_v16 = vadd.f32 %v5175_v31, %v4705_v23  ;;  %v2605_v17 = vpop.f32.mrb[29].mxu1  ;;  %v2141_v31 = vrot.slane %v2136_v26, %v7232_v62 }
 0xb21   :  { %v2642_v43 = vpack.c.bf16 %v2635_v12, %v2634_v25  ;;  %v2606_v5 = vadd.f32 %v4705_v23, %v2605_v17 }
 0xb22   :  { %v2637_v52 = vmax.f32 %v2611_v16, 0.0  ;;  %2889 = vmatpush1.bf16.msra.mxu0 %v5836_v44  ;;  %v2145_v16 = vrot.slane %v2136_v26, %v7235_v6 }
 0xb23   :  { %v2636_v11 = vmax.f32 %v2606_v5, 0.0  ;;  %v5178_v33 = vpop.f32.mrb[30].mxu1  ;;  %5190 = vmatprep.mubr.msk.bf16.mxu1 %vm921_vm4, %v2642_v43  ;;  %2890 = vmatprep.subr.bf16.mxu0 %v5841_v35 }
 0xb24   :  { %v2621_v50 = vadd.f32 %v5178_v33, %v4705_v23  ;;  %v2615_v32 = vpop.f32.mrb[31].mxu1 }
 0xb25   :  { %v2643_v36 = vpack.c.bf16 %v2637_v52, %v2636_v11  ;;  %v2616_v21 = vadd.f32 %v4705_v23, %v2615_v32  ;;  %2281 = vmatmul.mubr.bf16.gmra.mrb[44].mxu0 %v2118_v10  ;;  %v5850_v10 = vld [vmem:[#allocation34 + $0x74] ss:$8 sps:$4 sm:$0xff]  }
 0xb26   :  { %v2639_v37 = vmax.f32 %v2621_v50, 0.0  ;;  %2290 = vmatprep.mubr.bf16.mxu0 %v6680_v1  ;;  %2891 = vmatpush1.bf16.msra.mxu0 %v5839_v48 }
 0xb27   :  { %v2638_v51 = vmax.f32 %v2616_v21, 0.0  ;;  %v5181_v55 = vpop.f32.mrb[32].mxu1  ;;  %5191 = vmatmul.mubr.msk.bf16.vlgmr.msra.gmra.mrb[36].mxu1 %vm921_vm4, %v2643_v36  ;;  %2892 = vmatprep.subr.bf16.mxu0 %v5844_v20 }
 0xb28   :  { %v2631_v38 = vadd.f32 %v5181_v55, %v4705_v23  ;;  %v2625_v42 = vpop.f32.mrb[33].mxu1 }
 0xb29   :  { %v2644_v61 = vpack.c.bf16 %v2639_v37, %v2638_v51  ;;  %v2626_v46 = vadd.f32 %v4705_v23, %v2625_v42  ;;  %v5847_v23 = vld [vmem:[#allocation34 + $0x64] ss:$8 sps:$4 sm:$0xff]  }
 0xb2a   :  { %v2641_v9 = vmax.f32 %v2631_v38, 0.0  ;;  %2893 = vmatpush1.bf16.msra.mxu0 %v5842_v3 }
 0xb2b   :  { %v2640_v39 = vmax.f32 %v2626_v46, 0.0  ;;  %5194 = vmatprep.mubr.msk.bf16.mxu1 %vm921_vm4, %v2644_v61  ;;  %2894 = vmatprep.subr.bf16.mxu0 %v5847_v23 }
 0xb2d   :  { %v2645_v59 = vpack.c.bf16 %v2641_v9, %v2640_v39  ;;  %2291 = vmatmul.mubr.bf16.gmra.mrb[48].mxu0 %v2119_v24  ;;  %v5845_v24 = vld [vmem:[#allocation34 + $0x60] ss:$8 sps:$4 sm:$0xff]  }
 0xb2e   :  { %2914 = vmatprep.mubr.bf16.mxu0 %v6680_v1  ;;  %2895 = vmatpush1.bf16.msra.mxu0 %v5845_v24 }
 0xb2f   :  { %5195 = vmatmul.mubr.msk.bf16.gmra.mrb[40].mxu1 %vm921_vm4, %v2645_v59  ;;  %2896 = vmatprep.subr.bf16.mxu0 %v5850_v10  ;;  %v4714_v59 = vld [vmem:[#allocation32] ss:$0 sm:$0xff] }
 0xb32   :  { %2897 = vmatpush1.bf16.msra.mxu0 %v5848_v22 }
 0xb33   :  { %5415 = vmatprep.subr.bf16.mxu0 %v6683_v60 }
 0xbe8   :  { %v2262_v14 = vpop.f32.mrb[36].mxu0 }
 0xbe9   :  { %v2264_v15 = vpop.f32.mrb[37].mxu0  ;;  %v2263_v43 = vadd.f32 %v2262_v14, %v2141_v31 }
 0xbea   :  { %v2266_v12 = vpop.f32.mrb[38].mxu0  ;;  %v2265_v11 = vadd.f32 %v2264_v15, %v2145_v16 }
 0xbeb   :  { %v2268_v25 = vpop.f32.mrb[39].mxu0  ;;  %v2267_v32 = vadd.f32 %v2266_v12, %v2141_v31 }
 0xbec   :  { %v2269_v51 = vadd.f32 %v2268_v25, %v2145_v16 }
 0xbf0   :  { %v2272_v17 = vpop.f32.mrb[40].mxu0 }
 0xbf1   :  { %v2273_v5 = vadd.f32 %v2272_v17, %v2141_v31  ;;  %v2274_v52 = vpop.f32.mrb[41].mxu0 }
 0xbf2   :  { %v2275_v33 = vadd.f32 %v2274_v52, %v2145_v16  ;;  %v2276_v50 = vpop.f32.mrb[42].mxu0 }
 0xbf3   :  { %v2301_v36 = vmax.f32 %v2263_v43, %v2273_v5  ;;  %v2277_v21 = vadd.f32 %v2276_v50, %v2141_v31  ;;  %v2278_v37 = vpop.f32.mrb[43].mxu0 }
 0xbf4   :  { %v2310_v55 = vmax.f32 %v2265_v11, %v2275_v33  ;;  %v2279_v38 = vadd.f32 %v2278_v37, %v2145_v16 }
 0xbf5   :  { %v2302_v42 = vmax.f32 %v2267_v32, %v2277_v21 }
 0xbf6   :  { %v2311_v61 = vmax.f32 %v2269_v51, %v2279_v38 }
 0xbf7   :  { %v2303_v46 = vmax.f32 %v2301_v36, %v2302_v42 }
 0xbf8   :  { %v2312_v9 = vmax.f32 %v2310_v55, %v2311_v61  ;;  %v2282_v39 = vpop.f32.mrb[44].mxu0 }
 0xbf9   :  { %v2284_v40 = vpop.f32.mrb[45].mxu0  ;;  %v2304_v20 = vrot.slane %v2303_v46, 4  ;;  %v2283_v17 = vadd.f32 %v2282_v39, %v2141_v31 }
 0xbfa   :  { %v2286_v63 = vpop.f32.mrb[46].mxu0  ;;  %v5192_v41 = vpop.f32.mrb[36].mxu1  ;;  %v2313_v24 = vrot.slane %v2312_v9, 4  ;;  %v2285_v33 = vadd.f32 %v2284_v40, %v2145_v16 }
 0xbfb   :  { %v2740_v2 = vadd.f32 %v5192_v41, %v4714_v59  ;;  %v2288_v56 = vpop.f32.mrb[47].mxu0  ;;  %v2731_v44 = vpop.f32.mrb[37].mxu1  ;;  %v2305_v25 = vmax.f32 %v2303_v46, %v2304_v20  ;;  %v2287_v37 = vadd.f32 %v2286_v63, %v2141_v31 }
 0xbfc   :  { %v2732_v35 = vadd.f32 %v4714_v59, %v2731_v44  ;;  %v5193_v48 = vpop.f32.mrb[38].mxu1  ;;  %v2314_v11 = vmax.f32 %v2312_v9, %v2313_v24  ;;  %v2289_v41 = vadd.f32 %v2288_v56, %v2145_v16 }
 0xbfd   :  { %v2743_v3 = vadd.f32 %v5193_v48, %v4714_v59  ;;  %v2734_v23 = vpop.f32.mrb[39].mxu1  ;;  %v2764_v22 = vmax.f32 %v2740_v2, 0.0 }
 0xbfe   :  { %v2735_v10 = vadd.f32 %v4714_v59, %v2734_v23  ;;  %v2762_v15 = vmax.f32 %v2732_v35, 0.0  ;;  %v2306_v35 = vrot.slane %v2305_v25, 2  ;;  %v2315_v20 = vrot.slane %v2314_v11, 2 }
 0xbff   :  { %v2765_v14 = vmax.f32 %v2743_v3, 0.0 }
 0xc00   :  { %v2763_v26 = vmax.f32 %v2735_v10, 0.0  ;;  %v2292_v12 = vpop.f32.mrb[48].mxu0 }
 0xc01   :  { %v2771_v43 = vpack.c.bf16 %v2765_v14, %v2764_v22  ;;  %v2293_v5 = vadd.f32 %v2292_v12, %v2141_v31  ;;  %v2294_v52 = vpop.f32.mrb[49].mxu0  ;;  %v2307_v14 = vmax.f32 %v2305_v25, %v2306_v35 }
 0xc02   :  { %v2770_v50 = vpack.c.bf16 %v2763_v26, %v2762_v15  ;;  %v2295_v32 = vadd.f32 %v2294_v52, %v2145_v16  ;;  %v2296_v36 = vpop.f32.mrb[50].mxu0  ;;  %v5196_v21 = vpop.f32.mrb[40].mxu1  ;;  %v2316_v26 = vmax.f32 %v2314_v11, %v2315_v20  ;;  %v3033_v20 = vld [vmem:[#allocation37 + $0x90] sm:$0xff] }
 0xc03   :  { %v2323_v51 = vmax.f32 %v2283_v17, %v2293_v5  ;;  %v2297_v55 = vadd.f32 %v2296_v36, %v2141_v31  ;;  %v2756_v38 = vadd.f32 %v5196_v21, %v4714_v59  ;;  %v2298_v42 = vpop.f32.mrb[51].mxu0  ;;  %v2747_v61 = vpop.f32.mrb[41].mxu1 }
 0xc04   :  { %v2332_v2 = vmax.f32 %v2285_v33, %v2295_v32  ;;  %v2299_v44 = vadd.f32 %v2298_v42, %v2145_v16  ;;  %v2748_v46 = vadd.f32 %v4714_v59, %v2747_v61  ;;  %v5197_v39 = vpop.f32.mrb[42].mxu1  ;;  %2915 = vmatmul.mubr.bf16.vlgmr.msra.gmra.mrb[52].mxu0 %v2770_v50  ;;  %v2308_v33 = vrot.slane %v2307_v14, 1 }
 0xc05   :  { %v2324_v48 = vmax.f32 %v2287_v37, %v2297_v55  ;;  %v2759_v9 = vadd.f32 %v5197_v39, %v4714_v59  ;;  %v2750_v40 = vpop.f32.mrb[43].mxu1  ;;  %2924 = vmatprep.mubr.bf16.mxu0 %v6680_v1  ;;  %v2768_v31 = vmax.f32 %v2756_v38, 0.0  ;;  %v2317_v32 = vrot.slane %v2316_v26, 1  ;;  %v3032_v39 = vld [vmem:[#allocation37 + $0x88] sm:$0xff] }
 0xc06   :  { %v2333_v3 = vmax.f32 %v2289_v41, %v2299_v44  ;;  %v2751_v63 = vadd.f32 %v4714_v59, %v2750_v40  ;;  %v2766_v22 = vmax.f32 %v2748_v46, 0.0  ;;  %v2309_v37 = vmax.f32 %v2307_v14, %v2308_v33  ;;  %v3031_v46 = vld [vmem:[#allocation37 + $0x80] sm:$0xff] }
 0xc07   :  { %v2325_v23 = vmax.f32 %v2323_v51, %v2324_v48  ;;  %v2769_v24 = vmax.f32 %v2759_v9, 0.0  ;;  %v2318_v55 = vmax.f32 %v2316_v26, %v2317_v32  ;;  %v5383_v35 = vpack.c.bf16 %v3032_v39, %v3031_v46  ;;  %v3015_v48 = vld [vmem:[#allocation37] sm:$0xff]  ;;  %v3016_v9 = vld [vmem:[#allocation37 + $0x8] sm:$0xff]  ;;  %v3037_v26 = vld [vmem:[#allocation37 + $0xb0] sm:$0xff] }
 0xc08   :  { %v2334_v10 = vmax.f32 %v2332_v2, %v2333_v3  ;;  %v2767_v56 = vmax.f32 %v2751_v63, 0.0  ;;  %v2319_v42 = vmul.f32 %v2309_v37, %v7242_v53  ;;  %v5385_v40 = vpack.c.bf16 %v3016_v9, %v3015_v48  ;;  %v3034_v3 = vld [vmem:[#allocation37 + $0x98] sm:$0xff]  ;;  %v3019_v14 = vld [vmem:[#allocation37 + $0x20] sm:$0xff]  ;;  %v3028_v39 = vld [vmem:[#allocation37 + $0x68] sm:$0xff] }
 0xc09   :  { %v2326_v16 = vrot.slane %v2325_v23, 4  ;;  %v2773_v15 = vpack.c.bf16 %v2769_v24, %v2768_v31  ;;  %v2320_v61 = vmul.f32 %v2318_v55, %v7242_v53  ;;  %5384 = vmatprep.subr.bf16.mxu1 %v5383_v35  ;;  %v5387_v63 = vpack.c.bf16 %v3034_v3, %v3033_v20  ;;  %v3018_v31 = vld [vmem:[#allocation37 + $0x18] sm:$0xff]  ;;  %v3027_v46 = vld [vmem:[#allocation37 + $0x60] sm:$0xff]  ;;  %v3045_v48 = vld [vmem:[#allocation37 + $0xf0] sm:$0xff] }
 0xc0a   :  { %v2335_v12 = vrot.slane %v2334_v10, 4  ;;  %v2772_v17 = vpack.c.bf16 %v2767_v56, %v2766_v22  ;;  %5386 = vmatpush3.bf16.msra.mxu1 %v5385_v40  ;;  %v3036_v22 = vld [vmem:[#allocation37 + $0xa8] sm:$0xff]  ;;  %v3042_v55 = vld [vmem:[#allocation37 + $0xd8] sm:$0xff]  ;;  %v5409_v35 = vpack.c.bf16 %v3028_v39, %v3027_v46  ;;  %v3029_v20 = vld [vmem:[#allocation37 + $0x70] sm:$0xff] }
 0xc0b   :  { %v2327_v5 = vmax.f32 %v2325_v23, %v2326_v16  ;;  %v3017_v23 = vld [vmem:[#allocation37 + $0x10] sm:$0xff]  ;;  %5388 = vmatprep.subr.bf16.mxu1 %v5387_v63  ;;  %v3020_v16 = vld [vmem:[#allocation37 + $0x28] sm:$0xff]  ;;  %v3046_v9 = vld [vmem:[#allocation37 + $0xf8] sm:$0xff] }
 0xc0c   :  { %v2336_v52 = vmax.f32 %v2334_v10, %v2335_v12  ;;  %2925 = vmatmul.mubr.bf16.gmra.mrb[56].mxu0 %v2771_v43  ;;  %v5389_v24 = vpack.c.bf16 %v3018_v31, %v3017_v23  ;;  %v3035_v10 = vld [vmem:[#allocation37 + $0xa0] sm:$0xff]  ;;  %v3038_v12 = vld [vmem:[#allocation37 + $0xb8] sm:$0xff]  ;;  %v5411_v40 = vpack.c.bf16 %v3046_v9, %v3045_v48 }
 0xc0d   :  { %v2328_v50 = vrot.slane %v2327_v5, 2  ;;  %2934 = vmatprep.mubr.bf16.mxu0 %v6680_v1  ;;  %v5391_v56 = vpack.c.bf16 %v3036_v22, %v3035_v10  ;;  %v3030_v3 = vld [vmem:[#allocation37 + $0x78] sm:$0xff]  ;;  %v3128_v22 = vld [vmem:[%s7838_s22 + $0x18] sm:$0xff] }
 0xc0e   :  { %v2337_v59 = vrot.slane %v2336_v52, 2  ;;  %5390 = vmatpush3.bf16.msra.mxu1 %v5389_v24  ;;  %v5413_v63 = vpack.c.bf16 %v3030_v3, %v3029_v20  ;;  %v3125_v23 = vld [vmem:[%s7838_s22] sm:$0xff]  ;;  %v3126_v31 = vld [vmem:[%s7838_s22 + $0x8] sm:$0xff]  ;;  %v3127_v24 = vld [vmem:[%s7838_s22 + $0x10] sm:$0xff] }
 0xc0f   :  { %v2329_v36 = vmax.f32 %v2327_v5, %v2328_v50  ;;  %5392 = vmatprep.subr.bf16.mxu1 %v5391_v56  ;;  %v3021_v5 = vld [vmem:[#allocation37 + $0x30] sm:$0xff]  ;;  %v3039_v50 = vld [vmem:[#allocation37 + $0xc0] sm:$0xff]  ;;  %v5416_v10 = vpack.c.bf16 %v3126_v31, %v3125_v23  ;;  %v5419_v56 = vpack.c.bf16 %v3128_v22, %v3127_v24 }
 0xc10   :  { %v2338_v21 = vmax.f32 %v2336_v52, %v2337_v59  ;;  %v3022_v52 = vld [vmem:[#allocation37 + $0x38] sm:$0xff]  ;;  %v3040_v59 = vld [vmem:[#allocation37 + $0xc8] sm:$0xff] }
 0xc11   :  { %v2330_v51 = vrot.slane %v2329_v36, 1  ;;  %v5397_v33 = vpack.c.bf16 %v3022_v52, %v3021_v5  ;;  %v5399_v32 = vpack.c.bf16 %v3040_v59, %v3039_v50  ;;  %5417 = vmatpush3.bf16.msra.mxu0 %v5416_v10  ;;  %v3133_v5 = vld [vmem:[%s7838_s22 + $0x40] sm:$0xff]  ;;  %v3134_v52 = vld [vmem:[%s7838_s22 + $0x48] sm:$0xff]  ;;  %v3135_v50 = vld [vmem:[%s7838_s22 + $0x50] sm:$0xff] }
 0xc12   :  { %v2339_v25 = vrot.slane %v2338_v21, 1  ;;  %5418 = vmatprep.subr.bf16.mxu0 %v6683_v60  ;;  %v3136_v59 = vld [vmem:[%s7838_s22 + $0x58] sm:$0xff] }
 0xc13   :  { %v2331_v38 = vmax.f32 %v2329_v36, %v2330_v51  ;;  %v3023_v36 = vld [vmem:[#allocation37 + $0x40] sm:$0xff]  ;;  %v3041_v51 = vld [vmem:[#allocation37 + $0xd0] sm:$0xff] }
 0xc14   :  { %2935 = vmatmul.mubr.bf16.gmra.mrb[60].mxu0 %v2772_v17  ;;  %v2340_v11 = vmax.f32 %v2338_v21, %v2339_v25  ;;  %v5395_v17 = vpack.c.bf16 %v3038_v12, %v3037_v26  ;;  %v3024_v21 = vld [vmem:[#allocation37 + $0x48] sm:$0xff]  ;;  %v5403_v25 = vpack.c.bf16 %v3042_v55, %v3041_v51 }
 0xc15   :  { %2944 = vmatprep.mubr.bf16.mxu0 %v6680_v1  ;;  %v2341_v43 = vmul.f32 %v2331_v38, %v7245_v54  ;;  %v5401_v37 = vpack.c.bf16 %v3024_v21, %v3023_v36  ;;  %v3025_v38 = vld [vmem:[#allocation37 + $0x50] sm:$0xff]  ;;  %5420 = vmatpush3.bf16.msra.mxu0 %v5419_v56  ;;  %v3131_v26 = vld [vmem:[%s7838_s22 + $0x30] sm:$0xff]  ;;  %v2790_v36 = vld [vmem:[#allocation35] sm:$0x3] }
 0xc16   :  { %v2342_v41 = vmul.f32 %v2340_v11, %v7245_v54  ;;  %v3026_v11 = vld [vmem:[#allocation37 + $0x58] sm:$0xff]  ;;  %5421 = vmatprep.subr.bf16.mxu0 %v6683_v60  ;;  %v3132_v12 = vld [vmem:[%s7838_s22 + $0x38] sm:$0xff]  ;;  %v2795_v55 = vrot.slane %v2790_v36, %v7232_v62 }
 0xc17   :  { %v7477_v2 = vadd.f32 %v2341_v43, %v2319_v42  ;;  %v5405_v42 = vpack.c.bf16 %v3026_v11, %v3025_v38  ;;  %v3043_v43 = vld [vmem:[#allocation37 + $0xe0] sm:$0xff]  ;;  %v2799_v38 = vrot.slane %v2790_v36, %v7235_v6 }
 0xc18   :  { %v7479_v44 = vadd.f32 %v2342_v41, %v2320_v61  ;;  %v3044_v61 = vld [vmem:[#allocation37 + $0xe8] sm:$0xff] }
 0xc19   :  { %v5407_v41 = vpack.c.bf16 %v3044_v61, %v3043_v43 }
 0xc1c   :  { %2945 = vmatmul.mubr.bf16.gmra.mrb[64].mxu0 %v2773_v15  ;;  %v5393_v15 = vpack.c.bf16 %v3020_v16, %v3019_v14  ;;  %v3129_v14 = vld [vmem:[%s7838_s22 + $0x20] sm:$0xff]  ;;  %v3130_v16 = vld [vmem:[%s7838_s22 + $0x28] sm:$0xff] }
 0xc1d   :  { %5230 = vmatprep.mubr.msk.f32.mxu0 %vm6684_vm7, %v6682_v18 }
 0xc1e   :  { %5394 = vmatpush3.bf16.msra.mxu1 %v5393_v15  ;;  %v5422_v15 = vpack.c.bf16 %v3130_v16, %v3129_v14 }
 0xc1f   :  { %5396 = vmatprep.subr.bf16.mxu1 %v5395_v17  ;;  %v5425_v17 = vpack.c.bf16 %v3132_v12, %v3131_v26 }
 0xc20   :  { %5423 = vmatpush3.bf16.msra.mxu0 %v5422_v15 }
 0xc21   :  { %5424 = vmatprep.subr.bf16.mxu0 %v6683_v60 }
 0xc22   :  { %5398 = vmatpush3.bf16.msra.mxu1 %v5397_v33  ;;  %v5428_v33 = vpack.c.bf16 %v3134_v52, %v3133_v5 }
 0xc23   :  { %5400 = vmatprep.subr.bf16.mxu1 %v5399_v32  ;;  %v5431_v32 = vpack.c.bf16 %v3136_v59, %v3135_v50 }
 0xc24   :  { %5426 = vmatpush3.bf16.msra.mxu0 %v5425_v17 }
 0xc25   :  { %5427 = vmatprep.subr.bf16.mxu0 %v6683_v60 }
 0xc26   :  { %5402 = vmatpush3.bf16.msra.mxu1 %v5401_v37 }
 0xc27   :  { %5404 = vmatprep.subr.bf16.mxu1 %v5403_v25 }
 0xc28   :  { %5429 = vmatpush3.bf16.msra.mxu0 %v5428_v33 }
 0xc29   :  { %5430 = vmatprep.subr.bf16.mxu0 %v6683_v60 }
 0xc2a   :  { %5406 = vmatpush3.bf16.msra.mxu1 %v5405_v42 }
 0xc2b   :  { %5408 = vmatprep.subr.bf16.mxu1 %v5407_v41 }
 0xc2c   :  { %5432 = vmatpush3.bf16.msra.mxu0 %v5431_v32 }
 0xc2d   :  { %5433 = vmatprep.subr.bf16.mxu0 %v6683_v60 }
 0xc2e   :  { %5410 = vmatpush3.bf16.msra.mxu1 %v5409_v35 }
 0xc2f   :  { %5412 = vmatprep.subr.bf16.mxu1 %v5411_v40 }
 0xc32   :  { %5414 = vmatpush3.bf16.msra.mxu1 %v5413_v63 }
 0xc33   :  { %5439 = vmatprep.subr.bf16.mxu1 %v6683_v60 }
 0xcd7   :  { %v2916_v21 = vpop.f32.mrb[52].mxu0 }
 0xcd8   :  { %v2918_v37 = vpop.f32.mrb[53].mxu0  ;;  %v2917_v11 = vadd.f32 %v2916_v21, %v2795_v55 }
 0xcd9   :  { %v2920_v51 = vpop.f32.mrb[54].mxu0  ;;  %v2919_v42 = vadd.f32 %v2918_v37, %v2799_v38 }
 0xcda   :  { %v2922_v25 = vpop.f32.mrb[55].mxu0  ;;  %v2921_v61 = vadd.f32 %v2920_v51, %v2795_v55  ;;  %v2955_v9 = vmax.f32 %v2917_v11, 0.0 }
 0xcdb   :  { %v2923_v39 = vadd.f32 %v2922_v25, %v2799_v38  ;;  %v2956_v63 = vmax.f32 %v2919_v42, 0.0 }
 0xcdc   :  { %v2957_v24 = vmax.f32 %v2921_v61, 0.0 }
 0xcdd   :  { %v2958_v56 = vmax.f32 %v2923_v39, 0.0 }
 0xcdf   :  { %v2926_v43 = vpop.f32.mrb[56].mxu0 }
 0xce0   :  { %v2927_v41 = vadd.f32 %v2926_v43, %v2795_v55  ;;  %v2928_v46 = vpop.f32.mrb[57].mxu0 }
 0xce1   :  { %v2929_v35 = vadd.f32 %v2928_v46, %v2799_v38  ;;  %v2930_v48 = vpop.f32.mrb[58].mxu0 }
 0xce2   :  { %v2959_v40 = vmax.f32 %v2927_v41, 0.0  ;;  %v2931_v20 = vadd.f32 %v2930_v48, %v2795_v55  ;;  %v2932_v3 = vpop.f32.mrb[59].mxu0 }
 0xce3   :  { %v2960_v23 = vmax.f32 %v2929_v35, 0.0  ;;  %v2933_v31 = vadd.f32 %v2932_v3, %v2799_v38 }
 0xce4   :  { %v2971_v10 = vmax.f32 %v2955_v9, %v2959_v40  ;;  %v2961_v22 = vmax.f32 %v2931_v20, 0.0 }
 0xce5   :  { %v2980_v14 = vmax.f32 %v2956_v63, %v2960_v23  ;;  %v2962_v16 = vmax.f32 %v2933_v31, 0.0 }
 0xce6   :  { %v2972_v15 = vmax.f32 %v2957_v24, %v2961_v22 }
 0xce7   :  { %v2981_v26 = vmax.f32 %v2958_v56, %v2962_v16  ;;  %v2936_v12 = vpop.f32.mrb[60].mxu0 }
 0xce8   :  { %v2973_v17 = vmax.f32 %v2971_v10, %v2972_v15  ;;  %v2938_v5 = vpop.f32.mrb[61].mxu0  ;;  %v2937_v32 = vadd.f32 %v2936_v12, %v2795_v55 }
 0xce9   :  { %v2982_v52 = vmax.f32 %v2980_v14, %v2981_v26  ;;  %v2940_v33 = vpop.f32.mrb[62].mxu0  ;;  %v2939_v21 = vadd.f32 %v2938_v5, %v2799_v38 }
 0xcea   :  { %v2942_v50 = vpop.f32.mrb[63].mxu0  ;;  %v2974_v59 = vrot.slane %v2973_v17, 4  ;;  %v2941_v51 = vadd.f32 %v2940_v33, %v2795_v55  ;;  %v2963_v46 = vmax.f32 %v2937_v32, 0.0 }
 0xceb   :  { %v2983_v36 = vrot.slane %v2982_v52, 4  ;;  %v2943_v42 = vadd.f32 %v2942_v50, %v2799_v38  ;;  %v2964_v40 = vmax.f32 %v2939_v21, 0.0 }
 0xcec   :  { %v2975_v41 = vmax.f32 %v2973_v17, %v2974_v59  ;;  %v2965_v63 = vmax.f32 %v2941_v51, 0.0 }
 0xced   :  { %v2984_v9 = vmax.f32 %v2982_v52, %v2983_v36  ;;  %v2966_v24 = vmax.f32 %v2943_v42, 0.0 }
 0xcee   :  { %v2976_v56 = vrot.slane %v2975_v41, 2 }
 0xcef   :  { %v2946_v37 = vpop.f32.mrb[64].mxu0  ;;  %v2985_v16 = vrot.slane %v2984_v9, 2 }
 0xcf0   :  { %v2947_v25 = vadd.f32 %v2946_v37, %v2795_v55  ;;  %v2948_v11 = vpop.f32.mrb[65].mxu0  ;;  %v2977_v17 = vmax.f32 %v2975_v41, %v2976_v56 }
 0xcf1   :  { %v2949_v43 = vadd.f32 %v2948_v11, %v2799_v38  ;;  %v2950_v61 = vpop.f32.mrb[66].mxu0 }
 0xcf2   :  { %v2967_v39 = vmax.f32 %v2947_v25, 0.0  ;;  %v2951_v35 = vadd.f32 %v2950_v61, %v2795_v55  ;;  %v2952_v48 = vpop.f32.mrb[67].mxu0  ;;  %v2986_v55 = vmax.f32 %v2984_v9, %v2985_v16  ;;  %v2978_v59 = vrot.slane %v2977_v17, 1 }
 0xcf3   :  { %v2968_v20 = vmax.f32 %v2949_v43, 0.0  ;;  %v2953_v3 = vadd.f32 %v2952_v48, %v2799_v38 }
 0xcf4   :  { %v2993_v23 = vmax.f32 %v2963_v46, %v2967_v39  ;;  %v2969_v31 = vmax.f32 %v2951_v35, 0.0  ;;  %v2987_v36 = vrot.slane %v2986_v55, 1  ;;  %v2979_v51 = vmax.f32 %v2977_v17, %v2978_v59  ;;  %v3225_v59 = vld [vmem:[#allocation41 + $0x30] sm:$0xff] }
 0xcf5   :  { %v3002_v10 = vmax.f32 %v2964_v40, %v2968_v20  ;;  %v2970_v22 = vmax.f32 %v2953_v3, 0.0  ;;  %v3137_v40 = vld [vmem:[%s7838_s22 + $0x60] sm:$0xff]  ;;  %v3138_v20 = vld [vmem:[%s7838_s22 + $0x68] sm:$0xff] }
 0xcf6   :  { %v2994_v14 = vmax.f32 %v2965_v63, %v2969_v31  ;;  %v2988_v11 = vmax.f32 %v2986_v55, %v2987_v36  ;;  %v2989_v41 = vmul.f32 %v2979_v51, %v7242_v53  ;;  %v5434_v3 = vpack.c.bf16 %v3138_v20, %v3137_v40  ;;  %v3139_v63 = vld [vmem:[%s7838_s22 + $0x70] sm:$0xff]  ;;  %v4740_v36 = vld [vmem:[#allocation40] ss:$0 sm:$0xff] }
 0xcf7   :  { %v3003_v15 = vmax.f32 %v2966_v24, %v2970_v22  ;;  %v3219_v24 = vld [vmem:[#allocation41] sm:$0xff]  ;;  %v3221_v22 = vld [vmem:[#allocation41 + $0x10] sm:$0xff] }
 0xcf8   :  { %v2995_v26 = vmax.f32 %v2993_v23, %v2994_v14  ;;  %v2990_v39 = vmul.f32 %v2988_v11, %v7242_v53  ;;  %5435 = vmatpush3.bf16.msra.mxu0 %v5434_v3  ;;  %v3140_v23 = vld [vmem:[%s7838_s22 + $0x78] sm:$0xff]  ;;  %v3222_v14 = vld [vmem:[#allocation41 + $0x18] sm:$0xff]  ;;  %v4741_v11 = vld [vmem:[#allocation43] ss:$0 sm:$0xff] }
 0xcf9   :  { %v3004_v12 = vmax.f32 %v3002_v10, %v3003_v15  ;;  %5436 = vmatprep.subr.bf16.mxu0 %v6683_v60  ;;  %v5437_v31 = vpack.c.bf16 %v3140_v23, %v3139_v63  ;;  %v3220_v10 = vld [vmem:[#allocation41 + $0x8] sm:$0xff]  ;;  %v5443_v16 = vpack.c.bf16 %v3222_v14, %v3221_v22  ;;  %v3223_v15 = vld [vmem:[#allocation41 + $0x20] sm:$0xff] }
 0xcfa   :  { %v2996_v5 = vrot.slane %v2995_v26, 4  ;;  %v5440_v56 = vpack.c.bf16 %v3220_v10, %v3219_v24 }
 0xcfb   :  { %v3005_v33 = vrot.slane %v3004_v12, 4 }
 0xcfc   :  { %v2997_v52 = vmax.f32 %v2995_v26, %v2996_v5  ;;  %5438 = vmatpush3.bf16.msra.mxu0 %v5437_v31  ;;  %v3224_v26 = vld [vmem:[#allocation41 + $0x28] sm:$0xff]  ;;  %v4739_v5 = vld [vmem:[#allocation38] ss:$0 sm:$0xff] }
 0xcfd   :  { %v3006_v50 = vmax.f32 %v3004_v12, %v3005_v33  ;;  %v5446_v12 = vpack.c.bf16 %v3224_v26, %v3223_v15 }
 0xcfe   :  { %v2998_v38 = vrot.slane %v2997_v52, 2 }
 0xcff   :  { %v3007_v32 = vrot.slane %v3006_v50, 2 }
 0xd00   :  { %v2999_v21 = vmax.f32 %v2997_v52, %v2998_v38  ;;  %v3226_v38 = vld [vmem:[#allocation41 + $0x38] sm:$0xff] }
 0xd01   :  { %v3008_v37 = vmax.f32 %v3006_v50, %v3007_v32  ;;  %v5449_v32 = vpack.c.bf16 %v3226_v38, %v3225_v59 }
 0xd02   :  { %v3000_v25 = vrot.slane %v2999_v21, 1 }
 0xd03   :  { %v3009_v42 = vrot.slane %v3008_v37, 1 }
 0xd04   :  { %v3001_v43 = vmax.f32 %v2999_v21, %v3000_v25 }
 0xd05   :  { %v3010_v61 = vmax.f32 %v3008_v37, %v3009_v42 }
 0xd06   :  { %v3011_v46 = vmul.f32 %v3001_v43, %v7245_v54 }
 0xd07   :  { %v3012_v35 = vmul.f32 %v3010_v61, %v7245_v54 }
 0xd08   :  { %v3013_v48 = vadd.f32 %v3011_v46, %v2989_v41 }
 0xd09   :  { %v3014_v9 = vadd.f32 %v3012_v35, %v2990_v39 }
 0xd0b   :  { %3118 = vmatprep.mubr.f32.mxu1 %v3014_v9 }
 0xd0c   :  { %3119 = vmatmul.mubr.f32.vlgmr.msra.gmra.mrb[34].mxu1 %v3013_v48 }
 0xd0d   :  { %5249 = vmatprep.mubr.msk.f32.mxu1 %vm6684_vm7, %v6682_v18  ;;  %5441 = vmatpush3.bf16.msra.mxu1 %v5440_v56 }
 0xd0e   :  { %5442 = vmatprep.subr.bf16.mxu1 %v6683_v60 }
 0xd11   :  { %5444 = vmatpush3.bf16.msra.mxu1 %v5443_v16 }
 0xd12   :  { %5445 = vmatprep.subr.bf16.mxu1 %v6683_v60 }
 0xd15   :  { %5447 = vmatpush3.bf16.msra.mxu1 %v5446_v12 }
 0xd16   :  { %5448 = vmatprep.subr.bf16.mxu1 %v6683_v60 }
 0xd19   :  { %5450 = vmatpush3.bf16.msra.mxu1 %v5449_v32 }
 0xddf   :  { %v4941_v17 = vpop.f32.mrb[34].mxu1 }
 0xde0   :  { %v4942_v55 = vpop.f32.mrb[35].mxu1 }
 0xde1   :  { %v4943_v33 = vadd.f32 %v4942_v55, %v4941_v17 }
 0xde3   :  { %v3121_v52 = vadd.f32 %v4943_v33, %v4739_v5 }
 0xde5   :  { %v3124_v50 = vmax.f32 %v3121_v52, 0.0 }
 0xde7   :  { %5231 = vmatmul.mubr.f32.vlgmr.msra.gmra.mrb[68].mxu0 %v3124_v50 }
 0xde8   :  { %5268 = vmatprep.mubr.msk.f32.mxu0 %vm740_vm3, %v7402_v47 }
 0xeba   :  { %v3214_v21 = vpop.f32.mrb[68].mxu0 }
 0xebb   :  { %v3215_v37 = vadd.f32 %v4740_v36, %v3214_v21  ;;  %v5232_v51 = vpop.f32.mrb[69].mxu0 }
 0xebd   :  { %v3218_v25 = vmax.f32 %v3215_v37, 0.0 }
 0xebf   :  { %5250 = vmatmul.mubr.msk.f32.vlgmr.msra.gmra.mrb[44].mxu1 %vm921_vm4, %v3218_v25 }
 0xec0   :  { %5254 = vmatprep.mubr.msk.f32.mxu1 %vm740_vm3, %v7402_v47 }
 0xf92   :  { %v3303_v42 = vpop.f32.mrb[44].mxu1 }
 0xf93   :  { %v3304_v43 = vadd.f32 %v4741_v11, %v3303_v42  ;;  %v5251_v61 = vpop.f32.mrb[45].mxu1 }
 0xf95   :  { %4544 = vst [vmem:[%s6930_s13] sm:$0x3] %v3304_v43  ;;  %3332 = vperm.xlu0 %5760, %v3304_v43   ;;  %3310 = vperm.xlu1 %5758, %v3304_v43   ;;  %s7840_s13 = sld [smem:[#allocation87_spill]] }
 0xf99   :  { %5763 = vset.pattern.permute.xlu0 %v6686_v27  ;;  %5759 = vset.pattern.permute.xlu1 %v6679_v0  ;;  %v3307_v0 = vld [vmem:[%s7839_s23] sm:$0x7] }
 0xf9a   :  { %3343 = vperm.xlu0 %5763, %v3304_v43   ;;  %3315 = vperm.xlu1 %5759, %v3304_v43   ;;  %v3319_v46 = vrot.slane %v3307_v0, 1  ;;  %v3327_v35 = vrot.slane %v3307_v0, 2 }
 0xf9e   :  { %5766 = vset.pattern.permute.xlu0 %v6687_v28  ;;  %5761 = vset.pattern.permute.xlu1 %v6688_v34  ;;  %v3503_v28 = vrot.slane %v3307_v0, 7 }
 0xf9f   :  { %3360 = vperm.xlu0 %5766, %v3304_v43   ;;  %3337 = vperm.xlu1 %5761, %v3304_v43  }
 0xfa3   :  { %5762 = vset.pattern.permute.xlu1 %v6681_v4 }
 0xfa4   :  { %3324 = vperm.xlu1 %5762, %v3304_v43  }
 0xfa8   :  { %5764 = vset.pattern.permute.xlu1 %v6689_v29 }
 0xfa9   :  { %3349 = vperm.xlu1 %5764, %v3304_v43  }
 0xfad   :  { %5765 = vset.pattern.permute.xlu1 %v6690_v30 }
 0xfae   :  { %3354 = vperm.xlu1 %5765, %v3304_v43  }
0x1014   :  { %v3311_v27 = vpop.permute.xlu1 %3310  ;;  %v3333_v39 = vpop.permute.xlu0 %3332 }
0x1015   :  { %v3313_v20 = vmul.f32 %v3311_v27, %v3307_v0  ;;  %v3505_v3 = vmul.f32 %v3503_v28, %v3311_v27  ;;  %v3335_v23 = vmul.f32 %v3333_v39, %v3307_v0  ;;  %v3510_v30 = vmul.f32 %v3503_v28, %v3333_v39 }
0x1019   :  { %v3316_v47 = vpop.permute.xlu1 %3315  ;;  %v3344_v31 = vpop.permute.xlu0 %3343 }
0x101a   :  { %v3321_v34 = vmul.f32 %v3319_v46, %v3316_v47  ;;  %v3506_v48 = vmul.f32 %v3316_v47, %v3307_v0  ;;  %v3346_v26 = vmul.f32 %v3344_v31, %v3327_v35  ;;  %v3513_v12 = vmul.f32 %v3344_v31, %v3319_v46  ;;  %v5870_v31 = vld [vmem:[#allocation46 + $0x50] ss:$8 sps:$4 sm:$0xff]  }
0x101c   :  { %v3322_v24 = vadd.f32 %v3321_v34, %v3313_v20  ;;  %v3507_v10 = vadd.f32 %v3506_v48, %v3505_v3  ;;  %v5861_v20 = vld [vmem:[#allocation46 + $0x20] ss:$8 sps:$4 sm:$0xff]   ;;  %v5866_v3 = vld [vmem:[#allocation46 + $0x34] ss:$8 sps:$4 sm:$0xff]  }
0x101e   :  { %v3338_v41 = vpop.permute.xlu1 %3337  ;;  %v3361_v17 = vpop.permute.xlu0 %3360 }
0x101f   :  { %v3340_v40 = vmul.f32 %v3338_v41, %v3319_v46  ;;  %v3511_v4 = vmul.f32 %v3338_v41, %v3307_v0  ;;  %v3363_v21 = vmul.f32 %v3361_v17, %v3327_v35  ;;  %v3518_v37 = vmul.f32 %v3361_v17, %v3319_v46 }
0x1021   :  { %v3341_v22 = vadd.f32 %v3340_v40, %v3335_v23  ;;  %v3512_v56 = vadd.f32 %v3511_v4, %v3510_v30  ;;  %v5863_v4 = vld [vmem:[#allocation46 + $0x24] ss:$8 sps:$4 sm:$0xff]   ;;  %v5867_v23 = vld [vmem:[#allocation46 + $0x40] ss:$8 sps:$4 sm:$0xff]   ;;  %v5872_v30 = vld [vmem:[#allocation46 + $0x54] ss:$8 sps:$4 sm:$0xff]  }
0x1023   :  { %v3325_v9 = vpop.permute.xlu1 %3324  ;;  %v3347_v5 = vadd.f32 %v3346_v26, %v3341_v22  ;;  %v3514_v55 = vadd.f32 %v3513_v12, %v3512_v56 }
0x1024   :  { %v3329_v29 = vmul.f32 %v3327_v35, %v3325_v9  ;;  %v3508_v63 = vmul.f32 %v3325_v9, %v3319_v46 }
0x1025   :  { %v3373_v51 = vrot.slane %v3347_v5, %v7232_v62  ;;  %v3528_v25 = vrot.slane %v3514_v55, %v7235_v6 }
0x1026   :  { %v3330_v16 = vadd.f32 %v3329_v29, %v3322_v24  ;;  %v3509_v15 = vadd.f32 %v3508_v63, %v3507_v10  ;;  %v5864_v29 = vld [vmem:[#allocation46 + $0x30] ss:$8 sps:$4 sm:$0xff]   ;;  %v5869_v63 = vld [vmem:[#allocation46 + $0x44] ss:$8 sps:$4 sm:$0xff]  }
0x1028   :  { %v3350_v14 = vpop.permute.xlu1 %3349  ;;  %v3368_v33 = vrot.slane %v3330_v16, %v7232_v62  ;;  %v3523_v52 = vrot.slane %v3509_v15, %v7235_v6  ;;  %v4759_v16 = vld [vmem:[%s7840_s13] ss:$0 sm:$0xff] }
0x1029   :  { %v3352_v59 = vmul.f32 %v3350_v14, %v3307_v0  ;;  %v3515_v38 = vmul.f32 %v3503_v28, %v3350_v14 }
0x102a   :  { %v3369_v43 = vmul.f32 %v3368_v33, %v7242_v53  ;;  %v3524_v61 = vmul.f32 %v3523_v52, %v7242_v53 }
0x102d   :  { %v3355_v50 = vpop.permute.xlu1 %3354 }
0x102e   :  { %v3357_v32 = vmul.f32 %v3355_v50, %v3319_v46  ;;  %v3516_v36 = vmul.f32 %v3355_v50, %v3307_v0  ;;  %v3374_v0 = vmul.f32 %v3373_v51, %v7245_v54  ;;  %v3529_v46 = vmul.f32 %v3528_v25, %v7245_v54 }
0x1030   :  { %v3358_v11 = vadd.f32 %v3357_v32, %v3352_v59  ;;  %v3517_v42 = vadd.f32 %v3516_v36, %v3515_v38  ;;  %v3375_v28 = vadd.f32 %v3374_v0, %v3369_v43  ;;  %v3530_v34 = vadd.f32 %v3529_v46, %v3524_v61 }
0x1032   :  { %v3364_v27 = vadd.f32 %v3363_v21, %v3358_v11  ;;  %v3519_v47 = vadd.f32 %v3518_v37, %v3517_v42 }
0x1034   :  { %v3379_v41 = vrot.slane %v3364_v27, %v7232_v62  ;;  %v3534_v39 = vrot.slane %v3519_v47, %v7235_v6 }
0x1036   :  { %v3380_v35 = vmul.f32 %v3379_v41, %v7325_v45  ;;  %v3535_v48 = vmul.f32 %v3534_v39, %v7325_v45  ;;  %v5851_v45 = vld [vmem:[#allocation44] sm:$0xff]  }
0x1038   :  { %v3381_v9 = vadd.f32 %v3380_v35, %v3375_v28  ;;  %v3536_v40 = vadd.f32 %v3535_v48, %v3530_v34 }
0x103a   :  { %5252 = vmatprep.subr.mxu1 %v3381_v9  ;;  %5266 = vmatprep.subr.mxu0 %v3536_v40 }
0x103b   :  { %5253 = vmatpush3.msra.mxu1 %v3381_v9  ;;  %5267 = vmatpush3.msra.mxu0 %v3536_v40 }
0x103c   :  { %5255 = vmatmul.mubr.msk.f32.vlgmr.msra.gmra.mrb[46].mxu1 %vm740_vm3, %v7420_v57  ;;  %5269 = vmatmul.mubr.msk.f32.vlgmr.msra.gmra.mrb[70].mxu0 %vm740_vm3, %v7420_v57  ;;  %v5852_v57 = vld [vmem:[#allocation44 + $0x8] sm:$0xff]  }
0x103d   :  { %5257 = vmatprep.mubr.msk.f32.mxu1 %vm740_vm3, %v7422_v58  ;;  %5271 = vmatprep.mubr.msk.f32.mxu0 %vm740_vm3, %v7422_v58  ;;  %v5853_v58 = vld [vmem:[#allocation44 + $0x10] sm:$0xff]  }
0x103e   :  { %5280 = vmatprep.subr.bf16.mxu1 %v5851_v45 }
0x103f   :  { %5281 = vmatpush3.bf16.msra.mxu1 %v5851_v45 }
0x1040   :  { %5258 = vmatmul.mubr.msk.f32.gmra.mrb[48].mxu1 %vm740_vm3, %v7432_v7  ;;  %5272 = vmatmul.mubr.msk.f32.gmra.mrb[72].mxu0 %vm740_vm3, %v7432_v7  ;;  %v5854_v7 = vld [vmem:[#allocation44 + $0x18] sm:$0xff]  }
0x1041   :  { %5260 = vmatprep.mubr.msk.f32.mxu1 %vm740_vm3, %v7439_v49  ;;  %5274 = vmatprep.mubr.msk.f32.mxu0 %vm740_vm3, %v7439_v49  ;;  %v5855_v49 = vld [vmem:[#allocation46] ss:$8 sps:$4 sm:$0xff]  }
0x1042   :  { %5282 = vmatprep.subr.bf16.mxu1 %v5852_v57 }
0x1043   :  { %5283 = vmatpush3.bf16.msra.mxu1 %v5852_v57 }
0x1044   :  { %5261 = vmatmul.mubr.msk.f32.gmra.mrb[50].mxu1 %vm740_vm3, %v7446_v8  ;;  %5275 = vmatmul.mubr.msk.f32.gmra.mrb[74].mxu0 %vm740_vm3, %v7446_v8  ;;  %v5857_v8 = vld [vmem:[#allocation46 + $0x4] ss:$8 sps:$4 sm:$0xff]  }
0x1045   :  { %5263 = vmatprep.mubr.msk.f32.mxu1 %vm740_vm3, %v7449_v13  ;;  %5277 = vmatprep.mubr.msk.f32.mxu0 %vm740_vm3, %v7449_v13  ;;  %v5860_v13 = vld [vmem:[#allocation46 + $0x14] ss:$8 sps:$4 sm:$0xff]  }
0x1046   :  { %5284 = vmatprep.subr.bf16.mxu1 %v5853_v58  ;;  %3921 = vmatprep.subr.bf16.mxu0 %v5857_v8 }
0x1047   :  { %5285 = vmatpush3.bf16.msra.mxu1 %v5853_v58  ;;  %3922 = vmatpush1.bf16.msra.mxu0 %v5855_v49 }
0x1048   :  { %5264 = vmatmul.mubr.msk.f32.gmra.mrb[52].mxu1 %vm740_vm3, %v7455_v19  ;;  %5278 = vmatmul.mubr.msk.f32.gmra.mrb[76].mxu0 %vm740_vm3, %v7455_v19  ;;  %v5858_v19 = vld [vmem:[#allocation46 + $0x10] ss:$8 sps:$4 sm:$0xff]  }
0x1049   :  { %3953 = vmatprep.mubr.bf16.mxu0 %v6680_v1  ;;  %5286 = vmatprep.subr.bf16.mxu1 %v5854_v7 }
0x104a   :  { %3923 = vmatprep.subr.bf16.mxu0 %v5860_v13 }
0x104b   :  { %5287 = vmatpush3.bf16.msra.mxu1 %v5854_v7  ;;  %3924 = vmatpush1.bf16.msra.mxu0 %v5858_v19 }
0x104c   :  { %3925 = vmatprep.subr.bf16.mxu0 %v5863_v4 }
0x104f   :  { %3926 = vmatpush1.bf16.msra.mxu0 %v5861_v20 }
0x1050   :  { %3927 = vmatprep.subr.bf16.mxu0 %v5866_v3 }
0x1053   :  { %3928 = vmatpush1.bf16.msra.mxu0 %v5864_v29 }
0x1054   :  { %3929 = vmatprep.subr.bf16.mxu0 %v5869_v63 }
0x1057   :  { %3930 = vmatpush1.bf16.msra.mxu0 %v5867_v23 }
0x1058   :  { %3931 = vmatprep.subr.bf16.mxu0 %v5872_v30  ;;  %v5875_v30 = vld [vmem:[#allocation46 + $0x64] ss:$8 sps:$4 sm:$0xff]  }
0x105b   :  { %3932 = vmatpush1.bf16.msra.mxu0 %v5870_v31  ;;  %v5873_v31 = vld [vmem:[#allocation46 + $0x60] ss:$8 sps:$4 sm:$0xff]  }
0x105c   :  { %3933 = vmatprep.subr.bf16.mxu0 %v5875_v30 }
0x105f   :  { %3934 = vmatpush1.bf16.msra.mxu0 %v5873_v31 }
0x110f   :  { %v5256_v24 = vpop.f32.mrb[46].mxu1  ;;  %v5270_v10 = vpop.f32.mrb[70].mxu0 }
0x1110   :  { %v3643_v22 = vmul.f32 0.0, %v5270_v10  ;;  %v3448_v56 = vpop.f32.mrb[47].mxu1  ;;  %v3603_v14 = vpop.f32.mrb[71].mxu0  ;;  %v5876_v10 = vld [vmem:[#allocation46 + $0x70] ss:$8 sps:$4 sm:$0xff]  }
0x1111   :  { %v3642_v15 = vmul.f32 0.0, %v3603_v14  ;;  %v4102_v14 = vld [vmem:[%s7841_s20] sm:$0xff] }
0x1112   :  { %v3651_v26 = vadd.f32 %v5256_v24, %v3643_v22  ;;  %v5878_v24 = vld [vmem:[#allocation46 + $0x74] ss:$8 sps:$4 sm:$0xff]  }
0x1113   :  { %v3650_v12 = vadd.f32 %v3642_v15, %v3448_v56  ;;  %v5259_v17 = vpop.f32.mrb[48].mxu1  ;;  %v5273_v5 = vpop.f32.mrb[72].mxu0  ;;  %3935 = vmatprep.subr.bf16.mxu0 %v5878_v24  ;;  %v4103_v22 = vld [vmem:[%s7841_s20 + $0x8] sm:$0xff]  ;;  %v4105_v56 = vld [vmem:[%s7841_s20 + $0x18] sm:$0xff]  ;;  %v4104_v15 = vld [vmem:[%s7841_s20 + $0x10] sm:$0xff] }
0x1114   :  { %v3666_v55 = vadd.f32 %v4759_v16, %v3651_v26  ;;  %v3645_v33 = vmul.f32 0.0, %v5273_v5  ;;  %v3458_v52 = vpop.f32.mrb[49].mxu1  ;;  %v3613_v50 = vpop.f32.mrb[73].mxu0  ;;  %3936 = vmatpush1.bf16.msra.mxu0 %v5876_v10  ;;  %v4107_v26 = vld [vmem:[%s7841_s20 + $0x28] sm:$0xff]  ;;  %v4121_v10 = vld [vmem:[%s7841_s20 + $0x98] sm:$0xff] }
0x1115   :  { %v3665_v59 = vadd.f32 %v4759_v16, %v3650_v12  ;;  %v3644_v38 = vmul.f32 0.0, %v3613_v50  ;;  %v4109_v12 = vld [vmem:[%s7841_s20 + $0x38] sm:$0xff]  ;;  %v4119_v24 = vld [vmem:[%s7841_s20 + $0x88] sm:$0xff] }
0x1116   :  { %v3674_v32 = vmax.f32 %v3666_v55, 0.0  ;;  %v3653_v36 = vadd.f32 %v5259_v17, %v3645_v33  ;;  %v5453_v17 = vpack.c.bf16 %v4104_v15, %v4102_v14  ;;  %v5455_v5 = vpack.c.bf16 %v4109_v12, %v4107_v26  ;;  %v4106_v55 = vld [vmem:[%s7841_s20 + $0x20] sm:$0xff]  ;;  %v4108_v33 = vld [vmem:[%s7841_s20 + $0x30] sm:$0xff]  ;;  %v4113_v50 = vld [vmem:[%s7841_s20 + $0x58] sm:$0xff] }
0x1117   :  { %v3673_v21 = vmax.f32 %v3665_v59, 0.0  ;;  %v3652_v37 = vadd.f32 %v3644_v38, %v3458_v52  ;;  %v5262_v51 = vpop.f32.mrb[50].mxu1  ;;  %v5276_v25 = vpop.f32.mrb[74].mxu0  ;;  %v4111_v52 = vld [vmem:[%s7841_s20 + $0x48] sm:$0xff]  ;;  %v5457_v59 = vpack.c.bf16 %v4108_v33, %v4106_v55  ;;  %v4120_v14 = vld [vmem:[%s7841_s20 + $0x90] sm:$0xff]  ;;  %v4125_v26 = vld [vmem:[%s7841_s20 + $0xb8] sm:$0xff] }
0x1118   :  { %v3668_v11 = vadd.f32 %v4759_v16, %v3653_v36  ;;  %v3492_v42 = vmul.f32 0.0, %v5262_v51  ;;  %v3468_v43 = vpop.f32.mrb[51].mxu1  ;;  %v3623_v61 = vpop.f32.mrb[75].mxu0  ;;  %v5459_v38 = vpack.c.bf16 %v4113_v50, %v4111_v52  ;;  %v4112_v36 = vld [vmem:[%s7841_s20 + $0x50] sm:$0xff]  ;;  %v4123_v15 = vld [vmem:[%s7841_s20 + $0xa8] sm:$0xff]  ;;  %v4129_v33 = vld [vmem:[%s7841_s20 + $0xd8] sm:$0xff] }
0x1119   :  { %v3681_v27 = vpack.c.bf16 %v3674_v32, %v3673_v21  ;;  %v3667_v47 = vadd.f32 %v4759_v16, %v3652_v37  ;;  %v3491_v41 = vmul.f32 0.0, %v3468_v43  ;;  %v4110_v32 = vld [vmem:[%s7841_s20 + $0x40] sm:$0xff]  ;;  %v4115_v21 = vld [vmem:[%s7841_s20 + $0x68] sm:$0xff]  ;;  %v4117_v37 = vld [vmem:[%s7841_s20 + $0x78] sm:$0xff]  ;;  %v5471_v12 = vpack.c.bf16 %v4125_v26, %v4123_v15 }
0x111a   :  { %v3676_v39 = vmax.f32 %v3668_v11, 0.0  ;;  %v3655_v0 = vadd.f32 %v5276_v25, %v3492_v42  ;;  %v5461_v51 = vpack.c.bf16 %v4112_v36, %v4110_v32  ;;  %v5463_v25 = vpack.c.bf16 %v4117_v37, %v4115_v21  ;;  %v4114_v11 = vld [vmem:[%s7841_s20 + $0x60] sm:$0xff]  ;;  %v4116_v42 = vld [vmem:[%s7841_s20 + $0x70] sm:$0xff]  ;;  %v4127_v55 = vld [vmem:[%s7841_s20 + $0xc8] sm:$0xff] }
0x111b   :  { %v3675_v46 = vmax.f32 %v3667_v47, 0.0  ;;  %v3654_v28 = vadd.f32 %v3623_v61, %v3491_v41  ;;  %v5265_v35 = vpop.f32.mrb[52].mxu1  ;;  %v5279_v34 = vpop.f32.mrb[76].mxu0  ;;  %5288 = vmatprep.mubr.msk.bf16.mxu1 %vm921_vm4, %v3681_v27  ;;  %v5465_v43 = vpack.c.bf16 %v4116_v42, %v4114_v11  ;;  %v4760_v61 = vld [vmem:[%s7842_s10] ss:$0 sm:$0xff]  ;;  %v5475_v52 = vpack.c.bf16 %v4129_v33, %v4127_v55  ;;  %v4131_v32 = vld [vmem:[%s7841_s20 + $0xe8] sm:$0xff] }
0x111c   :  { %v3670_v48 = vadd.f32 %v4759_v16, %v3655_v0  ;;  %v3494_v9 = vmul.f32 0.0, %v5265_v35  ;;  %v3478_v40 = vpop.f32.mrb[53].mxu1  ;;  %v3633_v45 = vpop.f32.mrb[77].mxu0  ;;  %v4126_v50 = vld [vmem:[%s7841_s20 + $0xc0] sm:$0xff]  ;;  %v4133_v36 = vld [vmem:[%s7841_s20 + $0xf8] sm:$0xff]  ;;  %v4135_v11 = vld [vmem:[%s7841_s20 + $0x108] sm:$0xff] }
0x111d   :  { %v3682_v57 = vpack.c.bf16 %v3676_v39, %v3675_v46  ;;  %v3669_v58 = vadd.f32 %v4759_v16, %v3654_v28  ;;  %v3493_v7 = vmul.f32 0.0, %v3478_v40  ;;  %v5479_v21 = vpack.c.bf16 %v4133_v36, %v4131_v32  ;;  %v4130_v37 = vld [vmem:[%s7841_s20 + $0xe0] sm:$0xff]  ;;  %v4137_v42 = vld [vmem:[%s7841_s20 + $0x118] sm:$0xff] }
0x111e   :  { %v3678_v49 = vmax.f32 %v3670_v48, 0.0  ;;  %v3657_v8 = vadd.f32 %v5279_v34, %v3494_v9  ;;  %v4158_v26 = vld [vmem:[%s7841_s20 + $0x1c0] sm:$0xff] }
0x111f   :  { %v3677_v13 = vmax.f32 %v3669_v58, 0.0  ;;  %v3656_v19 = vadd.f32 %v3633_v45, %v3493_v7  ;;  %5289 = vmatmul.mubr.msk.bf16.vlgmr.msra.gmra.mrb[56].mxu1 %vm921_vm4, %v3682_v57  ;;  %v4162_v33 = vld [vmem:[%s7841_s20 + $0x1e0] sm:$0xff] }
0x1120   :  { %v3672_v4 = vadd.f32 %v4759_v16, %v3657_v8  ;;  %v4340_v36 = vld [vmem:[%s7844_s12 + $0x80] sm:$0xff] }
0x1121   :  { %v3683_v20 = vpack.c.bf16 %v3678_v49, %v3677_v13  ;;  %v3671_v3 = vadd.f32 %v4759_v16, %v3656_v19  ;;  %v5451_v16 = vpack.c.bf16 %v4105_v56, %v4103_v22  ;;  %v5467_v22 = vpack.c.bf16 %v4121_v10, %v4119_v24  ;;  %v4118_v56 = vld [vmem:[%s7841_s20 + $0x80] sm:$0xff] }
0x1122   :  { %v3680_v29 = vmax.f32 %v3672_v4, 0.0  ;;  %v4154_v10 = vld [vmem:[%s7841_s20 + $0x1a0] sm:$0xff] }
0x1123   :  { %v3679_v63 = vmax.f32 %v3671_v3, 0.0  ;;  %5292 = vmatprep.mubr.msk.bf16.mxu1 %vm921_vm4, %v3683_v20  ;;  %5452 = vmatprep.subr.bf16.mxu1 %v5451_v16  ;;  %v5469_v16 = vpack.c.bf16 %v4120_v14, %v4118_v56  ;;  %v4159_v14 = vld [vmem:[%s7841_s20 + $0x1c8] sm:$0xff] }
0x1124   :  { %5454 = vmatpush1.bf16.msra.mxu1 %v5453_v17  ;;  %v4122_v17 = vld [vmem:[%s7841_s20 + $0xa0] sm:$0xff] }
0x1125   :  { %v3684_v23 = vpack.c.bf16 %v3680_v29, %v3679_v63  ;;  %5456 = vmatprep.subr.bf16.mxu1 %v5455_v5 }
0x1127   :  { %5293 = vmatmul.mubr.msk.bf16.gmra.mrb[60].mxu1 %vm921_vm4, %v3684_v23 }
0x1128   :  { %5458 = vmatpush1.bf16.msra.mxu1 %v5457_v59  ;;  %v4128_v59 = vld [vmem:[%s7841_s20 + $0xd0] sm:$0xff] }
0x1129   :  { %5460 = vmatprep.subr.bf16.mxu1 %v5459_v38  ;;  %v5477_v38 = vpack.c.bf16 %v4128_v59, %v4126_v50  ;;  %v4039_v59 = vld [vmem:[%s7843_s11 + $0x8] sm:$0xff] }
0x112c   :  { %5462 = vmatpush1.bf16.msra.mxu1 %v5461_v51  ;;  %v4132_v51 = vld [vmem:[%s7841_s20 + $0xf0] sm:$0xff] }
0x112d   :  { %5464 = vmatprep.subr.bf16.mxu1 %v5463_v25  ;;  %v5481_v25 = vpack.c.bf16 %v4132_v51, %v4130_v37  ;;  %v4324_v37 = vld [vmem:[%s7844_s12] sm:$0xff] }
0x1130   :  { %5466 = vmatpush1.bf16.msra.mxu1 %v5465_v43  ;;  %v5483_v43 = vpack.c.bf16 %v4137_v42, %v4135_v11  ;;  %v4342_v11 = vld [vmem:[%s7844_s12 + $0x90] sm:$0xff]  ;;  %v4343_v42 = vld [vmem:[%s7844_s12 + $0x98] sm:$0xff] }
0x1131   :  { %5468 = vmatprep.subr.bf16.mxu1 %v5467_v22  ;;  %v4156_v22 = vld [vmem:[%s7841_s20 + $0x1b0] sm:$0xff] }
0x1132   :  { %v5505_v56 = vpack.c.bf16 %v4156_v22, %v4154_v10  ;;  %v4334_v10 = vld [vmem:[%s7844_s12 + $0x50] sm:$0xff]  ;;  %v4335_v22 = vld [vmem:[%s7844_s12 + $0x58] sm:$0xff] }
0x1134   :  { %5470 = vmatpush1.bf16.msra.mxu1 %v5469_v16  ;;  %v4161_v16 = vld [vmem:[%s7841_s20 + $0x1d8] sm:$0xff] }
0x1135   :  { %5472 = vmatprep.subr.bf16.mxu1 %v5471_v12  ;;  %v5507_v15 = vpack.c.bf16 %v4161_v16, %v4159_v14  ;;  %v4160_v12 = vld [vmem:[%s7841_s20 + $0x1d0] sm:$0xff]  ;;  %v4352_v14 = vld [vmem:[%s7844_s12 + $0xe0] sm:$0xff]  ;;  %v4353_v16 = vld [vmem:[%s7844_s12 + $0xe8] sm:$0xff] }
0x11f2   :  { %v5290_v27 = vpop.f32.mrb[56].mxu1 }
0x11f3   :  { %v3779_v47 = vadd.f32 %v5290_v27, %v4760_v61  ;;  %v3770_v41 = vpop.f32.mrb[57].mxu1  ;;  %v4136_v27 = vld [vmem:[%s7841_s20 + $0x110] sm:$0xff] }
0x11f4   :  { %v3771_v39 = vadd.f32 %v4760_v61, %v3770_v41  ;;  %v5291_v0 = vpop.f32.mrb[58].mxu1  ;;  %v4139_v41 = vld [vmem:[%s7841_s20 + $0x128] sm:$0xff] }
0x11f5   :  { %v3782_v46 = vadd.f32 %v5291_v0, %v4760_v61  ;;  %v3773_v28 = vpop.f32.mrb[59].mxu1  ;;  %v3803_v34 = vmax.f32 %v3779_v47, 0.0 }
0x11f6   :  { %v3774_v35 = vadd.f32 %v4760_v61, %v3773_v28  ;;  %v3801_v9 = vmax.f32 %v3771_v39, 0.0  ;;  %v4141_v39 = vld [vmem:[%s7841_s20 + $0x138] sm:$0xff]  ;;  %v4140_v28 = vld [vmem:[%s7841_s20 + $0x130] sm:$0xff] }
0x11f7   :  { %v3804_v48 = vmax.f32 %v3782_v46, 0.0  ;;  %v5487_v0 = vpack.c.bf16 %v4141_v39, %v4139_v41  ;;  %v4138_v46 = vld [vmem:[%s7841_s20 + $0x120] sm:$0xff]  ;;  %v4345_v39 = vld [vmem:[%s7844_s12 + $0xa8] sm:$0xff] }
0x11f8   :  { %v3802_v40 = vmax.f32 %v3774_v35, 0.0  ;;  %v5489_v35 = vpack.c.bf16 %v4140_v28, %v4138_v46  ;;  %v4344_v41 = vld [vmem:[%s7844_s12 + $0xa0] sm:$0xff] }
0x11f9   :  { %v3810_v45 = vpack.c.bf16 %v3804_v48, %v3803_v34  ;;  %v4143_v34 = vld [vmem:[%s7841_s20 + $0x148] sm:$0xff]  ;;  %v4145_v48 = vld [vmem:[%s7841_s20 + $0x158] sm:$0xff]  ;;  %v5587_v46 = vpack.c.bf16 %v4345_v39, %v4344_v41  ;;  %v4328_v28 = vld [vmem:[%s7844_s12 + $0x20] sm:$0xff] }
0x11fa   :  { %v3809_v57 = vpack.c.bf16 %v3802_v40, %v3801_v9  ;;  %v5294_v58 = vpop.f32.mrb[60].mxu1  ;;  %v5491_v9 = vpack.c.bf16 %v4145_v48, %v4143_v34  ;;  %v4142_v40 = vld [vmem:[%s7841_s20 + $0x140] sm:$0xff]  ;;  %v4346_v34 = vld [vmem:[%s7844_s12 + $0xb0] sm:$0xff]  ;;  %v4347_v48 = vld [vmem:[%s7844_s12 + $0xb8] sm:$0xff] }
0x11fb   :  { %v3795_v7 = vadd.f32 %v5294_v58, %v4760_v61  ;;  %v3786_v49 = vpop.f32.mrb[61].mxu1  ;;  %v4147_v58 = vld [vmem:[%s7841_s20 + $0x168] sm:$0xff] }
0x11fc   :  { %v3787_v8 = vadd.f32 %v4760_v61, %v3786_v49  ;;  %v5295_v13 = vpop.f32.mrb[62].mxu1  ;;  %3954 = vmatmul.mubr.bf16.vlgmr.msra.gmra.mrb[80].mxu0 %v3809_v57 }
0x11fd   :  { %v3798_v19 = vadd.f32 %v5295_v13, %v4760_v61  ;;  %v3789_v4 = vpop.f32.mrb[63].mxu1  ;;  %3963 = vmatprep.mubr.bf16.mxu0 %v6680_v1  ;;  %v3807_v3 = vmax.f32 %v3795_v7, 0.0  ;;  %v4149_v7 = vld [vmem:[%s7841_s20 + $0x178] sm:$0xff]  ;;  %v4148_v13 = vld [vmem:[%s7841_s20 + $0x170] sm:$0xff] }
0x11fe   :  { %v3790_v20 = vadd.f32 %v4760_v61, %v3789_v4  ;;  %v3805_v63 = vmax.f32 %v3787_v8, 0.0  ;;  %v4134_v61 = vld [vmem:[%s7841_s20 + $0x100] sm:$0xff]  ;;  %v5495_v49 = vpack.c.bf16 %v4149_v7, %v4147_v58  ;;  %v4151_v4 = vld [vmem:[%s7841_s20 + $0x188] sm:$0xff] }
0x11ff   :  { %v3808_v29 = vmax.f32 %v3798_v19, 0.0  ;;  %v5485_v47 = vpack.c.bf16 %v4136_v27, %v4134_v61  ;;  %v4146_v8 = vld [vmem:[%s7841_s20 + $0x160] sm:$0xff]  ;;  %v5583_v61 = vpack.c.bf16 %v4343_v42, %v4342_v11  ;;  %v4326_v27 = vld [vmem:[%s7844_s12 + $0x10] sm:$0xff]  ;;  %v4349_v7 = vld [vmem:[%s7844_s12 + $0xc8] sm:$0xff] }
0x1200   :  { %v3806_v23 = vmax.f32 %v3790_v20, 0.0  ;;  %v5497_v19 = vpack.c.bf16 %v4148_v13, %v4146_v8  ;;  %v4153_v20 = vld [vmem:[%s7841_s20 + $0x198] sm:$0xff]  ;;  %v4348_v58 = vld [vmem:[%s7844_s12 + $0xc0] sm:$0xff] }
0x1201   :  { %v3812_v30 = vpack.c.bf16 %v3808_v29, %v3807_v3  ;;  %v5499_v3 = vpack.c.bf16 %v4153_v20, %v4151_v4  ;;  %v4150_v29 = vld [vmem:[%s7841_s20 + $0x180] sm:$0xff]  ;;  %v5595_v13 = vpack.c.bf16 %v4349_v7, %v4348_v58  ;;  %v4333_v4 = vld [vmem:[%s7844_s12 + $0x48] sm:$0xff] }
0x1202   :  { %v3811_v31 = vpack.c.bf16 %v3806_v23, %v3805_v63  ;;  %v4152_v63 = vld [vmem:[%s7841_s20 + $0x190] sm:$0xff] }
0x1203   :  { %v5501_v23 = vpack.c.bf16 %v4152_v63, %v4150_v29  ;;  %v4351_v29 = vld [vmem:[%s7844_s12 + $0xd8] sm:$0xff]  ;;  %v3829_v63 = vld [vmem:[%s7845_s0] sm:$0x3] }
0x1204   :  { %3964 = vmatmul.mubr.bf16.gmra.mrb[84].mxu0 %v3810_v45  ;;  %v4144_v45 = vld [vmem:[%s7841_s20 + $0x150] sm:$0xff] }
0x1205   :  { %3973 = vmatprep.mubr.bf16.mxu0 %v6680_v1  ;;  %v5493_v57 = vpack.c.bf16 %v4144_v45, %v4142_v40  ;;  %v5591_v40 = vpack.c.bf16 %v4347_v48, %v4346_v34  ;;  %v4330_v45 = vld [vmem:[%s7844_s12 + $0x30] sm:$0xff] }
0x120c   :  { %3974 = vmatmul.mubr.bf16.gmra.mrb[88].mxu0 %v3811_v31  ;;  %v4157_v31 = vld [vmem:[%s7841_s20 + $0x1b8] sm:$0xff] }
0x120d   :  { %3983 = vmatprep.mubr.bf16.mxu0 %v6680_v1  ;;  %v4124_v1 = vld [vmem:[%s7841_s20 + $0xb0] sm:$0xff] }
0x120e   :  { %v5473_v5 = vpack.c.bf16 %v4124_v1, %v4122_v17  ;;  %v5509_v17 = vpack.c.bf16 %v4160_v12, %v4158_v26  ;;  %v4163_v1 = vld [vmem:[%s7841_s20 + $0x1e8] sm:$0xff]  ;;  %v5601_v26 = vpack.c.bf16 %v4335_v22, %v4334_v10 }
0x1210   :  { %5474 = vmatpush1.bf16.msra.mxu1 %v5473_v5  ;;  %v4165_v5 = vld [vmem:[%s7841_s20 + $0x1f8] sm:$0xff] }
0x1211   :  { %5476 = vmatprep.subr.bf16.mxu1 %v5475_v52  ;;  %v5511_v55 = vpack.c.bf16 %v4165_v5, %v4163_v1  ;;  %v4164_v52 = vld [vmem:[%s7841_s20 + $0x1f0] sm:$0xff] }
0x1212   :  { %v5513_v50 = vpack.c.bf16 %v4164_v52, %v4162_v33 }
0x1214   :  { %3984 = vmatmul.mubr.bf16.gmra.mrb[92].mxu0 %v3812_v30  ;;  %5478 = vmatpush1.bf16.msra.mxu1 %v5477_v38  ;;  %v4155_v30 = vld [vmem:[%s7841_s20 + $0x1a8] sm:$0xff]  ;;  %v4041_v38 = vld [vmem:[%s7843_s11 + $0x18] sm:$0xff] }
0x1215   :  { %5480 = vmatprep.subr.bf16.mxu1 %v5479_v21  ;;  %v5503_v24 = vpack.c.bf16 %v4157_v31, %v4155_v30  ;;  %v5515_v32 = vpack.c.bf16 %v4041_v38, %v4039_v59  ;;  %v4341_v21 = vld [vmem:[%s7844_s12 + $0x88] sm:$0xff] }
0x1216   :  { %v5579_v51 = vpack.c.bf16 %v4341_v21, %v4340_v36 }
0x1218   :  { %5482 = vmatpush1.bf16.msra.mxu1 %v5481_v25  ;;  %v4325_v25 = vld [vmem:[%s7844_s12 + $0x8] sm:$0xff]  ;;  %5580 = vmatprep.subr.bf16.mxu0 %v5579_v51 }
0x1219   :  { %5484 = vmatprep.subr.bf16.mxu1 %v5483_v43  ;;  %v5581_v43 = vpack.c.bf16 %v4325_v25, %v4324_v37 }
0x121b   :  { %5582 = vmatpush3.bf16.msra.mxu0 %v5581_v43 }
0x121c   :  { %5486 = vmatpush1.bf16.msra.mxu1 %v5485_v47  ;;  %v4327_v47 = vld [vmem:[%s7844_s12 + $0x18] sm:$0xff]  ;;  %5584 = vmatprep.subr.bf16.mxu0 %v5583_v61 }
0x121d   :  { %5488 = vmatprep.subr.bf16.mxu1 %v5487_v0  ;;  %v5585_v0 = vpack.c.bf16 %v4327_v47, %v4326_v27 }
0x121f   :  { %5586 = vmatpush3.bf16.msra.mxu0 %v5585_v0 }
0x1220   :  { %5490 = vmatpush1.bf16.msra.mxu1 %v5489_v35  ;;  %v4329_v35 = vld [vmem:[%s7844_s12 + $0x28] sm:$0xff]  ;;  %5588 = vmatprep.subr.bf16.mxu0 %v5587_v46 }
0x1221   :  { %5492 = vmatprep.subr.bf16.mxu1 %v5491_v9  ;;  %v5589_v9 = vpack.c.bf16 %v4329_v35, %v4328_v28 }
0x1223   :  { %5590 = vmatpush3.bf16.msra.mxu0 %v5589_v9 }
0x1224   :  { %5494 = vmatpush1.bf16.msra.mxu1 %v5493_v57  ;;  %v4331_v57 = vld [vmem:[%s7844_s12 + $0x38] sm:$0xff]  ;;  %5592 = vmatprep.subr.bf16.mxu0 %v5591_v40 }
0x1225   :  { %5496 = vmatprep.subr.bf16.mxu1 %v5495_v49  ;;  %v5593_v49 = vpack.c.bf16 %v4331_v57, %v4330_v45 }
0x1227   :  { %5594 = vmatpush3.bf16.msra.mxu0 %v5593_v49 }
0x1228   :  { %5498 = vmatpush1.bf16.msra.mxu1 %v5497_v19  ;;  %v4332_v19 = vld [vmem:[%s7844_s12 + $0x40] sm:$0xff]  ;;  %5596 = vmatprep.subr.bf16.mxu0 %v5595_v13 }
0x1229   :  { %5500 = vmatprep.subr.bf16.mxu1 %v5499_v3  ;;  %v4350_v3 = vld [vmem:[%s7844_s12 + $0xd0] sm:$0xff]  ;;  %v5597_v31 = vpack.c.bf16 %v4333_v4, %v4332_v19 }
0x122b   :  { %5598 = vmatpush3.bf16.msra.mxu0 %v5597_v31 }
0x122c   :  { %5502 = vmatpush1.bf16.msra.mxu1 %v5501_v23 }
0x122d   :  { %5504 = vmatprep.subr.bf16.mxu1 %v5503_v24  ;;  %v5599_v24 = vpack.c.bf16 %v4351_v29, %v4350_v3 }
0x122f   :  { %5600 = vmatprep.subr.bf16.mxu0 %v5599_v24 }
0x1230   :  { %5506 = vmatpush1.bf16.msra.mxu1 %v5505_v56  ;;  %v3834_v56 = vrot.slane %v3829_v63, %v7232_v62  ;;  %5602 = vmatpush3.bf16.msra.mxu0 %v5601_v26 }
0x1231   :  { %5508 = vmatprep.subr.bf16.mxu1 %v5507_v15  ;;  %v3838_v15 = vrot.slane %v3829_v63, %v7235_v6 }
0x1234   :  { %5510 = vmatpush1.bf16.msra.mxu1 %v5509_v17  ;;  %v5603_v17 = vpack.c.bf16 %v4353_v16, %v4352_v14 }
0x1235   :  { %5512 = vmatprep.subr.bf16.mxu1 %v5511_v55 }
0x1236   :  { %5604 = vmatprep.subr.bf16.mxu0 %v5603_v17 }
0x1238   :  { %5514 = vmatpush1.bf16.msra.mxu1 %v5513_v50 }
0x1239   :  { %5516 = vmatprep.subr.bf16.mxu1 %v5515_v32 }
0x12cf   :  { %v3955_v8 = vpop.f32.mrb[80].mxu0 }
0x12d0   :  { %v3957_v20 = vpop.f32.mrb[81].mxu0  ;;  %v3956_v1 = vadd.f32 %v3955_v8, %v3834_v56 }
0x12d1   :  { %v3959_v23 = vpop.f32.mrb[82].mxu0  ;;  %v3958_v33 = vadd.f32 %v3957_v20, %v3838_v15 }
0x12d2   :  { %v3961_v30 = vpop.f32.mrb[83].mxu0  ;;  %v3960_v59 = vadd.f32 %v3959_v23, %v3834_v56 }
0x12d3   :  { %v3962_v21 = vadd.f32 %v3961_v30, %v3838_v15 }
0x12d7   :  { %v3965_v12 = vpop.f32.mrb[84].mxu0 }
0x12d8   :  { %v3966_v5 = vadd.f32 %v3965_v12, %v3834_v56  ;;  %v3967_v55 = vpop.f32.mrb[85].mxu0 }
0x12d9   :  { %v3968_v52 = vadd.f32 %v3967_v55, %v3838_v15  ;;  %v3969_v50 = vpop.f32.mrb[86].mxu0 }
0x12da   :  { %v3994_v38 = vmax.f32 %v3956_v1, %v3966_v5  ;;  %v3970_v32 = vadd.f32 %v3969_v50, %v3834_v56  ;;  %v3971_v36 = vpop.f32.mrb[87].mxu0 }
0x12db   :  { %v4003_v37 = vmax.f32 %v3958_v33, %v3968_v52  ;;  %v3972_v51 = vadd.f32 %v3971_v36, %v3838_v15  ;;  %v4038_v36 = vld [vmem:[%s7843_s11] sm:$0xff] }
0x12dc   :  { %v3995_v25 = vmax.f32 %v3960_v59, %v3970_v32 }
0x12dd   :  { %v4004_v11 = vmax.f32 %v3962_v21, %v3972_v51  ;;  %v4040_v21 = vld [vmem:[%s7843_s11 + $0x10] sm:$0xff] }
0x12de   :  { %v3996_v42 = vmax.f32 %v3994_v38, %v3995_v25  ;;  %v4043_v25 = vld [vmem:[%s7843_s11 + $0x28] sm:$0xff] }
0x12df   :  { %v4005_v43 = vmax.f32 %v4003_v37, %v4004_v11  ;;  %v3975_v61 = vpop.f32.mrb[88].mxu0  ;;  %v4045_v11 = vld [vmem:[%s7843_s11 + $0x38] sm:$0xff] }
0x12e0   :  { %v3977_v27 = vpop.f32.mrb[89].mxu0  ;;  %v3997_v39 = vrot.slane %v3996_v42, 4  ;;  %v3976_v35 = vadd.f32 %v3975_v61, %v3834_v56  ;;  %v5517_v61 = vpack.c.bf16 %v4040_v21, %v4038_v36  ;;  %v4076_v36 = vld [vmem:[%s7843_s11 + $0x130] sm:$0xff]  ;;  %v4079_v21 = vld [vmem:[%s7843_s11 + $0x148] sm:$0xff] }
0x12e1   :  { %v3979_v47 = vpop.f32.mrb[90].mxu0  ;;  %v4006_v0 = vrot.slane %v4005_v43, 4  ;;  %v3978_v40 = vadd.f32 %v3977_v27, %v3838_v15  ;;  %v5519_v27 = vpack.c.bf16 %v4045_v11, %v4043_v25  ;;  %v4078_v11 = vld [vmem:[%s7843_s11 + $0x140] sm:$0xff] }
0x12e2   :  { %v3981_v41 = vpop.f32.mrb[91].mxu0  ;;  %v3998_v28 = vmax.f32 %v3996_v42, %v3997_v39  ;;  %v3980_v58 = vadd.f32 %v3979_v47, %v3834_v56  ;;  %v4042_v47 = vld [vmem:[%s7843_s11 + $0x20] sm:$0xff]  ;;  %v4047_v39 = vld [vmem:[%s7843_s11 + $0x48] sm:$0xff] }
0x12e3   :  { %v4007_v9 = vmax.f32 %v4005_v43, %v4006_v0  ;;  %v3982_v13 = vadd.f32 %v3981_v41, %v3838_v15  ;;  %v4044_v41 = vld [vmem:[%s7843_s11 + $0x30] sm:$0xff]  ;;  %v4049_v0 = vld [vmem:[%s7843_s11 + $0x58] sm:$0xff] }
0x12e4   :  { %v3999_v20 = vrot.slane %v3998_v28, 2 }
0x12e5   :  { %v4008_v29 = vrot.slane %v4007_v9, 2 }
0x12e6   :  { %v4000_v31 = vmax.f32 %v3998_v28, %v3999_v20  ;;  %v4048_v28 = vld [vmem:[%s7843_s11 + $0x50] sm:$0xff] }
0x12e7   :  { %v3985_v46 = vpop.f32.mrb[92].mxu0  ;;  %v4009_v10 = vmax.f32 %v4007_v9, %v4008_v29  ;;  %v4060_v29 = vld [vmem:[%s7843_s11 + $0xb0] sm:$0xff] }
0x12e8   :  { %v3986_v34 = vadd.f32 %v3985_v46, %v3834_v56  ;;  %v3987_v48 = vpop.f32.mrb[93].mxu0  ;;  %v4001_v26 = vrot.slane %v4000_v31, 1  ;;  %v4046_v46 = vld [vmem:[%s7843_s11 + $0x40] sm:$0xff] }
0x12e9   :  { %v3988_v45 = vadd.f32 %v3987_v48, %v3838_v15  ;;  %v3989_v57 = vpop.f32.mrb[94].mxu0  ;;  %v4010_v17 = vrot.slane %v4009_v10, 1  ;;  %v5525_v48 = vpack.c.bf16 %v4048_v28, %v4046_v46  ;;  %v4086_v28 = vld [vmem:[%s7843_s11 + $0x180] sm:$0xff] }
0x12ea   :  { %v4016_v7 = vmax.f32 %v3976_v35, %v3986_v34  ;;  %v3990_v49 = vadd.f32 %v3989_v57, %v3834_v56  ;;  %v3991_v8 = vpop.f32.mrb[95].mxu0  ;;  %v4002_v5 = vmax.f32 %v4000_v31, %v4001_v26  ;;  %v4051_v35 = vld [vmem:[%s7843_s11 + $0x68] sm:$0xff]  ;;  %v4053_v34 = vld [vmem:[%s7843_s11 + $0x78] sm:$0xff] }
0x12eb   :  { %v4025_v19 = vmax.f32 %v3978_v40, %v3988_v45  ;;  %v3992_v4 = vadd.f32 %v3991_v8, %v3838_v15  ;;  %v4011_v33 = vmax.f32 %v4009_v10, %v4010_v17  ;;  %v5527_v9 = vpack.c.bf16 %v4053_v34, %v4051_v35  ;;  %v4050_v40 = vld [vmem:[%s7843_s11 + $0x60] sm:$0xff]  ;;  %v4052_v45 = vld [vmem:[%s7843_s11 + $0x70] sm:$0xff]  ;;  %v4057_v57 = vld [vmem:[%s7843_s11 + $0x98] sm:$0xff] }
0x12ec   :  { %v4017_v3 = vmax.f32 %v3980_v58, %v3990_v49  ;;  %v4012_v38 = vmul.f32 %v4002_v5, %v7242_v53  ;;  %v5529_v58 = vpack.c.bf16 %v4052_v45, %v4050_v40  ;;  %v4054_v49 = vld [vmem:[%s7843_s11 + $0x80] sm:$0xff]  ;;  %v4056_v8 = vld [vmem:[%s7843_s11 + $0x90] sm:$0xff]  ;;  %v4071_v17 = vld [vmem:[%s7843_s11 + $0x108] sm:$0xff] }
0x12ed   :  { %v4026_v63 = vmax.f32 %v3982_v13, %v3992_v4  ;;  %v4013_v37 = vmul.f32 %v4011_v33, %v7242_v53  ;;  %v5521_v53 = vpack.c.bf16 %v4044_v41, %v4042_v47  ;;  %v4059_v13 = vld [vmem:[%s7843_s11 + $0xa8] sm:$0xff]  ;;  %v5533_v4 = vpack.c.bf16 %v4056_v8, %v4054_v49  ;;  %v4064_v10 = vld [vmem:[%s7843_s11 + $0xd0] sm:$0xff]  ;;  %v4082_v41 = vld [vmem:[%s7843_s11 + $0x160] sm:$0xff] }
0x12ee   :  { %v4018_v23 = vmax.f32 %v4016_v7, %v4017_v3  ;;  %v4058_v3 = vld [vmem:[%s7843_s11 + $0xa0] sm:$0xff]  ;;  %v4072_v33 = vld [vmem:[%s7843_s11 + $0x110] sm:$0xff]  ;;  %v4091_v34 = vld [vmem:[%s7843_s11 + $0x1a8] sm:$0xff] }
0x12ef   :  { %v4027_v30 = vmax.f32 %v4025_v19, %v4026_v63  ;;  %v4061_v19 = vld [vmem:[%s7843_s11 + $0xb8] sm:$0xff]  ;;  %v4063_v63 = vld [vmem:[%s7843_s11 + $0xc8] sm:$0xff]  ;;  %v4088_v35 = vld [vmem:[%s7843_s11 + $0x190] sm:$0xff] }
0x12f0   :  { %v4019_v24 = vrot.slane %v4018_v23, 4  ;;  %v5535_v20 = vpack.c.bf16 %v4061_v19, %v4059_v13  ;;  %v4090_v45 = vld [vmem:[%s7843_s11 + $0x1a0] sm:$0xff]  ;;  %v4096_v13 = vld [vmem:[%s7843_s11 + $0x1d0] sm:$0xff]  ;;  %v4099_v19 = vld [vmem:[%s7843_s11 + $0x1e8] sm:$0xff] }
0x12f1   :  { %v4028_v22 = vrot.slane %v4027_v30, 4  ;;  %v4094_v8 = vld [vmem:[%s7843_s11 + $0x1c0] sm:$0xff] }
0x12f2   :  { %v4020_v14 = vmax.f32 %v4018_v23, %v4019_v24  ;;  %v4065_v23 = vld [vmem:[%s7843_s11 + $0xd8] sm:$0xff]  ;;  %v4062_v24 = vld [vmem:[%s7843_s11 + $0xc0] sm:$0xff] }
0x12f3   :  { %v4029_v16 = vmax.f32 %v4027_v30, %v4028_v22  ;;  %v5537_v30 = vpack.c.bf16 %v4060_v29, %v4058_v3  ;;  %v5539_v31 = vpack.c.bf16 %v4065_v23, %v4063_v63  ;;  %v4067_v22 = vld [vmem:[%s7843_s11 + $0xe8] sm:$0xff]  ;;  %v4098_v29 = vld [vmem:[%s7843_s11 + $0x1e0] sm:$0xff]  ;;  %v4100_v63 = vld [vmem:[%s7843_s11 + $0x1f0] sm:$0xff] }
0x12f4   :  { %v4021_v56 = vrot.slane %v4020_v14, 2  ;;  %v5577_v23 = vpack.c.bf16 %v4100_v63, %v4098_v29 }
0x12f5   :  { %v4030_v12 = vrot.slane %v4029_v16, 2 }
0x12f6   :  { %v4022_v15 = vmax.f32 %v4020_v14, %v4021_v56  ;;  %v4069_v14 = vld [vmem:[%s7843_s11 + $0xf8] sm:$0xff]  ;;  %v4066_v56 = vld [vmem:[%s7843_s11 + $0xe0] sm:$0xff] }
0x12f7   :  { %v4031_v1 = vmax.f32 %v4029_v16, %v4030_v12  ;;  %v5541_v16 = vpack.c.bf16 %v4064_v10, %v4062_v24  ;;  %v5543_v26 = vpack.c.bf16 %v4069_v14, %v4067_v22  ;;  %v4068_v12 = vld [vmem:[%s7843_s11 + $0xf0] sm:$0xff]  ;;  %v4355_v22 = vld [vmem:[%s7844_s12 + $0xf8] sm:$0xff] }
0x12f8   :  { %v4023_v55 = vrot.slane %v4022_v15, 1  ;;  %v4354_v10 = vld [vmem:[%s7844_s12 + $0xf0] sm:$0xff] }
0x12f9   :  { %v4032_v52 = vrot.slane %v4031_v1, 1  ;;  %v5607_v14 = vpack.c.bf16 %v4355_v22, %v4354_v10 }
0x12fa   :  { %v4024_v50 = vmax.f32 %v4022_v15, %v4023_v55  ;;  %v4073_v15 = vld [vmem:[%s7843_s11 + $0x118] sm:$0xff]  ;;  %v4070_v55 = vld [vmem:[%s7843_s11 + $0x100] sm:$0xff] }
0x12fb   :  { %v4033_v59 = vmax.f32 %v4031_v1, %v4032_v52  ;;  %v5545_v1 = vpack.c.bf16 %v4068_v12, %v4066_v56  ;;  %v5547_v5 = vpack.c.bf16 %v4073_v15, %v4071_v17  ;;  %v4075_v52 = vld [vmem:[%s7843_s11 + $0x128] sm:$0xff]  ;;  %v4308_v12 = vld [vmem:[%s7846_s4] sm:$0x3] }
0x12fc   :  { %v4034_v32 = vmul.f32 %v4024_v50, %v7245_v54  ;;  %v4077_v50 = vld [vmem:[%s7843_s11 + $0x138] sm:$0xff]  ;;  %v4313_v17 = vrot.slane %v4308_v12, %v7232_v62  ;;  %v4317_v15 = vrot.slane %v4308_v12, %v7235_v6  ;;  %v4438_v62 = vld [vmem:[#allocation47 + $0x20] sm:$0xff] }
0x12fd   :  { %v4035_v51 = vmul.f32 %v4033_v59, %v7245_v54  ;;  %v5523_v54 = vpack.c.bf16 %v4049_v0, %v4047_v39  ;;  %v5549_v59 = vpack.c.bf16 %v4072_v33, %v4070_v55  ;;  %v4084_v39 = vld [vmem:[%s7843_s11 + $0x170] sm:$0xff]  ;;  %v4087_v0 = vld [vmem:[%s7843_s11 + $0x188] sm:$0xff]  ;;  %v4435_v33 = vld [vmem:[#allocation47 + $0x8] sm:$0xff] }
0x12fe   :  { %v4036_v42 = vadd.f32 %v4034_v32, %v4012_v38  ;;  %v5551_v38 = vpack.c.bf16 %v4077_v50, %v4075_v52  ;;  %v4074_v32 = vld [vmem:[%s7843_s11 + $0x120] sm:$0xff]  ;;  %v4434_v55 = vld [vmem:[#allocation47] sm:$0xff]  ;;  %v4439_v6 = vld [vmem:[#allocation47 + $0x28] sm:$0xff] }
0x12ff   :  { %v4037_v43 = vadd.f32 %v4035_v51, %v4013_v37  ;;  %v4081_v37 = vld [vmem:[%s7843_s11 + $0x158] sm:$0xff]  ;;  %v5553_v51 = vpack.c.bf16 %v4076_v36, %v4074_v32  ;;  %v4436_v32 = vld [vmem:[#allocation47 + $0x10] sm:$0xff]  ;;  %v4437_v36 = vld [vmem:[#allocation47 + $0x18] sm:$0xff] }
0x1300   :  { %v5555_v25 = vpack.c.bf16 %v4081_v37, %v4079_v21  ;;  %v5615_v21 = vpack.c.bf16 %v4437_v36, %v4436_v32  ;;  %v5618_v37 = vpack.c.bf16 %v4439_v6, %v4438_v62 }
0x1301   :  { %4230 = vmatprep.mubr.f32.mxu1 %v4037_v43  ;;  %v4083_v43 = vld [vmem:[%s7843_s11 + $0x168] sm:$0xff] }
0x1302   :  { %4231 = vmatmul.mubr.f32.vlgmr.msra.gmra.mrb[54].mxu1 %v4036_v42  ;;  %v4080_v42 = vld [vmem:[%s7843_s11 + $0x150] sm:$0xff] }
0x1303   :  { %5518 = vmatpush1.bf16.msra.mxu1 %v5517_v61  ;;  %4301 = vmatprep.mubr.f32.mxu1 %v7479_v44  ;;  %v4055_v44 = vld [vmem:[%s7843_s11 + $0x88] sm:$0xff]  ;;  %v4085_v61 = vld [vmem:[%s7843_s11 + $0x178] sm:$0xff] }
0x1304   :  { %5520 = vmatprep.subr.bf16.mxu1 %v5519_v27  ;;  %v5531_v7 = vpack.c.bf16 %v4057_v57, %v4055_v44  ;;  %v5557_v27 = vpack.c.bf16 %v4080_v42, %v4078_v11  ;;  %v5559_v47 = vpack.c.bf16 %v4085_v61, %v4083_v43  ;;  %v4092_v44 = vld [vmem:[%s7843_s11 + $0x1b0] sm:$0xff]  ;;  %v4095_v57 = vld [vmem:[%s7843_s11 + $0x1c8] sm:$0xff]  ;;  %v4785_v43 = vld [vmem:[%s7847_s16] ss:$0 sm:$0xff] }
0x1307   :  { %5522 = vmatpush1.bf16.msra.mxu1 %v5521_v53  ;;  %v4089_v53 = vld [vmem:[%s7843_s11 + $0x198] sm:$0xff] }
0x1308   :  { %5524 = vmatprep.subr.bf16.mxu1 %v5523_v54  ;;  %v5561_v54 = vpack.c.bf16 %v4084_v39, %v4082_v41  ;;  %v5563_v46 = vpack.c.bf16 %v4089_v53, %v4087_v0  ;;  %v4786_v41 = vld [vmem:[%s6920_s17] ss:$0 sm:$0xff]  ;;  %s6691_s17 = smov [#allocation49]  }
0x1309   :  { %s4551_s24 = sshll.u32 %s6691_s17, 4  ;;  %s4552_s24 = int_to_ptr.vmem [resolvable:$true] %s4551_s24 }
0x130a   :  { %s6543_s30 = scalar_lea.vmem %s4552_s24, 32  ;;  %p6548_p3 = scmp.lt.s32.totalorder %s4552_s24, %s4552_s24 }
0x130b   :  { %5526 = vmatpush1.bf16.msra.mxu1 %v5525_v48  ;;  %v4093_v48 = vld [vmem:[%s7843_s11 + $0x1b8] sm:$0xff]  ;;  %p6544_p2 = scmp.ne.s32.totalorder %s4552_s24, %s6543_s30  ;;  %p6549_p4 = scmp.lt.s32.totalorder %s6543_s30, %s6543_s30 }
0x130c   :  { %5528 = vmatprep.subr.bf16.mxu1 %v5527_v9  ;;  %v5565_v9 = vpack.c.bf16 %v4088_v35, %v4086_v28  ;;  %v5567_v40 = vpack.c.bf16 %v4093_v48, %v4091_v34 }
0x130d   :  { %p6550_p5 = por %p6549_p4, %p6548_p3 }
0x130f   :  { %5530 = vmatpush1.bf16.msra.mxu1 %v5529_v58  ;;  %v4097_v58 = vld [vmem:[%s7843_s11 + $0x1d8] sm:$0xff]  ;;  %p6551_p6 = pnand %p6550_p5, %p6544_p2 }
0x1310   :  { %5532 = vmatprep.subr.bf16.mxu1 %v5531_v7  ;;  %v5569_v7 = vpack.c.bf16 %v4092_v44, %v4090_v45  ;;  %v5571_v49 = vpack.c.bf16 %v4097_v58, %v4095_v57 }
0x1313   :  { %5534 = vmatpush1.bf16.msra.mxu1 %v5533_v4  ;;  %v4101_v4 = vld [vmem:[%s7843_s11 + $0x1f8] sm:$0xff] }
0x1314   :  { %5536 = vmatprep.subr.bf16.mxu1 %v5535_v20  ;;  %v5573_v20 = vpack.c.bf16 %v4096_v13, %v4094_v8  ;;  %v5575_v3 = vpack.c.bf16 %v4101_v4, %v4099_v19 }
0x1317   :  { %5538 = vmatpush1.bf16.msra.mxu1 %v5537_v30  ;;  %v4336_v30 = vld [vmem:[%s7844_s12 + $0x60] sm:$0xff] }
0x1318   :  { %5540 = vmatprep.subr.bf16.mxu1 %v5539_v31  ;;  %v4337_v31 = vld [vmem:[%s7844_s12 + $0x68] sm:$0xff] }
0x1319   :  { %v5605_v24 = vpack.c.bf16 %v4337_v31, %v4336_v30 }
0x131b   :  { %5542 = vmatpush1.bf16.msra.mxu1 %v5541_v16  ;;  %5606 = vmatpush3.bf16.msra.mxu0 %v5605_v24  ;;  %v4338_v16 = vld [vmem:[%s7844_s12 + $0x70] sm:$0xff] }
0x131c   :  { %5544 = vmatprep.subr.bf16.mxu1 %v5543_v26  ;;  %v4339_v26 = vld [vmem:[%s7844_s12 + $0x78] sm:$0xff]  ;;  %5608 = vmatprep.subr.bf16.mxu0 %v5607_v14 }
0x131d   :  { %v5609_v56 = vpack.c.bf16 %v4339_v26, %v4338_v16 }
0x131f   :  { %5546 = vmatpush1.bf16.msra.mxu1 %v5545_v1  ;;  %5610 = vmatpush3.bf16.msra.mxu0 %v5609_v56 }
0x1320   :  { %5548 = vmatprep.subr.bf16.mxu1 %v5547_v5  ;;  %5611 = vmatprep.subr.bf16.mxu0 %v6683_v60 }
0x1323   :  { %5550 = vmatpush1.bf16.msra.mxu1 %v5549_v59  ;;  %v5612_v59 = vpack.c.bf16 %v4435_v33, %v4434_v55 }
0x1324   :  { %5552 = vmatprep.subr.bf16.mxu1 %v5551_v38 }
0x1327   :  { %5554 = vmatpush1.bf16.msra.mxu1 %v5553_v51  ;;  %v4440_v51 = vld [vmem:[#allocation47 + $0x30] sm:$0xff] }
0x1328   :  { %5556 = vmatprep.subr.bf16.mxu1 %v5555_v25  ;;  %v4441_v25 = vld [vmem:[#allocation47 + $0x38] sm:$0xff] }
0x1329   :  { %v5621_v11 = vpack.c.bf16 %v4441_v25, %v4440_v51 }
0x132b   :  { %5558 = vmatpush1.bf16.msra.mxu1 %v5557_v27 }
0x132c   :  { %5560 = vmatprep.subr.bf16.mxu1 %v5559_v47 }
0x132f   :  { %5562 = vmatpush1.bf16.msra.mxu1 %v5561_v54 }
0x1330   :  { %5564 = vmatprep.subr.bf16.mxu1 %v5563_v46 }
0x1333   :  { %5566 = vmatpush1.bf16.msra.mxu1 %v5565_v9 }
0x1334   :  { %5568 = vmatprep.subr.bf16.mxu1 %v5567_v40 }
0x1337   :  { %5570 = vmatpush1.bf16.msra.mxu1 %v5569_v7 }
0x1338   :  { %5572 = vmatprep.subr.bf16.mxu1 %v5571_v49 }
0x133b   :  { %5574 = vmatpush1.bf16.msra.mxu1 %v5573_v20 }
0x133c   :  { %5576 = vmatprep.subr.bf16.mxu1 %v5575_v3 }
0x133f   :  { %5578 = vmatpush1.bf16.msra.mxu1 %v5577_v23 }
0x1342   :  { %4302 = vmatmul.mubr.f32.vlgmr.msra.gmra.mrb[54].mxu1 %v7477_v2 }
0x1415   :  { %v4303_v2 = vpop.f32.mrb[54].mxu1 }
0x1416   :  { %v4320_v1 = vadd.f32 %v4313_v17, %v4303_v2  ;;  %v4305_v5 = vpop.f32.mrb[55].mxu1 }
0x1417   :  { %v4321_v52 = vadd.f32 %v4317_v15, %v4305_v5 }
0x1418   :  { %v4322_v38 = vmax.f32 %v4320_v1, 0.0 }
0x1419   :  { %v4323_v50 = vmax.f32 %v4321_v52, 0.0 }
0x141b   :  { %4427 = vmatprep.mubr.f32.mxu0 %v4323_v50 }
0x141c   :  { %4428 = vmatmul.mubr.f32.vlgmr.msra.gmra.mrb[78].mxu0 %v4322_v38 }
0x141d   :  { %5613 = vmatpush3.bf16.msra.mxu0 %v5612_v59  ;;  %5312 = vmatprep.mubr.msk.f32.mxu0 %vm6684_vm7, %v6682_v18 }
0x141e   :  { %5614 = vmatprep.subr.bf16.mxu0 %v6683_v60 }
0x1421   :  { %5616 = vmatpush3.bf16.msra.mxu0 %v5615_v21 }
0x1422   :  { %5617 = vmatprep.subr.bf16.mxu0 %v6683_v60 }
0x1425   :  { %5619 = vmatpush3.bf16.msra.mxu0 %v5618_v37 }
0x1426   :  { %5620 = vmatprep.subr.bf16.mxu0 %v6683_v60 }
0x1429   :  { %5622 = vmatpush3.bf16.msra.mxu0 %v5621_v11 }
0x14ef   :  { %v5028_v42 = vpop.f32.mrb[78].mxu0 }
0x14f0   :  { %v5029_v61 = vpop.f32.mrb[79].mxu0 }
0x14f1   :  { %v5030_v18 = vadd.f32 %v5029_v61, %v5028_v42 }
0x14f3   :  { %v4430_v27 = vadd.f32 %v5030_v18, %v4785_v43 }
0x14f5   :  { %v4433_v47 = vmax.f32 %v4430_v27, 0.0 }
0x14f7   :  { %5313 = vmatmul.mubr.msk.f32.vlgmr.msra.gmra.mrb[96].mxu0 %vm921_vm4, %v4433_v47 }
0x15ca   :  { %v4518_v39 = vpop.f32.mrb[96].mxu0 }
0x15cb   :  { %v4519_v0 = vadd.f32 %v4786_v41, %v4518_v39  ;;  %v5314_v53 = vpop.f32.mrb[97].mxu0 }
0x15cd   :  { %v4523_v54 = vsel %vm4522_vm9, %v4519_v0, -inf }
0x15ce   :  { %v4524_v46 = vrot.slane %v4523_v54, 4 }
0x15d0   :  { %v4525_v60 = vmax.f32 %v4523_v54, %v4524_v46 }
0x15d2   :  { %v4526_v28 = vrot.slane %v4525_v60, 2 }
0x15d4   :  { %v4527_v35 = vmax.f32 %v4525_v60, %v4526_v28 }
0x15d6   :  { %v4528_v34 = vrot.slane %v4527_v35, 1 }
0x15d8   :  { %v4529_v48 = vmax.f32 %v4527_v35, %v4528_v34 }
0x15da   :  { %v4530_v9 = vsub.f32 %v4519_v0, %v4529_v48 }
0x15dc   :  { %v4531_v40 = vmul.f32 1.442695, %v4530_v9 }
0x15de   :  { %5879 = vpow2.f32 %v4531_v40 }
0x15e8   :  { %v5880_v45 = vpop.eup %5879 }
0x15e9   :  { %v4533_v44 = vsel %vm4522_vm9, %v5880_v45, 0.0 }
0x15ea   :  { %v4534_v57 = vrot.slane %v4533_v44, 4 }
0x15ec   :  { %v4535_v58 = vadd.f32 %v4534_v57, %v4533_v44 }
0x15ee   :  { %v4536_v7 = vrot.slane %v4535_v58, 2 }
0x15f0   :  { %v4537_v49 = vadd.f32 %v4536_v7, %v4535_v58 }
0x15f2   :  { %v4538_v8 = vrot.slane %v4537_v49, 1 }
0x15f4   :  { %v4539_v13 = vadd.f32 %v4538_v8, %v4537_v49 }
0x15f6   :  { %5881 = vlog2.f32 %v4539_v13 }
0x1600   :  { %v5882_v19 = vpop.eup %5881 }
0x1601   :  { %v4541_v4 = vmul.f32 0.6931472, %v5882_v19 }
0x1603   :  { %v4542_v20 = vsub.f32 %v4530_v9, %v4541_v4 }
0x1605   :  { %4543 = vst [vmem:[#allocation49] sm:$0x3] %v4542_v20 }
0x1606   :  { %6554 = shalt.err (!%p6551_p6)
}
0x1607   :  { %s6555_s15 = scalar_lea.hbm %s6925_s14, 32 }
0x1608   :  { %p6556_p7 = scmp.ne.s32.totalorder %s6925_s14, %s6555_s15  ;;  %p6559_p8 = scmp.lt.u32.totalorder %s6555_s15, %s6925_s14 }
0x160a   :  { %p6561_p9 = pnand %p6559_p8, %p6556_p7 }
0x160c   :  { %6564 = shalt.err (!%p6561_p9)
}
0x160d   :  { %4554 = dma.vmem_to_hbm [thread:$0]  %s4552_s24, 32, %s6925_s14, [#allocation4]  }
0x160e   :  { %6597 = dma.done.wait [#allocation4], 32  }
0x160f   :  { %6598 = vsyncadd [#allocation4], 4294967264 }
0x1610   :  { %4562 = vsyncpa [#allocation3], 1 }
0x1611   :  { %4563 = vsyncpa [#allocation6], 1 }
0x1612   :  { %4564 = vsyncpa [#allocation9], 1 }
0x1613   :  { %4565 = vsyncpa [#allocation12], 1 }
0x1614   :  { %4566 = vsyncpa [#allocation15], 1 }
0x1615   :  { %4567 = vsyncpa [#allocation18], 1 }
0x1616   :  { %4568 = vsyncpa [#allocation21], 1 }
0x1617   :  { %4569 = vsyncpa [#allocation24], 1 }
0x1618   :  { %4570 = vsyncpa [#allocation27], 1 }
0x1619   :  { %4571 = vsyncpa [#allocation30], 1 }
0x161a   :  { %4572 = vsyncpa [#allocation33], 1 }
0x161b   :  { %4573 = vsyncpa [#allocation36], 1 }
0x161c   :  { %4574 = vsyncpa [#allocation39], 1 }
0x161d   :  { %4575 = vsyncpa [#allocation42], 1 }
0x161e   :  { %4576 = vsyncpa [#allocation45], 1 }
0x161f   :  { %4577 = vsyncpa [#allocation48], 1 }
0x1620   :  { %4578 = vsyncpa [#allocation4], 1 }

</bundles_post_ra>
